<compile_context>
chip_gen: v5e
topology: v5e:2x2
jax: 0.10.0
libtpu: 0.0.40
codegen_flags: <defaults>
</compile_context>

<pallas_src>
import math
import functools

import numpy as np
import jax
import jax.numpy as jnp
from jax import lax
from jax.experimental import pallas as pl
from jax.experimental.pallas import tpu as pltpu

# ----------------------------- configuration --------------------------------
DIM = 32              # model dim
HEADS = 4             # self-attention heads (CrossTransformer kwarg `heads`)
CROSS_HEADS = 8       # CrossAttention keeps its default heads=8 (faithful to source)
DIM_HEAD = 16         # CrossTransformer kwarg `dim_head`
DEPTH = 2
FF_MULT = 4
FF_INNER = FF_MULT * DIM
MAX_TEXT_LEN = 32
MASK_HW = 64          # input_mask is (b, 64, 64) -> 4096, fixed by MLP(4096, dim)
HID = int(2.0 * DIM)  # MLP hidden (expansion_factor=2.0)
NUM_BUCKETS = 32
MAX_DISTANCE = 128
LN_EPS = 1e-5         # float32 branch of LayerNorm
COS_SIM_SCALE = 16.0  # Attention(cosine_sim=True) scale


# ----------------------- in-kernel math helpers -----------------------------
def _dot(a, b):
    return jnp.dot(a, b, preferred_element_type=jnp.float32)


def _ln(x, g, eps=LN_EPS):
    # variance as E[x^2] - mean^2: two independent lane reductions (shorter dep chain)
    mean = jnp.mean(x, axis=-1, keepdims=True)
    msq = jnp.mean(x * x, axis=-1, keepdims=True)
    var = msq - mean * mean
    return (x - mean) * lax.rsqrt(var + eps) * g


def _sigmoid(x):
    return 1.0 / (1.0 + jnp.exp(-x))   # exact reciprocal (accuracy over EUP trick)


def _silu(x):
    return x * _sigmoid(x)


def _folded_attention(q2, k2, v2, nk_mat, nv_mat, lift_k, mask_v, sum_keys, expand_h,
                      bias=None, bias0=None):
    """Multi-head attention with the head dim folded into the lane axis.

    q2: (nq, H*dh); k2, v2: (nk, H*dh)  -- head-major lane blocks of size dh.
    nk_mat (H*dh, H) / nv_mat (H, H*dh): block-diag null key / spread null value.
    lift_k (H*nk, nk), mask_v (H*nk, H*dh), sum_keys (H*nk, H), expand_h (H, H*dh):
    constant 0/1 helper matrices (host-precomputed).  Everything stays 2-D.
    """
    kbd_t = _dot(lift_k, k2) * mask_v                 # (H*nk, H*dh) block-diag keys
    vbd = _dot(lift_k, v2) * mask_v                   # (H*nk, H*dh) block-diag values
    sim = _dot(q2, kbd_t.T)                           # (nq, H*nk) per-head logits
    sim0 = _dot(q2, nk_mat)                           # (nq, H)    null-key logits
    if bias is not None:
        sim = sim + bias
        sim0 = sim0 + bias0
    mx = jnp.maximum(jnp.max(sim, axis=-1, keepdims=True),
                     jnp.max(sim0, axis=-1, keepdims=True))
    p = jnp.exp(sim - mx)
    p0 = jnp.exp(sim0 - mx)
    dinv = pl.reciprocal(_dot(p, sum_keys) + p0, approx=True)      # (nq, H)
    num = _dot(p, vbd) + _dot(p0, nv_mat)                          # (nq, H*dh)
    return num * _dot(dinv, expand_h)


# ------------------------------ fused kernel ---------------------------------
def _fused_kernel(img_ref, icond_ref, bvec_ref, mrow_ref,
                  mask_w1_ref, s64_ref, s128_ref, lw64_ref, lw128_ref,
                  out_ref, *, off_s64, off_s128, off_l64, off_l128):

    def s64(name):
        r0, r, c = off_s64[name]
        return s64_ref[r0:r0 + r, :c]

    def s128(name):
        r0, r, c = off_s128[name]
        return s128_ref[r0:r0 + r, :c]

    def l64(layer, name):
        r0, r, c = off_l64[name]
        return lw64_ref[layer, r0:r0 + r, :c]

    def l128(layer, name):
        r0, r, c = off_l128[name]
        return lw128_ref[layer, r0:r0 + r, :c]

    img = img_ref[0]                           # (n_img, dim)
    icond = icond_ref[0]                       # (n_cond, dim)
    bvec = bvec_ref[0]                         # (1, text_len + dim)
    text_row = bvec[:, :MAX_TEXT_LEN]
    sin_row = bvec[:, MAX_TEXT_LEN:]
    mrow = mrow_ref[0]                         # (1, 4096) bf16

    # ---------------- embedders (text / time / mask) -------------------------
    text_emb = _dot(text_row, s64('text_w')) + s64('text_b')                 # (1, dim)

    th = _silu(_dot(sin_row, s64('time_w1')) + s64('time_b1'))
    th = _silu(_dot(th, s64('time_w2')) + s64('time_b2'))
    time_emb = _dot(th, s64('time_w3')) + s64('time_b3')                     # (1, dim)

    mh = _silu(_dot(mrow, mask_w1_ref[...]) + s64('mask_b1'))                # bf16 MXU
    mh = _silu(_dot(mh, s64('mask_w2')) + s64('mask_b2'))
    mask_emb = _dot(mh, s64('mask_w3')) + s64('mask_b3')                     # (1, dim)

    # --- token / context assembly in value space (no partial stores) ---------
    x = jnp.concatenate([img, time_emb], axis=0)                             # (n, dim)
    ctx = jnp.concatenate([text_emb, icond, mask_emb], axis=0)               # (m, dim)

    rs_self = math.sqrt(COS_SIM_SCALE)
    rs_cross = math.sqrt(DIM_HEAD ** -0.5)

    for l in range(DEPTH):
        # ===== self-attention (cosine-sim, multi-query k/v, rel-pos bias) ====
        xn = _ln(x, l64(l, 'a_g'))
        q2 = _dot(xn, l64(l, 'a_wq'))                                        # (n, H*dh)
        kv = _dot(xn, l64(l, 'a_wkv'))                                       # (n, 2*dh)
        k = kv[:, :DIM_HEAD]
        v = kv[:, DIM_HEAD:]
        # per-head l2norm of q (head blocks live in lanes); the reference's
        # q * scale before l2norm is a mathematical no-op and is dropped.
        qsq = _dot(q2 * q2, s64('sumblk_dh_s'))                              # (n, H)
        q2 = q2 * _dot(lax.rsqrt(jnp.maximum(qsq, 1e-24)), s64('expand_h_s')) * rs_self
        k = k * lax.rsqrt(jnp.maximum(jnp.sum(k * k, axis=-1, keepdims=True),
                                      1e-24)) * rs_self
        k2 = _dot(k, s64('spread_dh_s'))       # shared k spread to every head block
        v2 = _dot(v, s64('spread_dh_s'))
        o = _folded_attention(
            q2, k2, v2, l64(l, 'a_nk'), l64(l, 'a_nv'),
            s64('lift_k_s'), s64('mask_v_s'), s64('sumkeys_s'), s64('expand_h_s'),
            bias=s64('bias_fold'), bias0=s64('bias_null'))
        x = _ln(_dot(o, l64(l, 'a_wo')), l64(l, 'a_go')) + x

        # ===== cross-attention over the context =====
        xn = _ln(x, l64(l, 'c_g'))
        q2 = _dot(xn, l128(l, 'c_wq')) * rs_cross                            # (n, CH*dh)
        k2 = _dot(ctx, l128(l, 'c_wk')) * rs_cross                           # (m, CH*dh)
        v2 = _dot(ctx, l128(l, 'c_wv'))                                      # (m, CH*dh)
        o = _folded_attention(
            q2, k2, v2, l64(l, 'c_nk'), l128(l, 'c_nv'),
            s64('lift_k_c'), s128('mask_v_c'), s64('sumkeys_c'), s128('expand_h_c'))
        x = _ln(_dot(o, l64(l, 'c_wo')), l64(l, 'c_go')) + x

        # ===== SwiGLU feed-forward =====
        xn = _ln(x, l64(l, 'f_g'))
        hid = _dot(xn, l128(l, 'f_w1x')) * _silu(_dot(xn, l128(l, 'f_w1g')))
        x = _dot(hid, l64(l, 'f_w2')) + x

    # ---- final stable LayerNorm + projection; only token 0 is emitted -------
    x0 = x[0:1, :]
    # TODO(synk): faithful to LayerNorm(stable=True): divides by amax (may be <= 0).
    x0 = x0 / jnp.max(x0, axis=-1, keepdims=True)
    out_ref[0] = _dot(_ln(x0, s64('final_g')), s64('final_wp'))


# ------------------------------ glue: RelPosBias ------------------------------
def rel_pos_bias(emb_table, i, j, num_buckets=NUM_BUCKETS, max_distance=MAX_DISTANCE):
    q_pos = jnp.arange(i, dtype=jnp.int32)
    k_pos = jnp.arange(j, dtype=jnp.int32)
    rel_pos = k_pos[None, :] - q_pos[:, None]
    nrel = jnp.maximum(-rel_pos, 0)
    max_exact = num_buckets // 2
    is_small = nrel < max_exact
    val_if_large = max_exact + (
        jnp.log(jnp.maximum(nrel, 1).astype(jnp.float32) / max_exact)
        / math.log(max_distance / max_exact) * (num_buckets - max_exact)
    ).astype(jnp.int32)
    val_if_large = jnp.minimum(val_if_large, num_buckets - 1)
    bucket = jnp.where(is_small, nrel, val_if_large)
    values = emb_table[bucket]                      # (i, j, heads)
    return jnp.transpose(values, (2, 0, 1))         # (heads, i, j)


# ------------------------ host-side packing helpers --------------------------
def _pack_slab(entries, width):
    """Pack (name, array) pairs into one (R, width) f32 slab, 8-row aligned."""
    parts, offsets, row = [], {}, 0
    for name, arr in entries:
        arr = jnp.asarray(arr, jnp.float32)
        if arr.ndim == 1:
            arr = arr[None, :]
        r, c = arr.shape
        rp = ((r + 7) // 8) * 8
        block = jnp.zeros((rp, width), jnp.float32).at[:r, :c].set(arr)
        parts.append(block)
        offsets[name] = (row, r, c)
        row += rp
    return jnp.concatenate(parts, axis=0), offsets


def _eqmat(rows_idx, cols_idx):
    return np.equal.outer(rows_idx, cols_idx).astype(np.float32)


def _attn_consts(nheads, dh, nkeys):
    lift = _eqmat(np.arange(nheads * nkeys) % nkeys, np.arange(nkeys))
    mask_v = _eqmat(np.arange(nheads * nkeys) // nkeys, np.arange(nheads * dh) // dh)
    sum_keys = _eqmat(np.arange(nheads * nkeys) // nkeys, np.arange(nheads))
    expand_h = _eqmat(np.arange(nheads), np.arange(nheads * dh) // dh)
    return lift, mask_v, sum_keys, expand_h


# ------------------------------ parameters -----------------------------------
def init_params(key):
    keys = iter(jax.random.split(key, 64))

    def dense(shape, scale=0.05):
        return scale * jax.random.normal(next(keys), shape, dtype=jnp.float32)

    def ones_g():
        return jnp.ones((1, DIM), jnp.float32)

    inner = HEADS * DIM_HEAD
    cross_inner = CROSS_HEADS * DIM_HEAD

    params = {
        'text_w': dense((MAX_TEXT_LEN, DIM)),
        'text_b': jnp.zeros((1, DIM), jnp.float32),
        'time_mlp': {
            'w1': dense((DIM, HID)), 'b1': jnp.zeros((1, HID), jnp.float32),
            'w2': dense((HID, HID)), 'b2': jnp.zeros((1, HID), jnp.float32),
            'w3': dense((HID, DIM)), 'b3': jnp.zeros((1, DIM), jnp.float32),
        },
        'mask_mlp': {
            # bf16 weight: halves the only HBM-significant transfer (bf16 MXU, f32 acc)
            'w1': dense((MASK_HW * MASK_HW, HID)).astype(jnp.bfloat16),
            'b1': jnp.zeros((1, HID), jnp.float32),
            'w2': dense((HID, HID)), 'b2': jnp.zeros((1, HID), jnp.float32),
            'w3': dense((HID, DIM)), 'b3': jnp.zeros((1, DIM), jnp.float32),
        },
        'relpos_emb': dense((NUM_BUCKETS, HEADS), scale=0.02),
        'layers': [],
        'final_g': ones_g(),
        'final_wp': dense((DIM, DIM)),
    }
    for _ in range(DEPTH):
        params['layers'].append({
            'attn': {
                'g': ones_g(),
                'wq': dense((DIM, inner)),
                'wkv': dense((DIM, 2 * DIM_HEAD)),
                'null_kv': dense((2, DIM_HEAD), scale=1.0),
                'wo': dense((inner, DIM)),
                'go': ones_g(),
            },
            'cross': {
                'g': ones_g(),
                'wq': dense((DIM, cross_inner)),
                'wkv': dense((DIM, 2 * cross_inner)),
                'null_kv': dense((2, DIM_HEAD), scale=1.0),
                'wo': dense((cross_inner, DIM)),
                'go': ones_g(),
            },
            'ff': {
                'g': ones_g(),
                'w1': dense((DIM, 2 * FF_INNER)),
                'w2': dense((FF_INNER, DIM)),
            },
        })
    return params


# ------------------------------ forward ---------------------------------------
@jax.jit
def compodiff_forward(params, image_embed, image_cond, text_cond, input_mask,
                      diffusion_timesteps):
    b, n_img, dim = image_embed.shape
    n_cond = image_cond.shape[1]
    n = n_img + 1          # tokens = image_embed ++ time_embed
    m = n_cond + 2         # context = text ++ image_cond ++ mask
    assert dim == DIM

    # sinusoidal time embedding (tiny, stays in the jitted XLA prologue)
    half = dim // 2
    t = diffusion_timesteps.astype(jnp.float32)
    freqs = jnp.exp(jnp.arange(half, dtype=jnp.float32)
                    * -(math.log(10000.0) / (half - 1)))
    ang = t[:, None] * freqs[None, :]
    sinusoid = jnp.concatenate([jnp.sin(ang), jnp.cos(ang)], axis=-1)        # (b, dim)

    # relative position bias, folded to the head-in-lanes layout
    attn_bias = rel_pos_bias(params['relpos_emb'], n, n + 1)                 # (H, n, n+1)
    bias_null = jnp.transpose(attn_bias[:, :, 0], (1, 0))                    # (n, H)
    bias_fold = jnp.transpose(attn_bias[:, :, 1:], (1, 0, 2)).reshape(n, HEADS * n)

    # constant 0/1 head-folding helper matrices
    lift_s, mask_v_s, sumkeys_s, expand_h_s = _attn_consts(HEADS, DIM_HEAD, n)
    lift_c, mask_v_c, sumkeys_c, expand_h_c = _attn_consts(CROSS_HEADS, DIM_HEAD, m)
    spread_dh_s = _eqmat(np.arange(DIM_HEAD), np.arange(HEADS * DIM_HEAD) % DIM_HEAD)
    sumblk_dh_s = _eqmat(np.arange(HEADS * DIM_HEAD) // DIM_HEAD, np.arange(HEADS))

    tm, mm = params['time_mlp'], params['mask_mlp']
    slab64, off_s64 = _pack_slab([
        ('text_w', params['text_w']), ('text_b', params['text_b']),
        ('time_w1', tm['w1']), ('time_b1', tm['b1']),
        ('time_w2', tm['w2']), ('time_b2', tm['b2']),
        ('time_w3', tm['w3']), ('time_b3', tm['b3']),
        ('mask_b1', mm['b1']),
        ('mask_w2', mm['w2']), ('mask_b2', mm['b2']),
        ('mask_w3', mm['w3']), ('mask_b3', mm['b3']),
        ('final_g', params['final_g']), ('final_wp', params['final_wp']),
        ('bias_fold', bias_fold), ('bias_null', bias_null),
        ('lift_k_s', lift_s), ('mask_v_s', mask_v_s),
        ('sumkeys_s', sumkeys_s), ('expand_h_s', expand_h_s),
        ('spread_dh_s', spread_dh_s), ('sumblk_dh_s', sumblk_dh_s),
        ('lift_k_c', lift_c), ('sumkeys_c', sumkeys_c),
    ], 64)
    slab128, off_s128 = _pack_slab([
        ('mask_v_c', mask_v_c), ('expand_h_c', expand_h_c),
    ], 128)

    inner_c = CROSS_HEADS * DIM_HEAD
    eye_h = np.eye(HEADS, dtype=np.float32)
    eye_ch = np.eye(CROSS_HEADS, dtype=np.float32)
    rs_self = math.sqrt(COS_SIM_SCALE)
    rs_cross = math.sqrt(DIM_HEAD ** -0.5)

    def layer64_entries(lp):
        a, c, f = lp['attn'], lp['cross'], lp['ff']
        nk, nv = a['null_kv'][0], a['null_kv'][1]
        nk_hat = nk * lax.rsqrt(jnp.maximum(jnp.sum(nk * nk), 1e-24)) * rs_self
        nk_c = c['null_kv'][0]
        return [
            ('a_g', a['g']), ('a_go', a['go']),
            ('a_wq', a['wq']), ('a_wkv', a['wkv']), ('a_wo', a['wo']),
            ('a_nk', jnp.kron(eye_h, nk_hat[:, None])),                # (H*dh, H)
            ('a_nv', jnp.kron(eye_h, nv[None, :])),                    # (H, H*dh)
            ('c_g', c['g']), ('c_go', c['go']),
            ('c_wo', c['wo']),
            ('c_nk', jnp.kron(eye_ch, (nk_c * rs_cross)[:, None])),    # (CH*dh, CH)
            ('f_g', f['g']), ('f_w2', f['w2']),
        ]

    def layer128_entries(lp):
        c, f = lp['cross'], lp['ff']
        nv_c = c['null_kv'][1]
        return [
            ('c_wq', c['wq']),
            ('c_wk', c['wkv'][:, :inner_c]),
            ('c_wv', c['wkv'][:, inner_c:]),
            ('c_nv', jnp.kron(eye_ch, nv_c[None, :])),                 # (CH, CH*dh)
            ('f_w1x', f['w1'][:, :FF_INNER]),
            ('f_w1g', f['w1'][:, FF_INNER:]),
        ]

    l64_slabs, l128_slabs, off_l64, off_l128 = [], [], None, None
    for lp in params['layers']:
        s, off_l64 = _pack_slab(layer64_entries(lp), 64)
        l64_slabs.append(s)
        s, off_l128 = _pack_slab(layer128_entries(lp), 128)
        l128_slabs.append(s)
    lw64 = jnp.stack(l64_slabs, axis=0)          # (DEPTH, R64, 64)
    lw128 = jnp.stack(l128_slabs, axis=0)        # (DEPTH, R128, 128)

    # per-batch data, 3-D so the batch grid can block them
    img3 = image_embed.astype(jnp.float32)
    icond3 = image_cond.astype(jnp.float32)
    bvec = jnp.concatenate(
        [text_cond.astype(jnp.float32).reshape(b, 1, MAX_TEXT_LEN),
         sinusoid.reshape(b, 1, dim)], axis=-1)                        # (b, 1, 64)
    mrow = input_mask.astype(jnp.bfloat16).reshape(b, 1, MASK_HW * MASK_HW)

    kernel = functools.partial(_fused_kernel, off_s64=off_s64, off_s128=off_s128,
                               off_l64=off_l64, off_l128=off_l128)

    def batch3(shape):
        return pl.BlockSpec(shape, lambda i: (i, 0, 0))

    def resident2(shape):
        return pl.BlockSpec(shape, lambda i: (0, 0))

    def resident3(shape):
        return pl.BlockSpec(shape, lambda i: (0, 0, 0))

    out = pl.pallas_call(
        kernel,
        out_shape=jax.ShapeDtypeStruct((b, 1, dim), jnp.float32),
        grid=(b,),
        in_specs=[
            batch3((1, n_img, dim)),
            batch3((1, n_cond, dim)),
            batch3((1, 1, MAX_TEXT_LEN + dim)),
            batch3((1, 1, MASK_HW * MASK_HW)),
            resident2(mm['w1'].shape),
            resident2(slab64.shape),
            resident2(slab128.shape),
            resident3(lw64.shape),
            resident3(lw128.shape),
        ],
        out_specs=batch3((1, 1, dim)),
        compiler_params=pltpu.CompilerParams(dimension_semantics=("parallel",)),
    )(img3, icond3, bvec, mrow, mm['w1'], slab64, slab128, lw64, lw128)
    return out                                                          # (b, 1, dim)


# ------------------------------ main ------------------------------------------
if __name__ == "__main__":
    key = jax.random.PRNGKey(0)
    k1, k2, k3, k4, k5 = jax.random.split(key, 5)
    b, n_img, n_cond = 2, 4, 4
    image_embed = jax.random.normal(k1, (b, n_img, DIM), dtype=jnp.float32)
    image_cond = jax.random.normal(k2, (b, n_cond, DIM), dtype=jnp.float32)
    text_cond = jax.random.normal(k3, (b, MAX_TEXT_LEN), dtype=jnp.float32)
    input_mask = (jax.random.uniform(k4, (b, MASK_HW, MASK_HW)) > 0.5).astype(jnp.float32)
    diffusion_timesteps = jax.random.uniform(k5, (b,), jnp.float32, 0.0, 1000.0)

    params = init_params(jax.random.PRNGKey(42))

    out = compodiff_forward(params, image_embed, image_cond, text_cond, input_mask,
                            diffusion_timesteps)
    out = jax.block_until_ready(out)
    assert out.shape == (b, 1, DIM), out.shape
    assert bool(jnp.all(jnp.isfinite(out)))
    print("KERNEL_OK")
</pallas_src>

<mosaic_0001>
module attributes {stable_mosaic.version = 11 : i64} {
  func.func @_fused_kernel(%arg0: i32, %arg1: memref<1x4x32xf32, #tpu.memory_space<vmem>>, %arg2: memref<1x4x32xf32, #tpu.memory_space<vmem>>, %arg3: memref<1x1x64xf32, #tpu.memory_space<vmem>>, %arg4: memref<1x1x4096xbf16, #tpu.memory_space<vmem>>, %arg5: memref<4096x64xbf16, #tpu.memory_space<vmem>>, %arg6: memref<688x64xf32, #tpu.memory_space<vmem>>, %arg7: memref<56x128xf32, #tpu.memory_space<vmem>>, %arg8: memref<2x624x64xf32, #tpu.memory_space<vmem>>, %arg9: memref<2x168x128xf32, #tpu.memory_space<vmem>>, %arg10: memref<1x1x32xf32, #tpu.memory_space<vmem>>) attributes {dimension_semantics = [#tpu.dimension_semantics<parallel>], iteration_bounds = array<i64: 2>, scalar_prefetch = 0 : i64, scratch_operands = 0 : i64, tpu.core_type = #tpu.core_type<tc>, window_params = [{transform_indices = @transform_0, window_bounds = array<i64: 1, 4, 32>}, {transform_indices = @transform_1, window_bounds = array<i64: 1, 4, 32>}, {transform_indices = @transform_2, window_bounds = array<i64: 1, 1, 64>}, {transform_indices = @transform_3, window_bounds = array<i64: 1, 1, 4096>}, {pipeline_mode = #tpu.pipeline_mode<synchronous>, transform_indices = @transform_4, window_bounds = array<i64: 4096, 64>}, {pipeline_mode = #tpu.pipeline_mode<synchronous>, transform_indices = @transform_5, window_bounds = array<i64: 688, 64>}, {pipeline_mode = #tpu.pipeline_mode<synchronous>, transform_indices = @transform_6, window_bounds = array<i64: 56, 128>}, {pipeline_mode = #tpu.pipeline_mode<synchronous>, transform_indices = @transform_7, window_bounds = array<i64: 2, 624, 64>}, {pipeline_mode = #tpu.pipeline_mode<synchronous>, transform_indices = @transform_8, window_bounds = array<i64: 2, 168, 128>}, {transform_indices = @transform_9, window_bounds = array<i64: 1, 1, 32>}]} {
    %c0 = arith.constant 0 : index
    %c0_0 = arith.constant 0 : index
    %c0_1 = arith.constant 0 : index
    %0 = vector.load %arg1[%c0, %c0_0, %c0_1] : memref<1x4x32xf32, #tpu.memory_space<vmem>>, vector<1x4x32xf32>
    %1 = vector.shape_cast %0 : vector<1x4x32xf32> to vector<4x32xf32>
    %c0_2 = arith.constant 0 : index
    %c0_3 = arith.constant 0 : index
    %c0_4 = arith.constant 0 : index
    %2 = vector.load %arg2[%c0_2, %c0_3, %c0_4] : memref<1x4x32xf32, #tpu.memory_space<vmem>>, vector<1x4x32xf32>
    %3 = vector.shape_cast %2 : vector<1x4x32xf32> to vector<4x32xf32>
    %c0_5 = arith.constant 0 : index
    %c0_6 = arith.constant 0 : index
    %c0_7 = arith.constant 0 : index
    %4 = vector.load %arg3[%c0_5, %c0_6, %c0_7] : memref<1x1x64xf32, #tpu.memory_space<vmem>>, vector<1x1x64xf32>
    %5 = vector.shape_cast %4 : vector<1x1x64xf32> to vector<1x64xf32>
    %6 = vector.extract_strided_slice %5 {offsets = [0, 0], sizes = [1, 32], strides = [1, 1]} : vector<1x64xf32> to vector<1x32xf32>
    %7 = vector.extract_strided_slice %5 {offsets = [0, 32], sizes = [1, 32], strides = [1, 1]} : vector<1x64xf32> to vector<1x32xf32>
    %c0_8 = arith.constant 0 : index
    %c0_9 = arith.constant 0 : index
    %c0_10 = arith.constant 0 : index
    %8 = vector.load %arg4[%c0_8, %c0_9, %c0_10] : memref<1x1x4096xbf16, #tpu.memory_space<vmem>>, vector<1x1x4096xbf16>
    %9 = vector.shape_cast %8 : vector<1x1x4096xbf16> to vector<1x4096xbf16>
    %c0_11 = arith.constant 0 : index
    %c0_12 = arith.constant 0 : index
    %10 = vector.load %arg6[%c0_11, %c0_12] : memref<688x64xf32, #tpu.memory_space<vmem>>, vector<32x32xf32>
    %cst = arith.constant dense<0.000000e+00> : vector<1x32xf32>
    %11 = tpu.matmul %6, %10, %cst {dimension_numbers = #tpu.dot_dimension_numbers<[1], [0], [0], [1], [0, 0, 1, 1], [], []>} : vector<1x32xf32>, vector<32x32xf32>, vector<1x32xf32> -> vector<1x32xf32>
    %c32 = arith.constant 32 : index
    %c0_13 = arith.constant 0 : index
    %12 = vector.load %arg6[%c32, %c0_13] : memref<688x64xf32, #tpu.memory_space<vmem>>, vector<1x32xf32>
    %13 = arith.addf %11, %12 : vector<1x32xf32>
    %c40 = arith.constant 40 : index
    %c0_14 = arith.constant 0 : index
    %14 = vector.load %arg6[%c40, %c0_14] : memref<688x64xf32, #tpu.memory_space<vmem>>, vector<32x64xf32>
    %cst_15 = arith.constant dense<0.000000e+00> : vector<1x64xf32>
    %15 = tpu.matmul %7, %14, %cst_15 {dimension_numbers = #tpu.dot_dimension_numbers<[1], [0], [0], [1], [0, 0, 1, 1], [], []>} : vector<1x32xf32>, vector<32x64xf32>, vector<1x64xf32> -> vector<1x64xf32>
    %c72 = arith.constant 72 : index
    %c0_16 = arith.constant 0 : index
    %16 = vector.load %arg6[%c72, %c0_16] : memref<688x64xf32, #tpu.memory_space<vmem>>, vector<1x64xf32>
    %17 = arith.addf %15, %16 : vector<1x64xf32>
    %cst_17 = arith.constant 0.000000e+00 : f32
    %18 = vector.broadcast %cst_17 : f32 to vector<1x64xf32>
    %19 = arith.subf %18, %17 : vector<1x64xf32>
    %20 = math.exp %19 : vector<1x64xf32>
    %cst_18 = arith.constant 1.000000e+00 : f32
    %21 = vector.broadcast %cst_18 : f32 to vector<1x64xf32>
    %22 = arith.addf %21, %20 : vector<1x64xf32>
    %cst_19 = arith.constant 1.000000e+00 : f32
    %23 = vector.broadcast %cst_19 : f32 to vector<1x64xf32>
    %24 = arith.divf %23, %22 : vector<1x64xf32>
    %25 = arith.mulf %17, %24 : vector<1x64xf32>
    %c80 = arith.constant 80 : index
    %c0_20 = arith.constant 0 : index
    %26 = vector.load %arg6[%c80, %c0_20] : memref<688x64xf32, #tpu.memory_space<vmem>>, vector<64x64xf32>
    %cst_21 = arith.constant dense<0.000000e+00> : vector<1x64xf32>
    %27 = tpu.matmul %25, %26, %cst_21 {dimension_numbers = #tpu.dot_dimension_numbers<[1], [0], [0], [1], [0, 0, 1, 1], [], []>} : vector<1x64xf32>, vector<64x64xf32>, vector<1x64xf32> -> vector<1x64xf32>
    %c144 = arith.constant 144 : index
    %c0_22 = arith.constant 0 : index
    %28 = vector.load %arg6[%c144, %c0_22] : memref<688x64xf32, #tpu.memory_space<vmem>>, vector<1x64xf32>
    %29 = arith.addf %27, %28 : vector<1x64xf32>
    %cst_23 = arith.constant 0.000000e+00 : f32
    %30 = vector.broadcast %cst_23 : f32 to vector<1x64xf32>
    %31 = arith.subf %30, %29 : vector<1x64xf32>
    %32 = math.exp %31 : vector<1x64xf32>
    %cst_24 = arith.constant 1.000000e+00 : f32
    %33 = vector.broadcast %cst_24 : f32 to vector<1x64xf32>
    %34 = arith.addf %33, %32 : vector<1x64xf32>
    %cst_25 = arith.constant 1.000000e+00 : f32
    %35 = vector.broadcast %cst_25 : f32 to vector<1x64xf32>
    %36 = arith.divf %35, %34 : vector<1x64xf32>
    %37 = arith.mulf %29, %36 : vector<1x64xf32>
    %c152 = arith.constant 152 : index
    %c0_26 = arith.constant 0 : index
    %38 = vector.load %arg6[%c152, %c0_26] : memref<688x64xf32, #tpu.memory_space<vmem>>, vector<64x32xf32>
    %cst_27 = arith.constant dense<0.000000e+00> : vector<1x32xf32>
    %39 = tpu.matmul %37, %38, %cst_27 {dimension_numbers = #tpu.dot_dimension_numbers<[1], [0], [0], [1], [0, 0, 1, 1], [], []>} : vector<1x64xf32>, vector<64x32xf32>, vector<1x32xf32> -> vector<1x32xf32>
    %c216 = arith.constant 216 : index
    %c0_28 = arith.constant 0 : index
    %40 = vector.load %arg6[%c216, %c0_28] : memref<688x64xf32, #tpu.memory_space<vmem>>, vector<1x32xf32>
    %41 = arith.addf %39, %40 : vector<1x32xf32>
    %c0_29 = arith.constant 0 : index
    %c0_30 = arith.constant 0 : index
    %42 = vector.load %arg5[%c0_29, %c0_30] : memref<4096x64xbf16, #tpu.memory_space<vmem>>, vector<4096x64xbf16>
    %cst_31 = arith.constant dense<0.000000e+00> : vector<1x64xf32>
    %43 = tpu.matmul %9, %42, %cst_31 {dimension_numbers = #tpu.dot_dimension_numbers<[1], [0], [0], [1], [0, 0, 1, 1], [], []>} : vector<1x4096xbf16>, vector<4096x64xbf16>, vector<1x64xf32> -> vector<1x64xf32>
    %c224 = arith.constant 224 : index
    %c0_32 = arith.constant 0 : index
    %44 = vector.load %arg6[%c224, %c0_32] : memref<688x64xf32, #tpu.memory_space<vmem>>, vector<1x64xf32>
    %45 = arith.addf %43, %44 : vector<1x64xf32>
    %cst_33 = arith.constant 0.000000e+00 : f32
    %46 = vector.broadcast %cst_33 : f32 to vector<1x64xf32>
    %47 = arith.subf %46, %45 : vector<1x64xf32>
    %48 = math.exp %47 : vector<1x64xf32>
    %cst_34 = arith.constant 1.000000e+00 : f32
    %49 = vector.broadcast %cst_34 : f32 to vector<1x64xf32>
    %50 = arith.addf %49, %48 : vector<1x64xf32>
    %cst_35 = arith.constant 1.000000e+00 : f32
    %51 = vector.broadcast %cst_35 : f32 to vector<1x64xf32>
    %52 = arith.divf %51, %50 : vector<1x64xf32>
    %53 = arith.mulf %45, %52 : vector<1x64xf32>
    %c232 = arith.constant 232 : index
    %c0_36 = arith.constant 0 : index
    %54 = vector.load %arg6[%c232, %c0_36] : memref<688x64xf32, #tpu.memory_space<vmem>>, vector<64x64xf32>
    %cst_37 = arith.constant dense<0.000000e+00> : vector<1x64xf32>
    %55 = tpu.matmul %53, %54, %cst_37 {dimension_numbers = #tpu.dot_dimension_numbers<[1], [0], [0], [1], [0, 0, 1, 1], [], []>} : vector<1x64xf32>, vector<64x64xf32>, vector<1x64xf32> -> vector<1x64xf32>
    %c296 = arith.constant 296 : index
    %c0_38 = arith.constant 0 : index
    %56 = vector.load %arg6[%c296, %c0_38] : memref<688x64xf32, #tpu.memory_space<vmem>>, vector<1x64xf32>
    %57 = arith.addf %55, %56 : vector<1x64xf32>
    %cst_39 = arith.constant 0.000000e+00 : f32
    %58 = vector.broadcast %cst_39 : f32 to vector<1x64xf32>
    %59 = arith.subf %58, %57 : vector<1x64xf32>
    %60 = math.exp %59 : vector<1x64xf32>
    %cst_40 = arith.constant 1.000000e+00 : f32
    %61 = vector.broadcast %cst_40 : f32 to vector<1x64xf32>
    %62 = arith.addf %61, %60 : vector<1x64xf32>
    %cst_41 = arith.constant 1.000000e+00 : f32
    %63 = vector.broadcast %cst_41 : f32 to vector<1x64xf32>
    %64 = arith.divf %63, %62 : vector<1x64xf32>
    %65 = arith.mulf %57, %64 : vector<1x64xf32>
    %c304 = arith.constant 304 : index
    %c0_42 = arith.constant 0 : index
    %66 = vector.load %arg6[%c304, %c0_42] : memref<688x64xf32, #tpu.memory_space<vmem>>, vector<64x32xf32>
    %cst_43 = arith.constant dense<0.000000e+00> : vector<1x32xf32>
    %67 = tpu.matmul %65, %66, %cst_43 {dimension_numbers = #tpu.dot_dimension_numbers<[1], [0], [0], [1], [0, 0, 1, 1], [], []>} : vector<1x64xf32>, vector<64x32xf32>, vector<1x32xf32> -> vector<1x32xf32>
    %c368 = arith.constant 368 : index
    %c0_44 = arith.constant 0 : index
    %68 = vector.load %arg6[%c368, %c0_44] : memref<688x64xf32, #tpu.memory_space<vmem>>, vector<1x32xf32>
    %69 = arith.addf %67, %68 : vector<1x32xf32>
    %70 = tpu.concatenate %1, %41 in 0 : vector<4x32xf32>, vector<1x32xf32> -> vector<5x32xf32>
    %71 = tpu.concatenate %13, %3, %69 in 0 : vector<1x32xf32>, vector<4x32xf32>, vector<1x32xf32> -> vector<6x32xf32>
    %c0_45 = arith.constant 0 : index
    %c0_46 = arith.constant 0 : index
    %c0_47 = arith.constant 0 : index
    %72 = vector.load %arg8[%c0_45, %c0_46, %c0_47] : memref<2x624x64xf32, #tpu.memory_space<vmem>>, vector<1x1x32xf32>
    %73 = vector.shape_cast %72 : vector<1x1x32xf32> to vector<1x32xf32>
    %cst_48 = arith.constant dense<0.000000e+00> : vector<5xf32>
    %74 = vector.multi_reduction <add>, %70, %cst_48 [1] : vector<5x32xf32> to vector<5xf32>
    %75 = vector.shape_cast %74 : vector<5xf32> to vector<5x1xf32>
    %cst_49 = arith.constant 3.200000e+01 : f32
    %76 = vector.broadcast %cst_49 : f32 to vector<5x1xf32>
    %77 = arith.divf %75, %76 : vector<5x1xf32>
    %78 = arith.mulf %70, %70 : vector<5x32xf32>
    %cst_50 = arith.constant dense<0.000000e+00> : vector<5xf32>
    %79 = vector.multi_reduction <add>, %78, %cst_50 [1] : vector<5x32xf32> to vector<5xf32>
    %80 = vector.shape_cast %79 : vector<5xf32> to vector<5x1xf32>
    %cst_51 = arith.constant 3.200000e+01 : f32
    %81 = vector.broadcast %cst_51 : f32 to vector<5x1xf32>
    %82 = arith.divf %80, %81 : vector<5x1xf32>
    %83 = arith.mulf %77, %77 : vector<5x1xf32>
    %84 = arith.subf %82, %83 : vector<5x1xf32>
    %85 = vector.broadcast %77 : vector<5x1xf32> to vector<5x32xf32>
    %86 = arith.subf %70, %85 : vector<5x32xf32>
    %cst_52 = arith.constant 9.99999974E-6 : f32
    %87 = vector.broadcast %cst_52 : f32 to vector<5x1xf32>
    %88 = arith.addf %84, %87 : vector<5x1xf32>
    %89 = math.rsqrt %88 : vector<5x1xf32>
    %90 = vector.broadcast %89 : vector<5x1xf32> to vector<5x32xf32>
    %91 = arith.mulf %86, %90 : vector<5x32xf32>
    %92 = vector.broadcast %73 : vector<1x32xf32> to vector<5x32xf32>
    %93 = arith.mulf %91, %92 : vector<5x32xf32>
    %c0_53 = arith.constant 0 : index
    %c16 = arith.constant 16 : index
    %c0_54 = arith.constant 0 : index
    %94 = vector.load %arg8[%c0_53, %c16, %c0_54] : memref<2x624x64xf32, #tpu.memory_space<vmem>>, vector<1x32x64xf32>
    %95 = vector.shape_cast %94 : vector<1x32x64xf32> to vector<32x64xf32>
    %cst_55 = arith.constant dense<0.000000e+00> : vector<5x64xf32>
    %96 = tpu.matmul %93, %95, %cst_55 {dimension_numbers = #tpu.dot_dimension_numbers<[1], [0], [0], [1], [0, 0, 1, 1], [], []>} : vector<5x32xf32>, vector<32x64xf32>, vector<5x64xf32> -> vector<5x64xf32>
    %c0_56 = arith.constant 0 : index
    %c48 = arith.constant 48 : index
    %c0_57 = arith.constant 0 : index
    %97 = vector.load %arg8[%c0_56, %c48, %c0_57] : memref<2x624x64xf32, #tpu.memory_space<vmem>>, vector<1x32x32xf32>
    %98 = vector.shape_cast %97 : vector<1x32x32xf32> to vector<32x32xf32>
    %cst_58 = arith.constant dense<0.000000e+00> : vector<5x32xf32>
    %99 = tpu.matmul %93, %98, %cst_58 {dimension_numbers = #tpu.dot_dimension_numbers<[1], [0], [0], [1], [0, 0, 1, 1], [], []>} : vector<5x32xf32>, vector<32x32xf32>, vector<5x32xf32> -> vector<5x32xf32>
    %100 = vector.extract_strided_slice %99 {offsets = [0, 0], sizes = [5, 16], strides = [1, 1]} : vector<5x32xf32> to vector<5x16xf32>
    %101 = vector.extract_strided_slice %99 {offsets = [0, 16], sizes = [5, 16], strides = [1, 1]} : vector<5x32xf32> to vector<5x16xf32>
    %102 = arith.mulf %96, %96 : vector<5x64xf32>
    %c528 = arith.constant 528 : index
    %c0_59 = arith.constant 0 : index
    %103 = vector.load %arg6[%c528, %c0_59] : memref<688x64xf32, #tpu.memory_space<vmem>>, vector<64x4xf32>
    %cst_60 = arith.constant dense<0.000000e+00> : vector<5x4xf32>
    %104 = tpu.matmul %102, %103, %cst_60 {dimension_numbers = #tpu.dot_dimension_numbers<[1], [0], [0], [1], [0, 0, 1, 1], [], []>} : vector<5x64xf32>, vector<64x4xf32>, vector<5x4xf32> -> vector<5x4xf32>
    %cst_61 = arith.constant 1.000000e-24 : f32
    %105 = vector.broadcast %cst_61 : f32 to vector<5x4xf32>
    %106 = arith.maximumf %104, %105 : vector<5x4xf32>
    %107 = math.rsqrt %106 : vector<5x4xf32>
    %c504 = arith.constant 504 : index
    %c0_62 = arith.constant 0 : index
    %108 = vector.load %arg6[%c504, %c0_62] : memref<688x64xf32, #tpu.memory_space<vmem>>, vector<4x64xf32>
    %cst_63 = arith.constant dense<0.000000e+00> : vector<5x64xf32>
    %109 = tpu.matmul %107, %108, %cst_63 {dimension_numbers = #tpu.dot_dimension_numbers<[1], [0], [0], [1], [0, 0, 1, 1], [], []>} : vector<5x4xf32>, vector<4x64xf32>, vector<5x64xf32> -> vector<5x64xf32>
    %110 = arith.mulf %96, %109 : vector<5x64xf32>
    %cst_64 = arith.constant 4.000000e+00 : f32
    %111 = vector.broadcast %cst_64 : f32 to vector<5x64xf32>
    %112 = arith.mulf %110, %111 : vector<5x64xf32>
    %113 = arith.mulf %100, %100 : vector<5x16xf32>
    %cst_65 = arith.constant dense<0.000000e+00> : vector<5xf32>
    %114 = vector.multi_reduction <add>, %113, %cst_65 [1] : vector<5x16xf32> to vector<5xf32>
    %115 = vector.shape_cast %114 : vector<5xf32> to vector<5x1xf32>
    %cst_66 = arith.constant 1.000000e-24 : f32
    %116 = vector.broadcast %cst_66 : f32 to vector<5x1xf32>
    %117 = arith.maximumf %115, %116 : vector<5x1xf32>
    %118 = math.rsqrt %117 : vector<5x1xf32>
    %119 = vector.broadcast %118 : vector<5x1xf32> to vector<5x16xf32>
    %120 = arith.mulf %100, %119 : vector<5x16xf32>
    %cst_67 = arith.constant 4.000000e+00 : f32
    %121 = vector.broadcast %cst_67 : f32 to vector<5x16xf32>
    %122 = arith.mulf %120, %121 : vector<5x16xf32>
    %c512 = arith.constant 512 : index
    %c0_68 = arith.constant 0 : index
    %123 = vector.load %arg6[%c512, %c0_68] : memref<688x64xf32, #tpu.memory_space<vmem>>, vector<16x64xf32>
    %cst_69 = arith.constant dense<0.000000e+00> : vector<5x64xf32>
    %124 = tpu.matmul %122, %123, %cst_69 {dimension_numbers = #tpu.dot_dimension_numbers<[1], [0], [0], [1], [0, 0, 1, 1], [], []>} : vector<5x16xf32>, vector<16x64xf32>, vector<5x64xf32> -> vector<5x64xf32>
    %c512_70 = arith.constant 512 : index
    %c0_71 = arith.constant 0 : index
    %125 = vector.load %arg6[%c512_70, %c0_71] : memref<688x64xf32, #tpu.memory_space<vmem>>, vector<16x64xf32>
    %cst_72 = arith.constant dense<0.000000e+00> : vector<5x64xf32>
    %126 = tpu.matmul %101, %125, %cst_72 {dimension_numbers = #tpu.dot_dimension_numbers<[1], [0], [0], [1], [0, 0, 1, 1], [], []>} : vector<5x16xf32>, vector<16x64xf32>, vector<5x64xf32> -> vector<5x64xf32>
    %c0_73 = arith.constant 0 : index
    %c144_74 = arith.constant 144 : index
    %c0_75 = arith.constant 0 : index
    %127 = vector.load %arg8[%c0_73, %c144_74, %c0_75] : memref<2x624x64xf32, #tpu.memory_space<vmem>>, vector<1x64x4xf32>
    %128 = vector.shape_cast %127 : vector<1x64x4xf32> to vector<64x4xf32>
    %c0_76 = arith.constant 0 : index
    %c208 = arith.constant 208 : index
    %c0_77 = arith.constant 0 : index
    %129 = vector.load %arg8[%c0_76, %c208, %c0_77] : memref<2x624x64xf32, #tpu.memory_space<vmem>>, vector<1x4x64xf32>
    %130 = vector.shape_cast %129 : vector<1x4x64xf32> to vector<4x64xf32>
    %c432 = arith.constant 432 : index
    %c0_78 = arith.constant 0 : index
    %131 = vector.load %arg6[%c432, %c0_78] : memref<688x64xf32, #tpu.memory_space<vmem>>, vector<20x5xf32>
    %c456 = arith.constant 456 : index
    %c0_79 = arith.constant 0 : index
    %132 = vector.load %arg6[%c456, %c0_79] : memref<688x64xf32, #tpu.memory_space<vmem>>, vector<20x64xf32>
    %c480 = arith.constant 480 : index
    %c0_80 = arith.constant 0 : index
    %133 = vector.load %arg6[%c480, %c0_80] : memref<688x64xf32, #tpu.memory_space<vmem>>, vector<20x4xf32>
    %c504_81 = arith.constant 504 : index
    %c0_82 = arith.constant 0 : index
    %134 = vector.load %arg6[%c504_81, %c0_82] : memref<688x64xf32, #tpu.memory_space<vmem>>, vector<4x64xf32>
    %c416 = arith.constant 416 : index
    %c0_83 = arith.constant 0 : index
    %135 = vector.load %arg6[%c416, %c0_83] : memref<688x64xf32, #tpu.memory_space<vmem>>, vector<5x20xf32>
    %c424 = arith.constant 424 : index
    %c0_84 = arith.constant 0 : index
    %136 = vector.load %arg6[%c424, %c0_84] : memref<688x64xf32, #tpu.memory_space<vmem>>, vector<5x4xf32>
    %cst_85 = arith.constant dense<0.000000e+00> : vector<20x64xf32>
    %137 = tpu.matmul %131, %124, %cst_85 {dimension_numbers = #tpu.dot_dimension_numbers<[1], [0], [0], [1], [0, 0, 1, 1], [], []>} : vector<20x5xf32>, vector<5x64xf32>, vector<20x64xf32> -> vector<20x64xf32>
    %138 = arith.mulf %137, %132 : vector<20x64xf32>
    %cst_86 = arith.constant dense<0.000000e+00> : vector<20x64xf32>
    %139 = tpu.matmul %131, %126, %cst_86 {dimension_numbers = #tpu.dot_dimension_numbers<[1], [0], [0], [1], [0, 0, 1, 1], [], []>} : vector<20x5xf32>, vector<5x64xf32>, vector<20x64xf32> -> vector<20x64xf32>
    %140 = arith.mulf %139, %132 : vector<20x64xf32>
    %141 = tpu.transpose %138, [1, 0] : vector<20x64xf32> -> vector<64x20xf32>
    %cst_87 = arith.constant dense<0.000000e+00> : vector<5x20xf32>
    %142 = tpu.matmul %112, %141, %cst_87 {dimension_numbers = #tpu.dot_dimension_numbers<[1], [0], [0], [1], [0, 0, 1, 1], [], []>} : vector<5x64xf32>, vector<64x20xf32>, vector<5x20xf32> -> vector<5x20xf32>
    %cst_88 = arith.constant dense<0.000000e+00> : vector<5x4xf32>
    %143 = tpu.matmul %112, %128, %cst_88 {dimension_numbers = #tpu.dot_dimension_numbers<[1], [0], [0], [1], [0, 0, 1, 1], [], []>} : vector<5x64xf32>, vector<64x4xf32>, vector<5x4xf32> -> vector<5x4xf32>
    %144 = arith.addf %142, %135 : vector<5x20xf32>
    %145 = arith.addf %143, %136 : vector<5x4xf32>
    %cst_89 = arith.constant dense<0xFF800000> : vector<5xf32>
    %146 = vector.multi_reduction <maximumf>, %144, %cst_89 [1] : vector<5x20xf32> to vector<5xf32>
    %147 = vector.shape_cast %146 : vector<5xf32> to vector<5x1xf32>
    %cst_90 = arith.constant dense<0xFF800000> : vector<5xf32>
    %148 = vector.multi_reduction <maximumf>, %145, %cst_90 [1] : vector<5x4xf32> to vector<5xf32>
    %149 = vector.shape_cast %148 : vector<5xf32> to vector<5x1xf32>
    %150 = arith.maximumf %147, %149 : vector<5x1xf32>
    %151 = vector.broadcast %150 : vector<5x1xf32> to vector<5x20xf32>
    %152 = arith.subf %144, %151 : vector<5x20xf32>
    %153 = math.exp %152 : vector<5x20xf32>
    %154 = vector.broadcast %150 : vector<5x1xf32> to vector<5x4xf32>
    %155 = arith.subf %145, %154 : vector<5x4xf32>
    %156 = math.exp %155 : vector<5x4xf32>
    %cst_91 = arith.constant dense<0.000000e+00> : vector<5x4xf32>
    %157 = tpu.matmul %153, %133, %cst_91 {dimension_numbers = #tpu.dot_dimension_numbers<[1], [0], [0], [1], [0, 0, 1, 1], [], []>} : vector<5x20xf32>, vector<20x4xf32>, vector<5x4xf32> -> vector<5x4xf32>
    %158 = arith.addf %157, %156 : vector<5x4xf32>
    %159 = tpu.reciprocal %158 {approx = true} : vector<5x4xf32> -> vector<5x4xf32>
    %cst_92 = arith.constant dense<0.000000e+00> : vector<5x64xf32>
    %160 = tpu.matmul %153, %140, %cst_92 {dimension_numbers = #tpu.dot_dimension_numbers<[1], [0], [0], [1], [0, 0, 1, 1], [], []>} : vector<5x20xf32>, vector<20x64xf32>, vector<5x64xf32> -> vector<5x64xf32>
    %cst_93 = arith.constant dense<0.000000e+00> : vector<5x64xf32>
    %161 = tpu.matmul %156, %130, %cst_93 {dimension_numbers = #tpu.dot_dimension_numbers<[1], [0], [0], [1], [0, 0, 1, 1], [], []>} : vector<5x4xf32>, vector<4x64xf32>, vector<5x64xf32> -> vector<5x64xf32>
    %162 = arith.addf %160, %161 : vector<5x64xf32>
    %cst_94 = arith.constant dense<0.000000e+00> : vector<5x64xf32>
    %163 = tpu.matmul %159, %134, %cst_94 {dimension_numbers = #tpu.dot_dimension_numbers<[1], [0], [0], [1], [0, 0, 1, 1], [], []>} : vector<5x4xf32>, vector<4x64xf32>, vector<5x64xf32> -> vector<5x64xf32>
    %164 = arith.mulf %162, %163 : vector<5x64xf32>
    %c0_95 = arith.constant 0 : index
    %c80_96 = arith.constant 80 : index
    %c0_97 = arith.constant 0 : index
    %165 = vector.load %arg8[%c0_95, %c80_96, %c0_97] : memref<2x624x64xf32, #tpu.memory_space<vmem>>, vector<1x64x32xf32>
    %166 = vector.shape_cast %165 : vector<1x64x32xf32> to vector<64x32xf32>
    %cst_98 = arith.constant dense<0.000000e+00> : vector<5x32xf32>
    %167 = tpu.matmul %164, %166, %cst_98 {dimension_numbers = #tpu.dot_dimension_numbers<[1], [0], [0], [1], [0, 0, 1, 1], [], []>} : vector<5x64xf32>, vector<64x32xf32>, vector<5x32xf32> -> vector<5x32xf32>
    %c0_99 = arith.constant 0 : index
    %c8 = arith.constant 8 : index
    %c0_100 = arith.constant 0 : index
    %168 = vector.load %arg8[%c0_99, %c8, %c0_100] : memref<2x624x64xf32, #tpu.memory_space<vmem>>, vector<1x1x32xf32>
    %169 = vector.shape_cast %168 : vector<1x1x32xf32> to vector<1x32xf32>
    %cst_101 = arith.constant dense<0.000000e+00> : vector<5xf32>
    %170 = vector.multi_reduction <add>, %167, %cst_101 [1] : vector<5x32xf32> to vector<5xf32>
    %171 = vector.shape_cast %170 : vector<5xf32> to vector<5x1xf32>
    %cst_102 = arith.constant 3.200000e+01 : f32
    %172 = vector.broadcast %cst_102 : f32 to vector<5x1xf32>
    %173 = arith.divf %171, %172 : vector<5x1xf32>
    %174 = arith.mulf %167, %167 : vector<5x32xf32>
    %cst_103 = arith.constant dense<0.000000e+00> : vector<5xf32>
    %175 = vector.multi_reduction <add>, %174, %cst_103 [1] : vector<5x32xf32> to vector<5xf32>
    %176 = vector.shape_cast %175 : vector<5xf32> to vector<5x1xf32>
    %cst_104 = arith.constant 3.200000e+01 : f32
    %177 = vector.broadcast %cst_104 : f32 to vector<5x1xf32>
    %178 = arith.divf %176, %177 : vector<5x1xf32>
    %179 = arith.mulf %173, %173 : vector<5x1xf32>
    %180 = arith.subf %178, %179 : vector<5x1xf32>
    %181 = vector.broadcast %173 : vector<5x1xf32> to vector<5x32xf32>
    %182 = arith.subf %167, %181 : vector<5x32xf32>
    %cst_105 = arith.constant 9.99999974E-6 : f32
    %183 = vector.broadcast %cst_105 : f32 to vector<5x1xf32>
    %184 = arith.addf %180, %183 : vector<5x1xf32>
    %185 = math.rsqrt %184 : vector<5x1xf32>
    %186 = vector.broadcast %185 : vector<5x1xf32> to vector<5x32xf32>
    %187 = arith.mulf %182, %186 : vector<5x32xf32>
    %188 = vector.broadcast %169 : vector<1x32xf32> to vector<5x32xf32>
    %189 = arith.mulf %187, %188 : vector<5x32xf32>
    %190 = arith.addf %189, %70 : vector<5x32xf32>
    %c0_106 = arith.constant 0 : index
    %c216_107 = arith.constant 216 : index
    %c0_108 = arith.constant 0 : index
    %191 = vector.load %arg8[%c0_106, %c216_107, %c0_108] : memref<2x624x64xf32, #tpu.memory_space<vmem>>, vector<1x1x32xf32>
    %192 = vector.shape_cast %191 : vector<1x1x32xf32> to vector<1x32xf32>
    %cst_109 = arith.constant dense<0.000000e+00> : vector<5xf32>
    %193 = vector.multi_reduction <add>, %190, %cst_109 [1] : vector<5x32xf32> to vector<5xf32>
    %194 = vector.shape_cast %193 : vector<5xf32> to vector<5x1xf32>
    %cst_110 = arith.constant 3.200000e+01 : f32
    %195 = vector.broadcast %cst_110 : f32 to vector<5x1xf32>
    %196 = arith.divf %194, %195 : vector<5x1xf32>
    %197 = arith.mulf %190, %190 : vector<5x32xf32>
    %cst_111 = arith.constant dense<0.000000e+00> : vector<5xf32>
    %198 = vector.multi_reduction <add>, %197, %cst_111 [1] : vector<5x32xf32> to vector<5xf32>
    %199 = vector.shape_cast %198 : vector<5xf32> to vector<5x1xf32>
    %cst_112 = arith.constant 3.200000e+01 : f32
    %200 = vector.broadcast %cst_112 : f32 to vector<5x1xf32>
    %201 = arith.divf %199, %200 : vector<5x1xf32>
    %202 = arith.mulf %196, %196 : vector<5x1xf32>
    %203 = arith.subf %201, %202 : vector<5x1xf32>
    %204 = vector.broadcast %196 : vector<5x1xf32> to vector<5x32xf32>
    %205 = arith.subf %190, %204 : vector<5x32xf32>
    %cst_113 = arith.constant 9.99999974E-6 : f32
    %206 = vector.broadcast %cst_113 : f32 to vector<5x1xf32>
    %207 = arith.addf %203, %206 : vector<5x1xf32>
    %208 = math.rsqrt %207 : vector<5x1xf32>
    %209 = vector.broadcast %208 : vector<5x1xf32> to vector<5x32xf32>
    %210 = arith.mulf %205, %209 : vector<5x32xf32>
    %211 = vector.broadcast %192 : vector<1x32xf32> to vector<5x32xf32>
    %212 = arith.mulf %210, %211 : vector<5x32xf32>
    %c0_114 = arith.constant 0 : index
    %c0_115 = arith.constant 0 : index
    %c0_116 = arith.constant 0 : index
    %213 = vector.load %arg9[%c0_114, %c0_115, %c0_116] : memref<2x168x128xf32, #tpu.memory_space<vmem>>, vector<1x32x128xf32>
    %214 = vector.shape_cast %213 : vector<1x32x128xf32> to vector<32x128xf32>
    %cst_117 = arith.constant dense<0.000000e+00> : vector<5x128xf32>
    %215 = tpu.matmul %212, %214, %cst_117 {dimension_numbers = #tpu.dot_dimension_numbers<[1], [0], [0], [1], [0, 0, 1, 1], [], []>} : vector<5x32xf32>, vector<32x128xf32>, vector<5x128xf32> -> vector<5x128xf32>
    %cst_118 = arith.constant 5.000000e-01 : f32
    %216 = vector.broadcast %cst_118 : f32 to vector<5x128xf32>
    %217 = arith.mulf %215, %216 : vector<5x128xf32>
    %c0_119 = arith.constant 0 : index
    %c32_120 = arith.constant 32 : index
    %c0_121 = arith.constant 0 : index
    %218 = vector.load %arg9[%c0_119, %c32_120, %c0_121] : memref<2x168x128xf32, #tpu.memory_space<vmem>>, vector<1x32x128xf32>
    %219 = vector.shape_cast %218 : vector<1x32x128xf32> to vector<32x128xf32>
    %cst_122 = arith.constant dense<0.000000e+00> : vector<6x128xf32>
    %220 = tpu.matmul %71, %219, %cst_122 {dimension_numbers = #tpu.dot_dimension_numbers<[1], [0], [0], [1], [0, 0, 1, 1], [], []>} : vector<6x32xf32>, vector<32x128xf32>, vector<6x128xf32> -> vector<6x128xf32>
    %cst_123 = arith.constant 5.000000e-01 : f32
    %221 = vector.broadcast %cst_123 : f32 to vector<6x128xf32>
    %222 = arith.mulf %220, %221 : vector<6x128xf32>
    %c0_124 = arith.constant 0 : index
    %c64 = arith.constant 64 : index
    %c0_125 = arith.constant 0 : index
    %223 = vector.load %arg9[%c0_124, %c64, %c0_125] : memref<2x168x128xf32, #tpu.memory_space<vmem>>, vector<1x32x128xf32>
    %224 = vector.shape_cast %223 : vector<1x32x128xf32> to vector<32x128xf32>
    %cst_126 = arith.constant dense<0.000000e+00> : vector<6x128xf32>
    %225 = tpu.matmul %71, %224, %cst_126 {dimension_numbers = #tpu.dot_dimension_numbers<[1], [0], [0], [1], [0, 0, 1, 1], [], []>} : vector<6x32xf32>, vector<32x128xf32>, vector<6x128xf32> -> vector<6x128xf32>
    %c0_127 = arith.constant 0 : index
    %c360 = arith.constant 360 : index
    %c0_128 = arith.constant 0 : index
    %226 = vector.load %arg8[%c0_127, %c360, %c0_128] : memref<2x624x64xf32, #tpu.memory_space<vmem>>, vector<1x128x8xf32>
    %227 = vector.shape_cast %226 : vector<1x128x8xf32> to vector<128x8xf32>
    %c0_129 = arith.constant 0 : index
    %c96 = arith.constant 96 : index
    %c0_130 = arith.constant 0 : index
    %228 = vector.load %arg9[%c0_129, %c96, %c0_130] : memref<2x168x128xf32, #tpu.memory_space<vmem>>, vector<1x8x128xf32>
    %229 = vector.shape_cast %228 : vector<1x8x128xf32> to vector<8x128xf32>
    %c592 = arith.constant 592 : index
    %c0_131 = arith.constant 0 : index
    %230 = vector.load %arg6[%c592, %c0_131] : memref<688x64xf32, #tpu.memory_space<vmem>>, vector<48x6xf32>
    %c0_132 = arith.constant 0 : index
    %c0_133 = arith.constant 0 : index
    %231 = vector.load %arg7[%c0_132, %c0_133] : memref<56x128xf32, #tpu.memory_space<vmem>>, vector<48x128xf32>
    %c640 = arith.constant 640 : index
    %c0_134 = arith.constant 0 : index
    %232 = vector.load %arg6[%c640, %c0_134] : memref<688x64xf32, #tpu.memory_space<vmem>>, vector<48x8xf32>
    %c48_135 = arith.constant 48 : index
    %c0_136 = arith.constant 0 : index
    %233 = vector.load %arg7[%c48_135, %c0_136] : memref<56x128xf32, #tpu.memory_space<vmem>>, vector<8x128xf32>
    %cst_137 = arith.constant dense<0.000000e+00> : vector<48x128xf32>
    %234 = tpu.matmul %230, %222, %cst_137 {dimension_numbers = #tpu.dot_dimension_numbers<[1], [0], [0], [1], [0, 0, 1, 1], [], []>} : vector<48x6xf32>, vector<6x128xf32>, vector<48x128xf32> -> vector<48x128xf32>
    %235 = arith.mulf %234, %231 : vector<48x128xf32>
    %cst_138 = arith.constant dense<0.000000e+00> : vector<48x128xf32>
    %236 = tpu.matmul %230, %225, %cst_138 {dimension_numbers = #tpu.dot_dimension_numbers<[1], [0], [0], [1], [0, 0, 1, 1], [], []>} : vector<48x6xf32>, vector<6x128xf32>, vector<48x128xf32> -> vector<48x128xf32>
    %237 = arith.mulf %236, %231 : vector<48x128xf32>
    %238 = tpu.transpose %235, [1, 0] : vector<48x128xf32> -> vector<128x48xf32>
    %cst_139 = arith.constant dense<0.000000e+00> : vector<5x48xf32>
    %239 = tpu.matmul %217, %238, %cst_139 {dimension_numbers = #tpu.dot_dimension_numbers<[1], [0], [0], [1], [0, 0, 1, 1], [], []>} : vector<5x128xf32>, vector<128x48xf32>, vector<5x48xf32> -> vector<5x48xf32>
    %cst_140 = arith.constant dense<0.000000e+00> : vector<5x8xf32>
    %240 = tpu.matmul %217, %227, %cst_140 {dimension_numbers = #tpu.dot_dimension_numbers<[1], [0], [0], [1], [0, 0, 1, 1], [], []>} : vector<5x128xf32>, vector<128x8xf32>, vector<5x8xf32> -> vector<5x8xf32>
    %cst_141 = arith.constant dense<0xFF800000> : vector<5xf32>
    %241 = vector.multi_reduction <maximumf>, %239, %cst_141 [1] : vector<5x48xf32> to vector<5xf32>
    %242 = vector.shape_cast %241 : vector<5xf32> to vector<5x1xf32>
    %cst_142 = arith.constant dense<0xFF800000> : vector<5xf32>
    %243 = vector.multi_reduction <maximumf>, %240, %cst_142 [1] : vector<5x8xf32> to vector<5xf32>
    %244 = vector.shape_cast %243 : vector<5xf32> to vector<5x1xf32>
    %245 = arith.maximumf %242, %244 : vector<5x1xf32>
    %246 = vector.broadcast %245 : vector<5x1xf32> to vector<5x48xf32>
    %247 = arith.subf %239, %246 : vector<5x48xf32>
    %248 = math.exp %247 : vector<5x48xf32>
    %249 = vector.broadcast %245 : vector<5x1xf32> to vector<5x8xf32>
    %250 = arith.subf %240, %249 : vector<5x8xf32>
    %251 = math.exp %250 : vector<5x8xf32>
    %cst_143 = arith.constant dense<0.000000e+00> : vector<5x8xf32>
    %252 = tpu.matmul %248, %232, %cst_143 {dimension_numbers = #tpu.dot_dimension_numbers<[1], [0], [0], [1], [0, 0, 1, 1], [], []>} : vector<5x48xf32>, vector<48x8xf32>, vector<5x8xf32> -> vector<5x8xf32>
    %253 = arith.addf %252, %251 : vector<5x8xf32>
    %254 = tpu.reciprocal %253 {approx = true} : vector<5x8xf32> -> vector<5x8xf32>
    %cst_144 = arith.constant dense<0.000000e+00> : vector<5x128xf32>
    %255 = tpu.matmul %248, %237, %cst_144 {dimension_numbers = #tpu.dot_dimension_numbers<[1], [0], [0], [1], [0, 0, 1, 1], [], []>} : vector<5x48xf32>, vector<48x128xf32>, vector<5x128xf32> -> vector<5x128xf32>
    %cst_145 = arith.constant dense<0.000000e+00> : vector<5x128xf32>
    %256 = tpu.matmul %251, %229, %cst_145 {dimension_numbers = #tpu.dot_dimension_numbers<[1], [0], [0], [1], [0, 0, 1, 1], [], []>} : vector<5x8xf32>, vector<8x128xf32>, vector<5x128xf32> -> vector<5x128xf32>
    %257 = arith.addf %255, %256 : vector<5x128xf32>
    %cst_146 = arith.constant dense<0.000000e+00> : vector<5x128xf32>
    %258 = tpu.matmul %254, %233, %cst_146 {dimension_numbers = #tpu.dot_dimension_numbers<[1], [0], [0], [1], [0, 0, 1, 1], [], []>} : vector<5x8xf32>, vector<8x128xf32>, vector<5x128xf32> -> vector<5x128xf32>
    %259 = arith.mulf %257, %258 : vector<5x128xf32>
    %c0_147 = arith.constant 0 : index
    %c232_148 = arith.constant 232 : index
    %c0_149 = arith.constant 0 : index
    %260 = vector.load %arg8[%c0_147, %c232_148, %c0_149] : memref<2x624x64xf32, #tpu.memory_space<vmem>>, vector<1x128x32xf32>
    %261 = vector.shape_cast %260 : vector<1x128x32xf32> to vector<128x32xf32>
    %cst_150 = arith.constant dense<0.000000e+00> : vector<5x32xf32>
    %262 = tpu.matmul %259, %261, %cst_150 {dimension_numbers = #tpu.dot_dimension_numbers<[1], [0], [0], [1], [0, 0, 1, 1], [], []>} : vector<5x128xf32>, vector<128x32xf32>, vector<5x32xf32> -> vector<5x32xf32>
    %c0_151 = arith.constant 0 : index
    %c224_152 = arith.constant 224 : index
    %c0_153 = arith.constant 0 : index
    %263 = vector.load %arg8[%c0_151, %c224_152, %c0_153] : memref<2x624x64xf32, #tpu.memory_space<vmem>>, vector<1x1x32xf32>
    %264 = vector.shape_cast %263 : vector<1x1x32xf32> to vector<1x32xf32>
    %cst_154 = arith.constant dense<0.000000e+00> : vector<5xf32>
    %265 = vector.multi_reduction <add>, %262, %cst_154 [1] : vector<5x32xf32> to vector<5xf32>
    %266 = vector.shape_cast %265 : vector<5xf32> to vector<5x1xf32>
    %cst_155 = arith.constant 3.200000e+01 : f32
    %267 = vector.broadcast %cst_155 : f32 to vector<5x1xf32>
    %268 = arith.divf %266, %267 : vector<5x1xf32>
    %269 = arith.mulf %262, %262 : vector<5x32xf32>
    %cst_156 = arith.constant dense<0.000000e+00> : vector<5xf32>
    %270 = vector.multi_reduction <add>, %269, %cst_156 [1] : vector<5x32xf32> to vector<5xf32>
    %271 = vector.shape_cast %270 : vector<5xf32> to vector<5x1xf32>
    %cst_157 = arith.constant 3.200000e+01 : f32
    %272 = vector.broadcast %cst_157 : f32 to vector<5x1xf32>
    %273 = arith.divf %271, %272 : vector<5x1xf32>
    %274 = arith.mulf %268, %268 : vector<5x1xf32>
    %275 = arith.subf %273, %274 : vector<5x1xf32>
    %276 = vector.broadcast %268 : vector<5x1xf32> to vector<5x32xf32>
    %277 = arith.subf %262, %276 : vector<5x32xf32>
    %cst_158 = arith.constant 9.99999974E-6 : f32
    %278 = vector.broadcast %cst_158 : f32 to vector<5x1xf32>
    %279 = arith.addf %275, %278 : vector<5x1xf32>
    %280 = math.rsqrt %279 : vector<5x1xf32>
    %281 = vector.broadcast %280 : vector<5x1xf32> to vector<5x32xf32>
    %282 = arith.mulf %277, %281 : vector<5x32xf32>
    %283 = vector.broadcast %264 : vector<1x32xf32> to vector<5x32xf32>
    %284 = arith.mulf %282, %283 : vector<5x32xf32>
    %285 = arith.addf %284, %190 : vector<5x32xf32>
    %c0_159 = arith.constant 0 : index
    %c488 = arith.constant 488 : index
    %c0_160 = arith.constant 0 : index
    %286 = vector.load %arg8[%c0_159, %c488, %c0_160] : memref<2x624x64xf32, #tpu.memory_space<vmem>>, vector<1x1x32xf32>
    %287 = vector.shape_cast %286 : vector<1x1x32xf32> to vector<1x32xf32>
    %cst_161 = arith.constant dense<0.000000e+00> : vector<5xf32>
    %288 = vector.multi_reduction <add>, %285, %cst_161 [1] : vector<5x32xf32> to vector<5xf32>
    %289 = vector.shape_cast %288 : vector<5xf32> to vector<5x1xf32>
    %cst_162 = arith.constant 3.200000e+01 : f32
    %290 = vector.broadcast %cst_162 : f32 to vector<5x1xf32>
    %291 = arith.divf %289, %290 : vector<5x1xf32>
    %292 = arith.mulf %285, %285 : vector<5x32xf32>
    %cst_163 = arith.constant dense<0.000000e+00> : vector<5xf32>
    %293 = vector.multi_reduction <add>, %292, %cst_163 [1] : vector<5x32xf32> to vector<5xf32>
    %294 = vector.shape_cast %293 : vector<5xf32> to vector<5x1xf32>
    %cst_164 = arith.constant 3.200000e+01 : f32
    %295 = vector.broadcast %cst_164 : f32 to vector<5x1xf32>
    %296 = arith.divf %294, %295 : vector<5x1xf32>
    %297 = arith.mulf %291, %291 : vector<5x1xf32>
    %298 = arith.subf %296, %297 : vector<5x1xf32>
    %299 = vector.broadcast %291 : vector<5x1xf32> to vector<5x32xf32>
    %300 = arith.subf %285, %299 : vector<5x32xf32>
    %cst_165 = arith.constant 9.99999974E-6 : f32
    %301 = vector.broadcast %cst_165 : f32 to vector<5x1xf32>
    %302 = arith.addf %298, %301 : vector<5x1xf32>
    %303 = math.rsqrt %302 : vector<5x1xf32>
    %304 = vector.broadcast %303 : vector<5x1xf32> to vector<5x32xf32>
    %305 = arith.mulf %300, %304 : vector<5x32xf32>
    %306 = vector.broadcast %287 : vector<1x32xf32> to vector<5x32xf32>
    %307 = arith.mulf %305, %306 : vector<5x32xf32>
    %c0_166 = arith.constant 0 : index
    %c104 = arith.constant 104 : index
    %c0_167 = arith.constant 0 : index
    %308 = vector.load %arg9[%c0_166, %c104, %c0_167] : memref<2x168x128xf32, #tpu.memory_space<vmem>>, vector<1x32x128xf32>
    %309 = vector.shape_cast %308 : vector<1x32x128xf32> to vector<32x128xf32>
    %cst_168 = arith.constant dense<0.000000e+00> : vector<5x128xf32>
    %310 = tpu.matmul %307, %309, %cst_168 {dimension_numbers = #tpu.dot_dimension_numbers<[1], [0], [0], [1], [0, 0, 1, 1], [], []>} : vector<5x32xf32>, vector<32x128xf32>, vector<5x128xf32> -> vector<5x128xf32>
    %c0_169 = arith.constant 0 : index
    %c136 = arith.constant 136 : index
    %c0_170 = arith.constant 0 : index
    %311 = vector.load %arg9[%c0_169, %c136, %c0_170] : memref<2x168x128xf32, #tpu.memory_space<vmem>>, vector<1x32x128xf32>
    %312 = vector.shape_cast %311 : vector<1x32x128xf32> to vector<32x128xf32>
    %cst_171 = arith.constant dense<0.000000e+00> : vector<5x128xf32>
    %313 = tpu.matmul %307, %312, %cst_171 {dimension_numbers = #tpu.dot_dimension_numbers<[1], [0], [0], [1], [0, 0, 1, 1], [], []>} : vector<5x32xf32>, vector<32x128xf32>, vector<5x128xf32> -> vector<5x128xf32>
    %cst_172 = arith.constant 0.000000e+00 : f32
    %314 = vector.broadcast %cst_172 : f32 to vector<5x128xf32>
    %315 = arith.subf %314, %313 : vector<5x128xf32>
    %316 = math.exp %315 : vector<5x128xf32>
    %cst_173 = arith.constant 1.000000e+00 : f32
    %317 = vector.broadcast %cst_173 : f32 to vector<5x128xf32>
    %318 = arith.addf %317, %316 : vector<5x128xf32>
    %cst_174 = arith.constant 1.000000e+00 : f32
    %319 = vector.broadcast %cst_174 : f32 to vector<5x128xf32>
    %320 = arith.divf %319, %318 : vector<5x128xf32>
    %321 = arith.mulf %313, %320 : vector<5x128xf32>
    %322 = arith.mulf %310, %321 : vector<5x128xf32>
    %c0_175 = arith.constant 0 : index
    %c496 = arith.constant 496 : index
    %c0_176 = arith.constant 0 : index
    %323 = vector.load %arg8[%c0_175, %c496, %c0_176] : memref<2x624x64xf32, #tpu.memory_space<vmem>>, vector<1x128x32xf32>
    %324 = vector.shape_cast %323 : vector<1x128x32xf32> to vector<128x32xf32>
    %cst_177 = arith.constant dense<0.000000e+00> : vector<5x32xf32>
    %325 = tpu.matmul %322, %324, %cst_177 {dimension_numbers = #tpu.dot_dimension_numbers<[1], [0], [0], [1], [0, 0, 1, 1], [], []>} : vector<5x128xf32>, vector<128x32xf32>, vector<5x32xf32> -> vector<5x32xf32>
    %326 = arith.addf %325, %285 : vector<5x32xf32>
    %c1 = arith.constant 1 : index
    %c0_178 = arith.constant 0 : index
    %c0_179 = arith.constant 0 : index
    %327 = vector.load %arg8[%c1, %c0_178, %c0_179] : memref<2x624x64xf32, #tpu.memory_space<vmem>>, vector<1x1x32xf32>
    %328 = vector.shape_cast %327 : vector<1x1x32xf32> to vector<1x32xf32>
    %cst_180 = arith.constant dense<0.000000e+00> : vector<5xf32>
    %329 = vector.multi_reduction <add>, %326, %cst_180 [1] : vector<5x32xf32> to vector<5xf32>
    %330 = vector.shape_cast %329 : vector<5xf32> to vector<5x1xf32>
    %cst_181 = arith.constant 3.200000e+01 : f32
    %331 = vector.broadcast %cst_181 : f32 to vector<5x1xf32>
    %332 = arith.divf %330, %331 : vector<5x1xf32>
    %333 = arith.mulf %326, %326 : vector<5x32xf32>
    %cst_182 = arith.constant dense<0.000000e+00> : vector<5xf32>
    %334 = vector.multi_reduction <add>, %333, %cst_182 [1] : vector<5x32xf32> to vector<5xf32>
    %335 = vector.shape_cast %334 : vector<5xf32> to vector<5x1xf32>
    %cst_183 = arith.constant 3.200000e+01 : f32
    %336 = vector.broadcast %cst_183 : f32 to vector<5x1xf32>
    %337 = arith.divf %335, %336 : vector<5x1xf32>
    %338 = arith.mulf %332, %332 : vector<5x1xf32>
    %339 = arith.subf %337, %338 : vector<5x1xf32>
    %340 = vector.broadcast %332 : vector<5x1xf32> to vector<5x32xf32>
    %341 = arith.subf %326, %340 : vector<5x32xf32>
    %cst_184 = arith.constant 9.99999974E-6 : f32
    %342 = vector.broadcast %cst_184 : f32 to vector<5x1xf32>
    %343 = arith.addf %339, %342 : vector<5x1xf32>
    %344 = math.rsqrt %343 : vector<5x1xf32>
    %345 = vector.broadcast %344 : vector<5x1xf32> to vector<5x32xf32>
    %346 = arith.mulf %341, %345 : vector<5x32xf32>
    %347 = vector.broadcast %328 : vector<1x32xf32> to vector<5x32xf32>
    %348 = arith.mulf %346, %347 : vector<5x32xf32>
    %c1_185 = arith.constant 1 : index
    %c16_186 = arith.constant 16 : index
    %c0_187 = arith.constant 0 : index
    %349 = vector.load %arg8[%c1_185, %c16_186, %c0_187] : memref<2x624x64xf32, #tpu.memory_space<vmem>>, vector<1x32x64xf32>
    %350 = vector.shape_cast %349 : vector<1x32x64xf32> to vector<32x64xf32>
    %cst_188 = arith.constant dense<0.000000e+00> : vector<5x64xf32>
    %351 = tpu.matmul %348, %350, %cst_188 {dimension_numbers = #tpu.dot_dimension_numbers<[1], [0], [0], [1], [0, 0, 1, 1], [], []>} : vector<5x32xf32>, vector<32x64xf32>, vector<5x64xf32> -> vector<5x64xf32>
    %c1_189 = arith.constant 1 : index
    %c48_190 = arith.constant 48 : index
    %c0_191 = arith.constant 0 : index
    %352 = vector.load %arg8[%c1_189, %c48_190, %c0_191] : memref<2x624x64xf32, #tpu.memory_space<vmem>>, vector<1x32x32xf32>
    %353 = vector.shape_cast %352 : vector<1x32x32xf32> to vector<32x32xf32>
    %cst_192 = arith.constant dense<0.000000e+00> : vector<5x32xf32>
    %354 = tpu.matmul %348, %353, %cst_192 {dimension_numbers = #tpu.dot_dimension_numbers<[1], [0], [0], [1], [0, 0, 1, 1], [], []>} : vector<5x32xf32>, vector<32x32xf32>, vector<5x32xf32> -> vector<5x32xf32>
    %355 = vector.extract_strided_slice %354 {offsets = [0, 0], sizes = [5, 16], strides = [1, 1]} : vector<5x32xf32> to vector<5x16xf32>
    %356 = vector.extract_strided_slice %354 {offsets = [0, 16], sizes = [5, 16], strides = [1, 1]} : vector<5x32xf32> to vector<5x16xf32>
    %357 = arith.mulf %351, %351 : vector<5x64xf32>
    %c528_193 = arith.constant 528 : index
    %c0_194 = arith.constant 0 : index
    %358 = vector.load %arg6[%c528_193, %c0_194] : memref<688x64xf32, #tpu.memory_space<vmem>>, vector<64x4xf32>
    %cst_195 = arith.constant dense<0.000000e+00> : vector<5x4xf32>
    %359 = tpu.matmul %357, %358, %cst_195 {dimension_numbers = #tpu.dot_dimension_numbers<[1], [0], [0], [1], [0, 0, 1, 1], [], []>} : vector<5x64xf32>, vector<64x4xf32>, vector<5x4xf32> -> vector<5x4xf32>
    %cst_196 = arith.constant 1.000000e-24 : f32
    %360 = vector.broadcast %cst_196 : f32 to vector<5x4xf32>
    %361 = arith.maximumf %359, %360 : vector<5x4xf32>
    %362 = math.rsqrt %361 : vector<5x4xf32>
    %c504_197 = arith.constant 504 : index
    %c0_198 = arith.constant 0 : index
    %363 = vector.load %arg6[%c504_197, %c0_198] : memref<688x64xf32, #tpu.memory_space<vmem>>, vector<4x64xf32>
    %cst_199 = arith.constant dense<0.000000e+00> : vector<5x64xf32>
    %364 = tpu.matmul %362, %363, %cst_199 {dimension_numbers = #tpu.dot_dimension_numbers<[1], [0], [0], [1], [0, 0, 1, 1], [], []>} : vector<5x4xf32>, vector<4x64xf32>, vector<5x64xf32> -> vector<5x64xf32>
    %365 = arith.mulf %351, %364 : vector<5x64xf32>
    %cst_200 = arith.constant 4.000000e+00 : f32
    %366 = vector.broadcast %cst_200 : f32 to vector<5x64xf32>
    %367 = arith.mulf %365, %366 : vector<5x64xf32>
    %368 = arith.mulf %355, %355 : vector<5x16xf32>
    %cst_201 = arith.constant dense<0.000000e+00> : vector<5xf32>
    %369 = vector.multi_reduction <add>, %368, %cst_201 [1] : vector<5x16xf32> to vector<5xf32>
    %370 = vector.shape_cast %369 : vector<5xf32> to vector<5x1xf32>
    %cst_202 = arith.constant 1.000000e-24 : f32
    %371 = vector.broadcast %cst_202 : f32 to vector<5x1xf32>
    %372 = arith.maximumf %370, %371 : vector<5x1xf32>
    %373 = math.rsqrt %372 : vector<5x1xf32>
    %374 = vector.broadcast %373 : vector<5x1xf32> to vector<5x16xf32>
    %375 = arith.mulf %355, %374 : vector<5x16xf32>
    %cst_203 = arith.constant 4.000000e+00 : f32
    %376 = vector.broadcast %cst_203 : f32 to vector<5x16xf32>
    %377 = arith.mulf %375, %376 : vector<5x16xf32>
    %c512_204 = arith.constant 512 : index
    %c0_205 = arith.constant 0 : index
    %378 = vector.load %arg6[%c512_204, %c0_205] : memref<688x64xf32, #tpu.memory_space<vmem>>, vector<16x64xf32>
    %cst_206 = arith.constant dense<0.000000e+00> : vector<5x64xf32>
    %379 = tpu.matmul %377, %378, %cst_206 {dimension_numbers = #tpu.dot_dimension_numbers<[1], [0], [0], [1], [0, 0, 1, 1], [], []>} : vector<5x16xf32>, vector<16x64xf32>, vector<5x64xf32> -> vector<5x64xf32>
    %c512_207 = arith.constant 512 : index
    %c0_208 = arith.constant 0 : index
    %380 = vector.load %arg6[%c512_207, %c0_208] : memref<688x64xf32, #tpu.memory_space<vmem>>, vector<16x64xf32>
    %cst_209 = arith.constant dense<0.000000e+00> : vector<5x64xf32>
    %381 = tpu.matmul %356, %380, %cst_209 {dimension_numbers = #tpu.dot_dimension_numbers<[1], [0], [0], [1], [0, 0, 1, 1], [], []>} : vector<5x16xf32>, vector<16x64xf32>, vector<5x64xf32> -> vector<5x64xf32>
    %c1_210 = arith.constant 1 : index
    %c144_211 = arith.constant 144 : index
    %c0_212 = arith.constant 0 : index
    %382 = vector.load %arg8[%c1_210, %c144_211, %c0_212] : memref<2x624x64xf32, #tpu.memory_space<vmem>>, vector<1x64x4xf32>
    %383 = vector.shape_cast %382 : vector<1x64x4xf32> to vector<64x4xf32>
    %c1_213 = arith.constant 1 : index
    %c208_214 = arith.constant 208 : index
    %c0_215 = arith.constant 0 : index
    %384 = vector.load %arg8[%c1_213, %c208_214, %c0_215] : memref<2x624x64xf32, #tpu.memory_space<vmem>>, vector<1x4x64xf32>
    %385 = vector.shape_cast %384 : vector<1x4x64xf32> to vector<4x64xf32>
    %c432_216 = arith.constant 432 : index
    %c0_217 = arith.constant 0 : index
    %386 = vector.load %arg6[%c432_216, %c0_217] : memref<688x64xf32, #tpu.memory_space<vmem>>, vector<20x5xf32>
    %c456_218 = arith.constant 456 : index
    %c0_219 = arith.constant 0 : index
    %387 = vector.load %arg6[%c456_218, %c0_219] : memref<688x64xf32, #tpu.memory_space<vmem>>, vector<20x64xf32>
    %c480_220 = arith.constant 480 : index
    %c0_221 = arith.constant 0 : index
    %388 = vector.load %arg6[%c480_220, %c0_221] : memref<688x64xf32, #tpu.memory_space<vmem>>, vector<20x4xf32>
    %c504_222 = arith.constant 504 : index
    %c0_223 = arith.constant 0 : index
    %389 = vector.load %arg6[%c504_222, %c0_223] : memref<688x64xf32, #tpu.memory_space<vmem>>, vector<4x64xf32>
    %c416_224 = arith.constant 416 : index
    %c0_225 = arith.constant 0 : index
    %390 = vector.load %arg6[%c416_224, %c0_225] : memref<688x64xf32, #tpu.memory_space<vmem>>, vector<5x20xf32>
    %c424_226 = arith.constant 424 : index
    %c0_227 = arith.constant 0 : index
    %391 = vector.load %arg6[%c424_226, %c0_227] : memref<688x64xf32, #tpu.memory_space<vmem>>, vector<5x4xf32>
    %cst_228 = arith.constant dense<0.000000e+00> : vector<20x64xf32>
    %392 = tpu.matmul %386, %379, %cst_228 {dimension_numbers = #tpu.dot_dimension_numbers<[1], [0], [0], [1], [0, 0, 1, 1], [], []>} : vector<20x5xf32>, vector<5x64xf32>, vector<20x64xf32> -> vector<20x64xf32>
    %393 = arith.mulf %392, %387 : vector<20x64xf32>
    %cst_229 = arith.constant dense<0.000000e+00> : vector<20x64xf32>
    %394 = tpu.matmul %386, %381, %cst_229 {dimension_numbers = #tpu.dot_dimension_numbers<[1], [0], [0], [1], [0, 0, 1, 1], [], []>} : vector<20x5xf32>, vector<5x64xf32>, vector<20x64xf32> -> vector<20x64xf32>
    %395 = arith.mulf %394, %387 : vector<20x64xf32>
    %396 = tpu.transpose %393, [1, 0] : vector<20x64xf32> -> vector<64x20xf32>
    %cst_230 = arith.constant dense<0.000000e+00> : vector<5x20xf32>
    %397 = tpu.matmul %367, %396, %cst_230 {dimension_numbers = #tpu.dot_dimension_numbers<[1], [0], [0], [1], [0, 0, 1, 1], [], []>} : vector<5x64xf32>, vector<64x20xf32>, vector<5x20xf32> -> vector<5x20xf32>
    %cst_231 = arith.constant dense<0.000000e+00> : vector<5x4xf32>
    %398 = tpu.matmul %367, %383, %cst_231 {dimension_numbers = #tpu.dot_dimension_numbers<[1], [0], [0], [1], [0, 0, 1, 1], [], []>} : vector<5x64xf32>, vector<64x4xf32>, vector<5x4xf32> -> vector<5x4xf32>
    %399 = arith.addf %397, %390 : vector<5x20xf32>
    %400 = arith.addf %398, %391 : vector<5x4xf32>
    %cst_232 = arith.constant dense<0xFF800000> : vector<5xf32>
    %401 = vector.multi_reduction <maximumf>, %399, %cst_232 [1] : vector<5x20xf32> to vector<5xf32>
    %402 = vector.shape_cast %401 : vector<5xf32> to vector<5x1xf32>
    %cst_233 = arith.constant dense<0xFF800000> : vector<5xf32>
    %403 = vector.multi_reduction <maximumf>, %400, %cst_233 [1] : vector<5x4xf32> to vector<5xf32>
    %404 = vector.shape_cast %403 : vector<5xf32> to vector<5x1xf32>
    %405 = arith.maximumf %402, %404 : vector<5x1xf32>
    %406 = vector.broadcast %405 : vector<5x1xf32> to vector<5x20xf32>
    %407 = arith.subf %399, %406 : vector<5x20xf32>
    %408 = math.exp %407 : vector<5x20xf32>
    %409 = vector.broadcast %405 : vector<5x1xf32> to vector<5x4xf32>
    %410 = arith.subf %400, %409 : vector<5x4xf32>
    %411 = math.exp %410 : vector<5x4xf32>
    %cst_234 = arith.constant dense<0.000000e+00> : vector<5x4xf32>
    %412 = tpu.matmul %408, %388, %cst_234 {dimension_numbers = #tpu.dot_dimension_numbers<[1], [0], [0], [1], [0, 0, 1, 1], [], []>} : vector<5x20xf32>, vector<20x4xf32>, vector<5x4xf32> -> vector<5x4xf32>
    %413 = arith.addf %412, %411 : vector<5x4xf32>
    %414 = tpu.reciprocal %413 {approx = true} : vector<5x4xf32> -> vector<5x4xf32>
    %cst_235 = arith.constant dense<0.000000e+00> : vector<5x64xf32>
    %415 = tpu.matmul %408, %395, %cst_235 {dimension_numbers = #tpu.dot_dimension_numbers<[1], [0], [0], [1], [0, 0, 1, 1], [], []>} : vector<5x20xf32>, vector<20x64xf32>, vector<5x64xf32> -> vector<5x64xf32>
    %cst_236 = arith.constant dense<0.000000e+00> : vector<5x64xf32>
    %416 = tpu.matmul %411, %385, %cst_236 {dimension_numbers = #tpu.dot_dimension_numbers<[1], [0], [0], [1], [0, 0, 1, 1], [], []>} : vector<5x4xf32>, vector<4x64xf32>, vector<5x64xf32> -> vector<5x64xf32>
    %417 = arith.addf %415, %416 : vector<5x64xf32>
    %cst_237 = arith.constant dense<0.000000e+00> : vector<5x64xf32>
    %418 = tpu.matmul %414, %389, %cst_237 {dimension_numbers = #tpu.dot_dimension_numbers<[1], [0], [0], [1], [0, 0, 1, 1], [], []>} : vector<5x4xf32>, vector<4x64xf32>, vector<5x64xf32> -> vector<5x64xf32>
    %419 = arith.mulf %417, %418 : vector<5x64xf32>
    %c1_238 = arith.constant 1 : index
    %c80_239 = arith.constant 80 : index
    %c0_240 = arith.constant 0 : index
    %420 = vector.load %arg8[%c1_238, %c80_239, %c0_240] : memref<2x624x64xf32, #tpu.memory_space<vmem>>, vector<1x64x32xf32>
    %421 = vector.shape_cast %420 : vector<1x64x32xf32> to vector<64x32xf32>
    %cst_241 = arith.constant dense<0.000000e+00> : vector<5x32xf32>
    %422 = tpu.matmul %419, %421, %cst_241 {dimension_numbers = #tpu.dot_dimension_numbers<[1], [0], [0], [1], [0, 0, 1, 1], [], []>} : vector<5x64xf32>, vector<64x32xf32>, vector<5x32xf32> -> vector<5x32xf32>
    %c1_242 = arith.constant 1 : index
    %c8_243 = arith.constant 8 : index
    %c0_244 = arith.constant 0 : index
    %423 = vector.load %arg8[%c1_242, %c8_243, %c0_244] : memref<2x624x64xf32, #tpu.memory_space<vmem>>, vector<1x1x32xf32>
    %424 = vector.shape_cast %423 : vector<1x1x32xf32> to vector<1x32xf32>
    %cst_245 = arith.constant dense<0.000000e+00> : vector<5xf32>
    %425 = vector.multi_reduction <add>, %422, %cst_245 [1] : vector<5x32xf32> to vector<5xf32>
    %426 = vector.shape_cast %425 : vector<5xf32> to vector<5x1xf32>
    %cst_246 = arith.constant 3.200000e+01 : f32
    %427 = vector.broadcast %cst_246 : f32 to vector<5x1xf32>
    %428 = arith.divf %426, %427 : vector<5x1xf32>
    %429 = arith.mulf %422, %422 : vector<5x32xf32>
    %cst_247 = arith.constant dense<0.000000e+00> : vector<5xf32>
    %430 = vector.multi_reduction <add>, %429, %cst_247 [1] : vector<5x32xf32> to vector<5xf32>
    %431 = vector.shape_cast %430 : vector<5xf32> to vector<5x1xf32>
    %cst_248 = arith.constant 3.200000e+01 : f32
    %432 = vector.broadcast %cst_248 : f32 to vector<5x1xf32>
    %433 = arith.divf %431, %432 : vector<5x1xf32>
    %434 = arith.mulf %428, %428 : vector<5x1xf32>
    %435 = arith.subf %433, %434 : vector<5x1xf32>
    %436 = vector.broadcast %428 : vector<5x1xf32> to vector<5x32xf32>
    %437 = arith.subf %422, %436 : vector<5x32xf32>
    %cst_249 = arith.constant 9.99999974E-6 : f32
    %438 = vector.broadcast %cst_249 : f32 to vector<5x1xf32>
    %439 = arith.addf %435, %438 : vector<5x1xf32>
    %440 = math.rsqrt %439 : vector<5x1xf32>
    %441 = vector.broadcast %440 : vector<5x1xf32> to vector<5x32xf32>
    %442 = arith.mulf %437, %441 : vector<5x32xf32>
    %443 = vector.broadcast %424 : vector<1x32xf32> to vector<5x32xf32>
    %444 = arith.mulf %442, %443 : vector<5x32xf32>
    %445 = arith.addf %444, %326 : vector<5x32xf32>
    %c1_250 = arith.constant 1 : index
    %c216_251 = arith.constant 216 : index
    %c0_252 = arith.constant 0 : index
    %446 = vector.load %arg8[%c1_250, %c216_251, %c0_252] : memref<2x624x64xf32, #tpu.memory_space<vmem>>, vector<1x1x32xf32>
    %447 = vector.shape_cast %446 : vector<1x1x32xf32> to vector<1x32xf32>
    %cst_253 = arith.constant dense<0.000000e+00> : vector<5xf32>
    %448 = vector.multi_reduction <add>, %445, %cst_253 [1] : vector<5x32xf32> to vector<5xf32>
    %449 = vector.shape_cast %448 : vector<5xf32> to vector<5x1xf32>
    %cst_254 = arith.constant 3.200000e+01 : f32
    %450 = vector.broadcast %cst_254 : f32 to vector<5x1xf32>
    %451 = arith.divf %449, %450 : vector<5x1xf32>
    %452 = arith.mulf %445, %445 : vector<5x32xf32>
    %cst_255 = arith.constant dense<0.000000e+00> : vector<5xf32>
    %453 = vector.multi_reduction <add>, %452, %cst_255 [1] : vector<5x32xf32> to vector<5xf32>
    %454 = vector.shape_cast %453 : vector<5xf32> to vector<5x1xf32>
    %cst_256 = arith.constant 3.200000e+01 : f32
    %455 = vector.broadcast %cst_256 : f32 to vector<5x1xf32>
    %456 = arith.divf %454, %455 : vector<5x1xf32>
    %457 = arith.mulf %451, %451 : vector<5x1xf32>
    %458 = arith.subf %456, %457 : vector<5x1xf32>
    %459 = vector.broadcast %451 : vector<5x1xf32> to vector<5x32xf32>
    %460 = arith.subf %445, %459 : vector<5x32xf32>
    %cst_257 = arith.constant 9.99999974E-6 : f32
    %461 = vector.broadcast %cst_257 : f32 to vector<5x1xf32>
    %462 = arith.addf %458, %461 : vector<5x1xf32>
    %463 = math.rsqrt %462 : vector<5x1xf32>
    %464 = vector.broadcast %463 : vector<5x1xf32> to vector<5x32xf32>
    %465 = arith.mulf %460, %464 : vector<5x32xf32>
    %466 = vector.broadcast %447 : vector<1x32xf32> to vector<5x32xf32>
    %467 = arith.mulf %465, %466 : vector<5x32xf32>
    %c1_258 = arith.constant 1 : index
    %c0_259 = arith.constant 0 : index
    %c0_260 = arith.constant 0 : index
    %468 = vector.load %arg9[%c1_258, %c0_259, %c0_260] : memref<2x168x128xf32, #tpu.memory_space<vmem>>, vector<1x32x128xf32>
    %469 = vector.shape_cast %468 : vector<1x32x128xf32> to vector<32x128xf32>
    %cst_261 = arith.constant dense<0.000000e+00> : vector<5x128xf32>
    %470 = tpu.matmul %467, %469, %cst_261 {dimension_numbers = #tpu.dot_dimension_numbers<[1], [0], [0], [1], [0, 0, 1, 1], [], []>} : vector<5x32xf32>, vector<32x128xf32>, vector<5x128xf32> -> vector<5x128xf32>
    %cst_262 = arith.constant 5.000000e-01 : f32
    %471 = vector.broadcast %cst_262 : f32 to vector<5x128xf32>
    %472 = arith.mulf %470, %471 : vector<5x128xf32>
    %c1_263 = arith.constant 1 : index
    %c32_264 = arith.constant 32 : index
    %c0_265 = arith.constant 0 : index
    %473 = vector.load %arg9[%c1_263, %c32_264, %c0_265] : memref<2x168x128xf32, #tpu.memory_space<vmem>>, vector<1x32x128xf32>
    %474 = vector.shape_cast %473 : vector<1x32x128xf32> to vector<32x128xf32>
    %cst_266 = arith.constant dense<0.000000e+00> : vector<6x128xf32>
    %475 = tpu.matmul %71, %474, %cst_266 {dimension_numbers = #tpu.dot_dimension_numbers<[1], [0], [0], [1], [0, 0, 1, 1], [], []>} : vector<6x32xf32>, vector<32x128xf32>, vector<6x128xf32> -> vector<6x128xf32>
    %cst_267 = arith.constant 5.000000e-01 : f32
    %476 = vector.broadcast %cst_267 : f32 to vector<6x128xf32>
    %477 = arith.mulf %475, %476 : vector<6x128xf32>
    %c1_268 = arith.constant 1 : index
    %c64_269 = arith.constant 64 : index
    %c0_270 = arith.constant 0 : index
    %478 = vector.load %arg9[%c1_268, %c64_269, %c0_270] : memref<2x168x128xf32, #tpu.memory_space<vmem>>, vector<1x32x128xf32>
    %479 = vector.shape_cast %478 : vector<1x32x128xf32> to vector<32x128xf32>
    %cst_271 = arith.constant dense<0.000000e+00> : vector<6x128xf32>
    %480 = tpu.matmul %71, %479, %cst_271 {dimension_numbers = #tpu.dot_dimension_numbers<[1], [0], [0], [1], [0, 0, 1, 1], [], []>} : vector<6x32xf32>, vector<32x128xf32>, vector<6x128xf32> -> vector<6x128xf32>
    %c1_272 = arith.constant 1 : index
    %c360_273 = arith.constant 360 : index
    %c0_274 = arith.constant 0 : index
    %481 = vector.load %arg8[%c1_272, %c360_273, %c0_274] : memref<2x624x64xf32, #tpu.memory_space<vmem>>, vector<1x128x8xf32>
    %482 = vector.shape_cast %481 : vector<1x128x8xf32> to vector<128x8xf32>
    %c1_275 = arith.constant 1 : index
    %c96_276 = arith.constant 96 : index
    %c0_277 = arith.constant 0 : index
    %483 = vector.load %arg9[%c1_275, %c96_276, %c0_277] : memref<2x168x128xf32, #tpu.memory_space<vmem>>, vector<1x8x128xf32>
    %484 = vector.shape_cast %483 : vector<1x8x128xf32> to vector<8x128xf32>
    %c592_278 = arith.constant 592 : index
    %c0_279 = arith.constant 0 : index
    %485 = vector.load %arg6[%c592_278, %c0_279] : memref<688x64xf32, #tpu.memory_space<vmem>>, vector<48x6xf32>
    %c0_280 = arith.constant 0 : index
    %c0_281 = arith.constant 0 : index
    %486 = vector.load %arg7[%c0_280, %c0_281] : memref<56x128xf32, #tpu.memory_space<vmem>>, vector<48x128xf32>
    %c640_282 = arith.constant 640 : index
    %c0_283 = arith.constant 0 : index
    %487 = vector.load %arg6[%c640_282, %c0_283] : memref<688x64xf32, #tpu.memory_space<vmem>>, vector<48x8xf32>
    %c48_284 = arith.constant 48 : index
    %c0_285 = arith.constant 0 : index
    %488 = vector.load %arg7[%c48_284, %c0_285] : memref<56x128xf32, #tpu.memory_space<vmem>>, vector<8x128xf32>
    %cst_286 = arith.constant dense<0.000000e+00> : vector<48x128xf32>
    %489 = tpu.matmul %485, %477, %cst_286 {dimension_numbers = #tpu.dot_dimension_numbers<[1], [0], [0], [1], [0, 0, 1, 1], [], []>} : vector<48x6xf32>, vector<6x128xf32>, vector<48x128xf32> -> vector<48x128xf32>
    %490 = arith.mulf %489, %486 : vector<48x128xf32>
    %cst_287 = arith.constant dense<0.000000e+00> : vector<48x128xf32>
    %491 = tpu.matmul %485, %480, %cst_287 {dimension_numbers = #tpu.dot_dimension_numbers<[1], [0], [0], [1], [0, 0, 1, 1], [], []>} : vector<48x6xf32>, vector<6x128xf32>, vector<48x128xf32> -> vector<48x128xf32>
    %492 = arith.mulf %491, %486 : vector<48x128xf32>
    %493 = tpu.transpose %490, [1, 0] : vector<48x128xf32> -> vector<128x48xf32>
    %cst_288 = arith.constant dense<0.000000e+00> : vector<5x48xf32>
    %494 = tpu.matmul %472, %493, %cst_288 {dimension_numbers = #tpu.dot_dimension_numbers<[1], [0], [0], [1], [0, 0, 1, 1], [], []>} : vector<5x128xf32>, vector<128x48xf32>, vector<5x48xf32> -> vector<5x48xf32>
    %cst_289 = arith.constant dense<0.000000e+00> : vector<5x8xf32>
    %495 = tpu.matmul %472, %482, %cst_289 {dimension_numbers = #tpu.dot_dimension_numbers<[1], [0], [0], [1], [0, 0, 1, 1], [], []>} : vector<5x128xf32>, vector<128x8xf32>, vector<5x8xf32> -> vector<5x8xf32>
    %cst_290 = arith.constant dense<0xFF800000> : vector<5xf32>
    %496 = vector.multi_reduction <maximumf>, %494, %cst_290 [1] : vector<5x48xf32> to vector<5xf32>
    %497 = vector.shape_cast %496 : vector<5xf32> to vector<5x1xf32>
    %cst_291 = arith.constant dense<0xFF800000> : vector<5xf32>
    %498 = vector.multi_reduction <maximumf>, %495, %cst_291 [1] : vector<5x8xf32> to vector<5xf32>
    %499 = vector.shape_cast %498 : vector<5xf32> to vector<5x1xf32>
    %500 = arith.maximumf %497, %499 : vector<5x1xf32>
    %501 = vector.broadcast %500 : vector<5x1xf32> to vector<5x48xf32>
    %502 = arith.subf %494, %501 : vector<5x48xf32>
    %503 = math.exp %502 : vector<5x48xf32>
    %504 = vector.broadcast %500 : vector<5x1xf32> to vector<5x8xf32>
    %505 = arith.subf %495, %504 : vector<5x8xf32>
    %506 = math.exp %505 : vector<5x8xf32>
    %cst_292 = arith.constant dense<0.000000e+00> : vector<5x8xf32>
    %507 = tpu.matmul %503, %487, %cst_292 {dimension_numbers = #tpu.dot_dimension_numbers<[1], [0], [0], [1], [0, 0, 1, 1], [], []>} : vector<5x48xf32>, vector<48x8xf32>, vector<5x8xf32> -> vector<5x8xf32>
    %508 = arith.addf %507, %506 : vector<5x8xf32>
    %509 = tpu.reciprocal %508 {approx = true} : vector<5x8xf32> -> vector<5x8xf32>
    %cst_293 = arith.constant dense<0.000000e+00> : vector<5x128xf32>
    %510 = tpu.matmul %503, %492, %cst_293 {dimension_numbers = #tpu.dot_dimension_numbers<[1], [0], [0], [1], [0, 0, 1, 1], [], []>} : vector<5x48xf32>, vector<48x128xf32>, vector<5x128xf32> -> vector<5x128xf32>
    %cst_294 = arith.constant dense<0.000000e+00> : vector<5x128xf32>
    %511 = tpu.matmul %506, %484, %cst_294 {dimension_numbers = #tpu.dot_dimension_numbers<[1], [0], [0], [1], [0, 0, 1, 1], [], []>} : vector<5x8xf32>, vector<8x128xf32>, vector<5x128xf32> -> vector<5x128xf32>
    %512 = arith.addf %510, %511 : vector<5x128xf32>
    %cst_295 = arith.constant dense<0.000000e+00> : vector<5x128xf32>
    %513 = tpu.matmul %509, %488, %cst_295 {dimension_numbers = #tpu.dot_dimension_numbers<[1], [0], [0], [1], [0, 0, 1, 1], [], []>} : vector<5x8xf32>, vector<8x128xf32>, vector<5x128xf32> -> vector<5x128xf32>
    %514 = arith.mulf %512, %513 : vector<5x128xf32>
    %c1_296 = arith.constant 1 : index
    %c232_297 = arith.constant 232 : index
    %c0_298 = arith.constant 0 : index
    %515 = vector.load %arg8[%c1_296, %c232_297, %c0_298] : memref<2x624x64xf32, #tpu.memory_space<vmem>>, vector<1x128x32xf32>
    %516 = vector.shape_cast %515 : vector<1x128x32xf32> to vector<128x32xf32>
    %cst_299 = arith.constant dense<0.000000e+00> : vector<5x32xf32>
    %517 = tpu.matmul %514, %516, %cst_299 {dimension_numbers = #tpu.dot_dimension_numbers<[1], [0], [0], [1], [0, 0, 1, 1], [], []>} : vector<5x128xf32>, vector<128x32xf32>, vector<5x32xf32> -> vector<5x32xf32>
    %c1_300 = arith.constant 1 : index
    %c224_301 = arith.constant 224 : index
    %c0_302 = arith.constant 0 : index
    %518 = vector.load %arg8[%c1_300, %c224_301, %c0_302] : memref<2x624x64xf32, #tpu.memory_space<vmem>>, vector<1x1x32xf32>
    %519 = vector.shape_cast %518 : vector<1x1x32xf32> to vector<1x32xf32>
    %cst_303 = arith.constant dense<0.000000e+00> : vector<5xf32>
    %520 = vector.multi_reduction <add>, %517, %cst_303 [1] : vector<5x32xf32> to vector<5xf32>
    %521 = vector.shape_cast %520 : vector<5xf32> to vector<5x1xf32>
    %cst_304 = arith.constant 3.200000e+01 : f32
    %522 = vector.broadcast %cst_304 : f32 to vector<5x1xf32>
    %523 = arith.divf %521, %522 : vector<5x1xf32>
    %524 = arith.mulf %517, %517 : vector<5x32xf32>
    %cst_305 = arith.constant dense<0.000000e+00> : vector<5xf32>
    %525 = vector.multi_reduction <add>, %524, %cst_305 [1] : vector<5x32xf32> to vector<5xf32>
    %526 = vector.shape_cast %525 : vector<5xf32> to vector<5x1xf32>
    %cst_306 = arith.constant 3.200000e+01 : f32
    %527 = vector.broadcast %cst_306 : f32 to vector<5x1xf32>
    %528 = arith.divf %526, %527 : vector<5x1xf32>
    %529 = arith.mulf %523, %523 : vector<5x1xf32>
    %530 = arith.subf %528, %529 : vector<5x1xf32>
    %531 = vector.broadcast %523 : vector<5x1xf32> to vector<5x32xf32>
    %532 = arith.subf %517, %531 : vector<5x32xf32>
    %cst_307 = arith.constant 9.99999974E-6 : f32
    %533 = vector.broadcast %cst_307 : f32 to vector<5x1xf32>
    %534 = arith.addf %530, %533 : vector<5x1xf32>
    %535 = math.rsqrt %534 : vector<5x1xf32>
    %536 = vector.broadcast %535 : vector<5x1xf32> to vector<5x32xf32>
    %537 = arith.mulf %532, %536 : vector<5x32xf32>
    %538 = vector.broadcast %519 : vector<1x32xf32> to vector<5x32xf32>
    %539 = arith.mulf %537, %538 : vector<5x32xf32>
    %540 = arith.addf %539, %445 : vector<5x32xf32>
    %c1_308 = arith.constant 1 : index
    %c488_309 = arith.constant 488 : index
    %c0_310 = arith.constant 0 : index
    %541 = vector.load %arg8[%c1_308, %c488_309, %c0_310] : memref<2x624x64xf32, #tpu.memory_space<vmem>>, vector<1x1x32xf32>
    %542 = vector.shape_cast %541 : vector<1x1x32xf32> to vector<1x32xf32>
    %cst_311 = arith.constant dense<0.000000e+00> : vector<5xf32>
    %543 = vector.multi_reduction <add>, %540, %cst_311 [1] : vector<5x32xf32> to vector<5xf32>
    %544 = vector.shape_cast %543 : vector<5xf32> to vector<5x1xf32>
    %cst_312 = arith.constant 3.200000e+01 : f32
    %545 = vector.broadcast %cst_312 : f32 to vector<5x1xf32>
    %546 = arith.divf %544, %545 : vector<5x1xf32>
    %547 = arith.mulf %540, %540 : vector<5x32xf32>
    %cst_313 = arith.constant dense<0.000000e+00> : vector<5xf32>
    %548 = vector.multi_reduction <add>, %547, %cst_313 [1] : vector<5x32xf32> to vector<5xf32>
    %549 = vector.shape_cast %548 : vector<5xf32> to vector<5x1xf32>
    %cst_314 = arith.constant 3.200000e+01 : f32
    %550 = vector.broadcast %cst_314 : f32 to vector<5x1xf32>
    %551 = arith.divf %549, %550 : vector<5x1xf32>
    %552 = arith.mulf %546, %546 : vector<5x1xf32>
    %553 = arith.subf %551, %552 : vector<5x1xf32>
    %554 = vector.broadcast %546 : vector<5x1xf32> to vector<5x32xf32>
    %555 = arith.subf %540, %554 : vector<5x32xf32>
    %cst_315 = arith.constant 9.99999974E-6 : f32
    %556 = vector.broadcast %cst_315 : f32 to vector<5x1xf32>
    %557 = arith.addf %553, %556 : vector<5x1xf32>
    %558 = math.rsqrt %557 : vector<5x1xf32>
    %559 = vector.broadcast %558 : vector<5x1xf32> to vector<5x32xf32>
    %560 = arith.mulf %555, %559 : vector<5x32xf32>
    %561 = vector.broadcast %542 : vector<1x32xf32> to vector<5x32xf32>
    %562 = arith.mulf %560, %561 : vector<5x32xf32>
    %c1_316 = arith.constant 1 : index
    %c104_317 = arith.constant 104 : index
    %c0_318 = arith.constant 0 : index
    %563 = vector.load %arg9[%c1_316, %c104_317, %c0_318] : memref<2x168x128xf32, #tpu.memory_space<vmem>>, vector<1x32x128xf32>
    %564 = vector.shape_cast %563 : vector<1x32x128xf32> to vector<32x128xf32>
    %cst_319 = arith.constant dense<0.000000e+00> : vector<5x128xf32>
    %565 = tpu.matmul %562, %564, %cst_319 {dimension_numbers = #tpu.dot_dimension_numbers<[1], [0], [0], [1], [0, 0, 1, 1], [], []>} : vector<5x32xf32>, vector<32x128xf32>, vector<5x128xf32> -> vector<5x128xf32>
    %c1_320 = arith.constant 1 : index
    %c136_321 = arith.constant 136 : index
    %c0_322 = arith.constant 0 : index
    %566 = vector.load %arg9[%c1_320, %c136_321, %c0_322] : memref<2x168x128xf32, #tpu.memory_space<vmem>>, vector<1x32x128xf32>
    %567 = vector.shape_cast %566 : vector<1x32x128xf32> to vector<32x128xf32>
    %cst_323 = arith.constant dense<0.000000e+00> : vector<5x128xf32>
    %568 = tpu.matmul %562, %567, %cst_323 {dimension_numbers = #tpu.dot_dimension_numbers<[1], [0], [0], [1], [0, 0, 1, 1], [], []>} : vector<5x32xf32>, vector<32x128xf32>, vector<5x128xf32> -> vector<5x128xf32>
    %cst_324 = arith.constant 0.000000e+00 : f32
    %569 = vector.broadcast %cst_324 : f32 to vector<5x128xf32>
    %570 = arith.subf %569, %568 : vector<5x128xf32>
    %571 = math.exp %570 : vector<5x128xf32>
    %cst_325 = arith.constant 1.000000e+00 : f32
    %572 = vector.broadcast %cst_325 : f32 to vector<5x128xf32>
    %573 = arith.addf %572, %571 : vector<5x128xf32>
    %cst_326 = arith.constant 1.000000e+00 : f32
    %574 = vector.broadcast %cst_326 : f32 to vector<5x128xf32>
    %575 = arith.divf %574, %573 : vector<5x128xf32>
    %576 = arith.mulf %568, %575 : vector<5x128xf32>
    %577 = arith.mulf %565, %576 : vector<5x128xf32>
    %c1_327 = arith.constant 1 : index
    %c496_328 = arith.constant 496 : index
    %c0_329 = arith.constant 0 : index
    %578 = vector.load %arg8[%c1_327, %c496_328, %c0_329] : memref<2x624x64xf32, #tpu.memory_space<vmem>>, vector<1x128x32xf32>
    %579 = vector.shape_cast %578 : vector<1x128x32xf32> to vector<128x32xf32>
    %cst_330 = arith.constant dense<0.000000e+00> : vector<5x32xf32>
    %580 = tpu.matmul %577, %579, %cst_330 {dimension_numbers = #tpu.dot_dimension_numbers<[1], [0], [0], [1], [0, 0, 1, 1], [], []>} : vector<5x128xf32>, vector<128x32xf32>, vector<5x32xf32> -> vector<5x32xf32>
    %581 = arith.addf %580, %540 : vector<5x32xf32>
    %582 = vector.extract_strided_slice %581 {offsets = [0, 0], sizes = [1, 32], strides = [1, 1]} : vector<5x32xf32> to vector<1x32xf32>
    %cst_331 = arith.constant dense<0xFF800000> : vector<1xf32>
    %583 = vector.multi_reduction <maximumf>, %582, %cst_331 [1] : vector<1x32xf32> to vector<1xf32>
    %584 = vector.shape_cast %583 : vector<1xf32> to vector<1x1xf32>
    %585 = vector.broadcast %584 : vector<1x1xf32> to vector<1x32xf32>
    %586 = arith.divf %582, %585 : vector<1x32xf32>
    %c376 = arith.constant 376 : index
    %c0_332 = arith.constant 0 : index
    %587 = vector.load %arg6[%c376, %c0_332] : memref<688x64xf32, #tpu.memory_space<vmem>>, vector<1x32xf32>
    %cst_333 = arith.constant dense<0.000000e+00> : vector<1xf32>
    %588 = vector.multi_reduction <add>, %586, %cst_333 [1] : vector<1x32xf32> to vector<1xf32>
    %589 = vector.shape_cast %588 : vector<1xf32> to vector<1x1xf32>
    %cst_334 = arith.constant 3.200000e+01 : f32
    %590 = vector.broadcast %cst_334 : f32 to vector<1x1xf32>
    %591 = arith.divf %589, %590 : vector<1x1xf32>
    %592 = arith.mulf %586, %586 : vector<1x32xf32>
    %cst_335 = arith.constant dense<0.000000e+00> : vector<1xf32>
    %593 = vector.multi_reduction <add>, %592, %cst_335 [1] : vector<1x32xf32> to vector<1xf32>
    %594 = vector.shape_cast %593 : vector<1xf32> to vector<1x1xf32>
    %cst_336 = arith.constant 3.200000e+01 : f32
    %595 = vector.broadcast %cst_336 : f32 to vector<1x1xf32>
    %596 = arith.divf %594, %595 : vector<1x1xf32>
    %597 = arith.mulf %591, %591 : vector<1x1xf32>
    %598 = arith.subf %596, %597 : vector<1x1xf32>
    %599 = vector.broadcast %591 : vector<1x1xf32> to vector<1x32xf32>
    %600 = arith.subf %586, %599 : vector<1x32xf32>
    %cst_337 = arith.constant 9.99999974E-6 : f32
    %601 = vector.broadcast %cst_337 : f32 to vector<1x1xf32>
    %602 = arith.addf %598, %601 : vector<1x1xf32>
    %603 = math.rsqrt %602 : vector<1x1xf32>
    %604 = vector.broadcast %603 : vector<1x1xf32> to vector<1x32xf32>
    %605 = arith.mulf %600, %604 : vector<1x32xf32>
    %606 = arith.mulf %605, %587 : vector<1x32xf32>
    %c384 = arith.constant 384 : index
    %c0_338 = arith.constant 0 : index
    %607 = vector.load %arg6[%c384, %c0_338] : memref<688x64xf32, #tpu.memory_space<vmem>>, vector<32x32xf32>
    %cst_339 = arith.constant dense<0.000000e+00> : vector<1x32xf32>
    %608 = tpu.matmul %606, %607, %cst_339 {dimension_numbers = #tpu.dot_dimension_numbers<[1], [0], [0], [1], [0, 0, 1, 1], [], []>} : vector<1x32xf32>, vector<32x32xf32>, vector<1x32xf32> -> vector<1x32xf32>
    %c0_340 = arith.constant 0 : index
    %c0_341 = arith.constant 0 : index
    %c0_342 = arith.constant 0 : index
    %609 = vector.load %arg10[%c0_340, %c0_341, %c0_342] : memref<1x1x32xf32, #tpu.memory_space<vmem>>, vector<1x1x32xf32>
    %610 = vector.shape_cast %609 : vector<1x1x32xf32> to vector<1x32xf32>
    %611 = vector.shape_cast %608 : vector<1x32xf32> to vector<1x1x32xf32>
    tpu.vector_store %arg10[%c0_340, %c0_341, %c0_342], %611 {strides = array<i32>} : memref<1x1x32xf32, #tpu.memory_space<vmem>>, vector<1x1x32xf32>,
    return
  }
  func.func @transform_0(%arg0: i32) -> (i32, i32, i32) {
    %c0_i32 = arith.constant 0 : i32
    %c0_i32_0 = arith.constant 0 : i32
    %c0_i32_1 = arith.constant 0 : i32
    return %arg0, %c0_i32, %c0_i32_0 : i32, i32, i32
  }
  func.func @transform_1(%arg0: i32) -> (i32, i32, i32) {
    %c0_i32 = arith.constant 0 : i32
    %c0_i32_0 = arith.constant 0 : i32
    %c0_i32_1 = arith.constant 0 : i32
    return %arg0, %c0_i32, %c0_i32_0 : i32, i32, i32
  }
  func.func @transform_2(%arg0: i32) -> (i32, i32, i32) {
    %c0_i32 = arith.constant 0 : i32
    %c0_i32_0 = arith.constant 0 : i32
    %c0_i32_1 = arith.constant 0 : i32
    return %arg0, %c0_i32, %c0_i32_0 : i32, i32, i32
  }
  func.func @transform_3(%arg0: i32) -> (i32, i32, i32) {
    %c0_i32 = arith.constant 0 : i32
    %c0_i32_0 = arith.constant 0 : i32
    %c0_i32_1 = arith.constant 0 : i32
    return %arg0, %c0_i32, %c0_i32_0 : i32, i32, i32
  }
  func.func @transform_4(%arg0: i32) -> (i32, i32) {
    %c0_i32 = arith.constant 0 : i32
    %c0_i32_0 = arith.constant 0 : i32
    %c0_i32_1 = arith.constant 0 : i32
    return %c0_i32, %c0_i32_0 : i32, i32
  }
  func.func @transform_5(%arg0: i32) -> (i32, i32) {
    %c0_i32 = arith.constant 0 : i32
    %c0_i32_0 = arith.constant 0 : i32
    %c0_i32_1 = arith.constant 0 : i32
    return %c0_i32, %c0_i32_0 : i32, i32
  }
  func.func @transform_6(%arg0: i32) -> (i32, i32) {
    %c0_i32 = arith.constant 0 : i32
    %c0_i32_0 = arith.constant 0 : i32
    %c0_i32_1 = arith.constant 0 : i32
    return %c0_i32, %c0_i32_0 : i32, i32
  }
  func.func @transform_7(%arg0: i32) -> (i32, i32, i32) {
    %c0_i32 = arith.constant 0 : i32
    %c0_i32_0 = arith.constant 0 : i32
    %c0_i32_1 = arith.constant 0 : i32
    %c0_i32_2 = arith.constant 0 : i32
    return %c0_i32, %c0_i32_0, %c0_i32_1 : i32, i32, i32
  }
  func.func @transform_8(%arg0: i32) -> (i32, i32, i32) {
    %c0_i32 = arith.constant 0 : i32
    %c0_i32_0 = arith.constant 0 : i32
    %c0_i32_1 = arith.constant 0 : i32
    %c0_i32_2 = arith.constant 0 : i32
    return %c0_i32, %c0_i32_0, %c0_i32_1 : i32, i32, i32
  }
  func.func @transform_9(%arg0: i32) -> (i32, i32, i32) {
    %c0_i32 = arith.constant 0 : i32
    %c0_i32_0 = arith.constant 0 : i32
    %c0_i32_1 = arith.constant 0 : i32
    return %arg0, %c0_i32, %c0_i32_0 : i32, i32, i32
  }
}

</mosaic_0001>

<bundles_post_ra>
// kernel: compodiff_forward.1
= control target key start
LH: loop header
LB: loop body
LE: loop exit
PB: predicated region body
PF: predicated region fallthrough
CT: control target
= control target key end

     0   :  { %s9562_s0 = inlined_call_operand.vmem [shape: f32[2,4,32], index: 0, kind: input, shape index: {}]   ;;  %s9563_s1 = inlined_call_operand.vmem [shape: f32[2,4,32], index: 1, kind: input, shape index: {}]   ;;  %s9564_s2 = inlined_call_operand.vmem [shape: f32[2,1,64], index: 2, kind: input, shape index: {}]   ;;  %s9565_s3 = inlined_call_operand.vmem [shape: bf16[2,1,4096], index: 3, kind: input, shape index: {}]   ;;  %s9566_s4 = inlined_call_operand.vmem [shape: bf16[4096,64], index: 4, kind: input, shape index: {}]   ;;  %s9567_s5 = inlined_call_operand.vmem [shape: f32[688,64], index: 5, kind: input, shape index: {}]   ;;  %s9568_s6 = inlined_call_operand.vmem [shape: f32[56,128], index: 6, kind: input, shape index: {}]   ;;  %s9569_s7 = inlined_call_operand.vmem [shape: f32[2,624,64], index: 7, kind: input, shape index: {}]   ;;  %s9570_s8 = inlined_call_operand.vmem [shape: f32[2,168,128], index: 8, kind: input, shape index: {}]   ;;  %s9571_s9 = inlined_call_operand.hbm [shape: f32[2,1,32], index: 9, kind: output, shape index: {}]  }
   0x1   :  { %9579 = sst [smem:[#allocation5_spill]] %s9564_s2 }
   0x2   :  { %14 = vsyncpa [#allocation3], 0 }
   0x3   :  { %16 = vsyncpa [#allocation3 + $0x1], 0  ;;  %s7367_s30 = smov 0   ;;  %s7369_s10 = smov 0  }
   0x4   :  { %s7371_s11 = smov 0   ;;  %s7373_s12 = smov 0  }
   0x5 LB: > { %s7388_s13 = sadd.s32 4294967295, %s7312_s12   ;;  %s5574_s14 = sadd.s32 4294967294, %s7312_s12   ;;  %s7312_s12 = sphi %s7373_s12, %s9613_s12   ;;  %s7308_s11 = sphi %s7371_s11, %s9612_s11   ;;  %s7304_s10 = sphi %s7369_s10, %s9611_s10   ;;  %s7300_s30 = sphi %s7367_s30, %s9610_s30  }
   0x6   : > { %s7392_s15 = sadd.s32 1, %s7312_s12   ;;  %s238_s16 = sadd.s32 1, %s7308_s11 }
   0x7   : > { %s235_s17 = ssub.s32 %s7312_s12, %s7392_s15  ;;  %p248_p0 = scmp.ne.s32.totalorder %s7308_s11, %s7304_s10 }
   0x8   : > { %p236_p1 = scmp.eq.s32.totalorder %s235_s17, 0  ;;  %p249_p2 = scmp.eq.s32.totalorder %s7388_s13, 1 }
   0x9   : > { %p254_p3 = scmp.ne.s32.totalorder %s7304_s10, %s7300_s30  ;;  %p255_p4 = scmp.eq.s32.totalorder %s5574_s14, 1 }
   0xa   : > { %s7403_s18 = scalar_select %p236_p1, %s7308_s11, %s238_s16  }
   0xb   : > { %p7405_p5 = por %p249_p2, %p248_p0  ;;  %p7409_p6 = por %p255_p4, %p254_p3 }
   0xc   : > { %p5577_p7 = scmp.ge.s32.totalorder %s7312_s12, 1  ;;  %p315_p8 = scmp.lt.s32.totalorder %s7312_s12, 3 }
   0xe   : > { %p316_p9 = pnand %p5577_p7, %p315_p8 }
   0xf   : > { %p360_p10 = scmp.lt.s32.totalorder (!%p316_p9), %s7388_s13, 1  ;;  %s9582_s2 = sld [smem:[#allocation5_spill]] (!%p316_p9) }
  0x10   : > { %319 = sbr.rel (%p316_p9) target bundleno = 7489 (0x1d41), region = 56  ;;  %s7314_s26 = smov (!%p316_p9), 96  }
  0x15   : > { %v414_v0 = vld [vmem:[%s9567_s5 + $0x40] sm:$0xff]  ;;  %v413_v1 = vld [vmem:[%s9567_s5 + $0x38] sm:$0xff]  ;;  %s7423_s25 = scalar_select %p360_p10, %s7388_s13, 1  ;;  %v412_v2 = vld [vmem:[%s9567_s5 + $0x30] sm:$0xff]  ;;  %vm387_vm0 = vcmask 261120   ;;  %vm470_vm5 = vcmask 523264  }
  0x16   : > { %433 = vmatpush.msra.mxu1 %v414_v0  ;;  %v411_v3 = vld [vmem:[%s9567_s5 + $0x28] sm:$0xff]  ;;  %v467_v8 = vld [vmem:[%s9567_s5 + $0x80] sm:$0xff]  ;;  %v466_v9 = vld [vmem:[%s9567_s5 + $0x78] sm:$0xff]  ;;  %vm3190_vm10 = vcmask 1043456   ;;  %vm9578_vm11 = vcmask 258048  }
  0x17   : > { %s7432_s14 = scalar_lea.vmem %s9582_s2, %s7423_s25  ;;  %s5580_s16 = sshll.u32 %s7423_s25, 5  ;;  %v468_v7 = vld [vmem:[%s9567_s5 + $0x88] sm:$0xff]  ;;  %v465_v10 = vld [vmem:[%s9567_s5 + $0x70] sm:$0xff]  ;;  %v463_v12 = vld [vmem:[%s9567_s5 + $0x60] sm:$0xff] }
  0x18   : > { %434 = vmatpush.msra.mxu1 %v413_v1  ;;  %s7441_s24 = scalar_lea.vmem %s9565_s3, %s5580_s16  ;;  %v7116_v4 = vld [vmem:[%s7432_s14] ss:$0 sm:$0xff]  ;;  %482 = vmatpush.msra.mxu2 %v468_v7  ;;  %v464_v11 = vld [vmem:[%s9567_s5 + $0x68] sm:$0xff]  ;;  %v462_v14 = vld [vmem:[%s9567_s5 + $0x58] sm:$0xff] }
  0x19   : > { %v378_v5 = vld [vmem:[%s7441_s24] sm:$0xff]  ;;  %417 = vrot.lane.b32.xlu0 %v7116_v4, %s7314_s26  ;;  %v415_v13 = vld [vmem:[%s9567_s5 + $0x48] sm:$0x1]  ;;  %v461_v17 = vld [vmem:[%s9567_s5 + $0x50] sm:$0xff] }
  0x1a   : > { %435 = vmatpush.msra.mxu1 %v412_v2  ;;  %1060 = vst [vmem:[#allocation1] ss:$9 sm:$0xff] %v378_v5  ;;  %483 = vmatpush.msra.mxu2 %v467_v8  ;;  %v385_v19 = vld [vmem:[%s9567_s5 + $0x18] sm:$0xff]  ;;  %v384_v20 = vld [vmem:[%s9567_s5 + $0x10] sm:$0xff]  ;;  %v383_v23 = vld [vmem:[%s9567_s5 + $0x8] sm:$0xff] }
  0x1b   : > { %403 = vmatpush.msra.mxu0 %v385_v19  ;;  %v6840_v21 = vld [vmem:[%s9566_s4 + $0xb8] sm:$0xff]  ;;  %v382_v25 = vld [vmem:[%s9567_s5] sm:$0xff]  ;;  %v6839_v26 = vld [vmem:[%s9566_s4 + $0xb0] sm:$0xff] }
  0x1c   : > { %436 = vmatpush.msra.mxu1 %v411_v3  ;;  %484 = vmatpush.msra.mxu2 %v466_v9  ;;  %v6832_v24 = vld [vmem:[%s9566_s4 + $0x78] sm:$0xff]  ;;  %v521_v27 = vld [vmem:[%s9567_s5 + $0xd0] sm:$0xff]  ;;  %v520_v30 = vld [vmem:[%s9567_s5 + $0xc8] sm:$0xff] }
  0x1d   : > { %404 = vmatpush.msra.mxu0 %v384_v20  ;;  %v6824_v28 = vld [vmem:[%s9566_s4 + $0x38] sm:$0xff]  ;;  %534 = vmatpush.msra.mxu3 %v521_v27  ;;  %v6831_v29 = vld [vmem:[%s9566_s4 + $0x70] sm:$0xff]  ;;  %v377_v31 = vld [vmem:[%s7432_s14] sm:$0x1] }
  0x1e   : > { %485 = vmatpush.msra.mxu2 %v465_v10  ;;  %2680 = vmatpush.bf16.msrb.mxu1 %v6832_v24  ;;  %v519_v32 = vld [vmem:[%s9567_s5 + $0xc0] sm:$0xff]  ;;  %v6838_v33 = vld [vmem:[%s9566_s4 + $0xa8] sm:$0xff]  ;;  %v6823_v34 = vld [vmem:[%s9566_s4 + $0x30] sm:$0xff] }
  0x1f   : > { %405 = vmatpush.msra.mxu0 %v383_v23  ;;  %535 = vmatpush.msra.mxu3 %v520_v30  ;;  %v6830_v35 = vld [vmem:[%s9566_s4 + $0x68] sm:$0xff]  ;;  %v518_v36 = vld [vmem:[%s9567_s5 + $0xb8] sm:$0xff]  ;;  %v517_v38 = vld [vmem:[%s9567_s5 + $0xb0] sm:$0xff] }
  0x20   : > { %486 = vmatpush.msra.mxu2 %v464_v11  ;;  %v6837_v40 = vld [vmem:[%s9566_s4 + $0xa0] sm:$0xff]  ;;  %v6822_v41 = vld [vmem:[%s9566_s4 + $0x28] sm:$0xff]  ;;  %v6836_v43 = vld [vmem:[%s9566_s4 + $0x98] sm:$0xff] }
  0x21   : > { %406 = vmatpush.msra.mxu0 %v382_v25  ;;  %536 = vmatpush.msra.mxu3 %v519_v32  ;;  %v6829_v42 = vld [vmem:[%s9566_s4 + $0x60] sm:$0xff]  ;;  %v6820_v56 = vld [vmem:[%s9566_s4 + $0x18] sm:$0xff]  ;;  %v516_v57 = vld [vmem:[%s9567_s5 + $0xa8] sm:$0xff] }
  0x22   : > { %487 = vmatpush.msra.mxu2 %v463_v12  ;;  %2681 = vmatpush.bf16.msrb.mxu1 %v6831_v29  ;;  %v6821_v44 = vld [vmem:[%s9566_s4 + $0x20] sm:$0xff]  ;;  %v6828_v58 = vld [vmem:[%s9566_s4 + $0x58] sm:$0xff]  ;;  %v6835_v59 = vld [vmem:[%s9566_s4 + $0x90] sm:$0xff] }
  0x23   : > { %2667 = vmatpush.bf16.msrb.mxu0 %v6824_v28  ;;  %537 = vmatpush.msra.mxu3 %v518_v36  ;;  %v515_v60 = vld [vmem:[%s9567_s5 + $0xa0] sm:$0xff]  ;;  %v6819_v61 = vld [vmem:[%s9566_s4 + $0x10] sm:$0xff]  ;;  %v514_v62 = vld [vmem:[%s9567_s5 + $0x98] sm:$0xff] }
  0x24   : > { %488 = vmatpush.msra.mxu2 %v462_v14  ;;  %5581 = vmatmul.msk.f32.vlgmr.msra.gmra.mxu0 %vm387_vm0, %v377_v31  ;;  %v6848_v63 = vld [vmem:[%s9566_s4 + $0xf8] sm:$0xff]  ;;  %v6827_v0 = vld [vmem:[%s9566_s4 + $0x50] sm:$0xff]  ;;  %v6834_v1 = vld [vmem:[%s9566_s4 + $0x88] sm:$0xff] }
  0x25   : > { %538 = vmatpush.msra.mxu3 %v517_v38  ;;  %v6818_v2 = vld [vmem:[%s9566_s4 + $0x8] sm:$0xff]  ;;  %v6847_v3 = vld [vmem:[%s9566_s4 + $0xf0] sm:$0xff]  ;;  %v6833_v5 = vld [vmem:[%s9566_s4 + $0x80] sm:$0xff] }
  0x26   : > { %489 = vmatpush.msra.mxu2 %v461_v17  ;;  %2682 = vmatpush.bf16.msrb.mxu1 %v6830_v35  ;;  %v6826_v4 = vld [vmem:[%s9566_s4 + $0x48] sm:$0xff]  ;;  %v6817_v7 = vld [vmem:[%s9566_s4] sm:$0xff]  ;;  %v6856_v9 = vld [vmem:[%s9566_s4 + $0x138] sm:$0xff] }
  0x27   : > { %2668 = vmatpush.bf16.msrb.mxu0 %v6823_v34  ;;  %539 = vmatpush.msra.mxu3 %v516_v57  ;;  %v6846_v8 = vld [vmem:[%s9566_s4 + $0xe8] sm:$0xff]  ;;  %v6825_v10 = vld [vmem:[%s9566_s4 + $0x40] sm:$0xff]  ;;  %v6864_v11 = vld [vmem:[%s9566_s4 + $0x178] sm:$0xff] }
  0x28   : > { %2693 = vmatpush.bf16.msrb.mxu2 %v6840_v21  ;;  %v6871_v12 = vld [vmem:[%s9566_s4 + $0x1b0] sm:$0xff]  ;;  %v6844_v17 = vld [vmem:[%s9566_s4 + $0xd8] sm:$0xff]  ;;  %v6862_v19 = vld [vmem:[%s9566_s4 + $0x168] sm:$0xff] }
  0x29   : > { %540 = vmatpush.msra.mxu3 %v515_v60  ;;  %v6855_v14 = vld [vmem:[%s9566_s4 + $0x130] sm:$0xff]  ;;  %v6869_v20 = vld [vmem:[%s9566_s4 + $0x1a0] sm:$0xff]  ;;  %v6868_v24 = vld [vmem:[%s9566_s4 + $0x198] sm:$0xff] }
  0x2a   : > { %2683 = vmatpush.bf16.msrb.mxu1 %v6829_v42  ;;  %v6843_v21 = vld [vmem:[%s9566_s4 + $0xd0] sm:$0xff]  ;;  %v6861_v23 = vld [vmem:[%s9566_s4 + $0x160] sm:$0xff]  ;;  %v6842_v25 = vld [vmem:[%s9566_s4 + $0xc8] sm:$0xff] }
  0x2b   : > { %2669 = vmatpush.bf16.msrb.mxu0 %v6822_v41  ;;  %541 = vmatpush.msra.mxu3 %v514_v62  ;;  %v469_v27 = vld [vmem:[%s9567_s5 + $0x90] sm:$0x1]  ;;  %v6860_v28 = vld [vmem:[%s9566_s4 + $0x158] sm:$0xff]  ;;  %v6841_v31 = vld [vmem:[%s9566_s4 + $0xc0] sm:$0xff] }
  0x2c   : > { %2694 = vmatpush.bf16.msrb.mxu2 %v6839_v26  ;;  %v6852_v26 = vld [vmem:[%s9566_s4 + $0x118] sm:$0xff]  ;;  %v6867_v29 = vld [vmem:[%s9566_s4 + $0x190] sm:$0xff]  ;;  %v6866_v36 = vld [vmem:[%s9566_s4 + $0x188] sm:$0xff] }
  0x2d   : > { %2706 = vmatpush.bf16.msrb.mxu3 %v6848_v63  ;;  %v6851_v32 = vld [vmem:[%s9566_s4 + $0x110] sm:$0xff]  ;;  %v6904_v42 = vld [vmem:[%s9566_s4 + $0x2b8] sm:$0xff]  ;;  %v6901_v57 = vld [vmem:[%s9566_s4 + $0x2a0] sm:$0xff] }
  0x2e   : > { %2684 = vmatpush.bf16.msrb.mxu1 %v6828_v58  ;;  %v6859_v35 = vld [vmem:[%s9566_s4 + $0x150] sm:$0xff]  ;;  %v6900_v63 = vld [vmem:[%s9566_s4 + $0x298] sm:$0xff] }
  0x2f   : > { %2670 = vmatpush.bf16.msrb.mxu0 %v6821_v44  ;;  %v1063_v41 = vld [vmem:[#allocation1 + $0x12] sm:$0xff]  ;;  %v1061_v44 = vld [vmem:[#allocation1] sm:$0xff] }
  0x30   : > { %2695 = vmatpush.bf16.msrb.mxu2 %v6838_v33 }
  0x31   : > { %2707 = vmatpush.bf16.msrb.mxu3 %v6847_v3 }
  0x32   : > { %2685 = vmatpush.bf16.msrb.mxu1 %v6827_v0 }
  0x33   : > { %2671 = vmatpush.bf16.msrb.mxu0 %v6820_v56  ;;  %v6894_v56 = vld [vmem:[%s9566_s4 + $0x268] sm:$0xff] }
  0x34   : > { %2696 = vmatpush.bf16.msrb.mxu2 %v6837_v40  ;;  %v6865_v40 = vld [vmem:[%s9566_s4 + $0x180] sm:$0xff] }
  0x35   : > { %2708 = vmatpush.bf16.msrb.mxu3 %v6846_v8 }
  0x36   : > { %2686 = vmatpush.bf16.msrb.mxu1 %v6826_v4  ;;  %v6892_v4 = vld [vmem:[%s9566_s4 + $0x258] sm:$0xff] }
  0x37   : > { %2672 = vmatpush.bf16.msrb.mxu0 %v6819_v61  ;;  %v6893_v61 = vld [vmem:[%s9566_s4 + $0x260] sm:$0xff] }
  0x38   : > { %2697 = vmatpush.bf16.msrb.mxu2 %v6836_v43  ;;  %v6849_v43 = vld [vmem:[%s9566_s4 + $0x100] sm:$0xff] }
  0x3a   : > { %2687 = vmatpush.bf16.msrb.mxu1 %v6825_v10 }
  0x3b   : > { %2673 = vmatpush.bf16.msrb.mxu0 %v6818_v2 }
  0x3c   : > { %2698 = vmatpush.bf16.msrb.mxu2 %v6835_v59  ;;  %v6885_v59 = vld [vmem:[%s9566_s4 + $0x220] sm:$0xff] }
  0x3f   : > { %2674 = vmatpush.bf16.msrb.mxu0 %v6817_v7 }
  0x40   : > { %2699 = vmatpush.bf16.msrb.mxu2 %v6834_v1  ;;  %v6884_v1 = vld [vmem:[%s9566_s4 + $0x218] sm:$0xff] }
  0x42   : > { %2675 = vmatmul.bf16.vlgmr.msrb.gmra.mxu0 %v1061_v44  ;;  %v6875_v44 = vld [vmem:[%s9566_s4 + $0x1d0] sm:$0xff] }
  0x43   : > { %2719 = vmatpush.bf16.msra.mxu0 %v6856_v9  ;;  %v6883_v9 = vld [vmem:[%s9566_s4 + $0x210] sm:$0xff] }
  0x44   : > { %2700 = vmatpush.bf16.msrb.mxu2 %v6833_v5  ;;  %v6899_v5 = vld [vmem:[%s9566_s4 + $0x290] sm:$0xff] }
  0x47   : > { %2720 = vmatpush.bf16.msra.mxu0 %v6855_v14  ;;  %v6891_v14 = vld [vmem:[%s9566_s4 + $0x250] sm:$0xff] }
  0x8b   : > { %v418_v6 = vpop.permute.xlu0 %417 }
  0x8c   : > { %5582 = vmatmul.msk.f32.vlgmr.msra.gmra.mxu1 %vm387_vm0, %v418_v6  ;;  %v6872_v6 = vld [vmem:[%s9566_s4 + $0x1b8] sm:$0xff] }
  0x8d   : > { %2732 = vmatpush.bf16.msra.mxu1 %v6864_v11  ;;  %v6880_v11 = vld [vmem:[%s9566_s4 + $0x1f8] sm:$0xff] }
 0x109   : > { %v438_v15 = vpop.f32.mrf.mxu1 }
 0x10a   : > { %v7470_v16 = vadd.f32 %v438_v15, %v415_v13  ;;  %v6845_v13 = vld [vmem:[%s9566_s4 + $0xe0] sm:$0xff]  ;;  %v6863_v15 = vld [vmem:[%s9566_s4 + $0x170] sm:$0xff] }
 0x10b   : > { %2709 = vmatpush.bf16.msrb.mxu3 %v6845_v13  ;;  %2733 = vmatpush.bf16.msra.mxu1 %v6863_v15  ;;  %v1065_v13 = vld [vmem:[#allocation1 + $0x24] sm:$0xff] }
 0x10c   : > { %v441_v18 = vsub.f32 0.0, %v7470_v16  ;;  %v6898_v15 = vld [vmem:[%s9566_s4 + $0x288] sm:$0xff] }
 0x10e   : > { %v442_v22 = vmul.f32 1.442695, %v441_v18  ;;  %v6854_v18 = vld [vmem:[%s9566_s4 + $0x128] sm:$0xff] }
 0x10f   : > { %2710 = vmatpush.bf16.msrb.mxu3 %v6844_v17  ;;  %2721 = vmatpush.bf16.msra.mxu0 %v6854_v18  ;;  %v1066_v17 = vld [vmem:[#allocation1 + $0x2d] sm:$0xff] }
 0x110   : > { %7127 = vpow2.f32 %v442_v22  ;;  %2734 = vmatpush.bf16.msra.mxu1 %v6862_v19  ;;  %v6853_v22 = vld [vmem:[%s9566_s4 + $0x120] sm:$0xff]  ;;  %v6882_v18 = vld [vmem:[%s9566_s4 + $0x208] sm:$0xff] }
 0x111   : > { %v379_v19 = vld [vmem:[%s7441_s24 + $0x8] sm:$0xff] }
 0x113   : > { %2711 = vmatpush.bf16.msrb.mxu3 %v6843_v21  ;;  %2722 = vmatpush.bf16.msra.mxu0 %v6853_v22  ;;  %v1064_v21 = vld [vmem:[#allocation1 + $0x1b] sm:$0xff]  ;;  %v6890_v22 = vld [vmem:[%s9566_s4 + $0x248] sm:$0xff] }
 0x114   : > { %2735 = vmatpush.bf16.msra.mxu1 %v6861_v23  ;;  %v6897_v23 = vld [vmem:[%s9566_s4 + $0x280] sm:$0xff] }
 0x116   : > { %v7128_v37 = vpop.eup %7127 }
 0x117   : > { %v444_v39 = vadd.f32 1.0, %v7128_v37  ;;  %2712 = vmatpush.bf16.msrb.mxu3 %v6842_v25  ;;  %2723 = vmatpush.bf16.msra.mxu0 %v6852_v26  ;;  %v6850_v37 = vld [vmem:[%s9566_s4 + $0x108] sm:$0xff]  ;;  %v6881_v25 = vld [vmem:[%s9566_s4 + $0x200] sm:$0xff] }
 0x118   : > { %2736 = vmatpush.bf16.msra.mxu1 %v6860_v28  ;;  %v7771_v26 = vld [vmem:[#allocation1 + $0x3f] sm:$0xff]  ;;  %v6878_v28 = vld [vmem:[%s9566_s4 + $0x1e8] sm:$0xff] }
 0x119   : > { %7129 = vrcp.f32 %v444_v39  ;;  %v456_v48 = vand.u32 2147483648, %v444_v39  ;;  %v454_v50 = vand.u32 2147483647, %v444_v39  ;;  %vm450_vm2 = vweird.f32 %v444_v39 }
 0x11b   : > { %v457_v52 = vor.u32 1.1754944e-38, %v456_v48  ;;  %vm455_vm4 = vcmp.eq.f32.partialorder %v454_v50, 8.507059e+37  ;;  %2713 = vmatpush.bf16.msrb.mxu3 %v6841_v31  ;;  %2724 = vmatpush.bf16.msra.mxu0 %v6851_v32  ;;  %v6896_v48 = vld [vmem:[%s9566_s4 + $0x278] sm:$0xff]  ;;  %v6935_v31 = vld [vmem:[%s9566_s4 + $0x3b0] sm:$0xff] }
 0x11c   : > { %2737 = vmatpush.bf16.msra.mxu1 %v6859_v35  ;;  %v6919_v32 = vld [vmem:[%s9566_s4 + $0x330] sm:$0xff] }
 0x11d   : > { %v6927_v35 = vld [vmem:[%s9566_s4 + $0x370] sm:$0xff] }
 0x11f   : > { %v7130_v45 = vpop.eup %7129  ;;  %2725 = vmatpush.bf16.msra.mxu0 %v6850_v37 }
 0x120   : > { %v446_v46 = vmul.f32 %v7130_v45, %v444_v39  ;;  %vm451_vm1 = vweird.f32 %v7130_v45  ;;  %v6858_v39 = vld [vmem:[%s9566_s4 + $0x148] sm:$0xff] }
 0x121   : > { %vm452_vm3 = vmor %vm450_vm2, %vm451_vm1  ;;  %2738 = vmatpush.bf16.msra.mxu1 %v6858_v39  ;;  %v6876_v39 = vld [vmem:[%s9566_s4 + $0x1d8] sm:$0xff] }
 0x122   : > { %v447_v47 = vsub.f32 1.0, %v446_v46  ;;  %v6857_v46 = vld [vmem:[%s9566_s4 + $0x140] sm:$0xff] }
 0x123   : > { %2726 = vmatpush.bf16.msra.mxu0 %v6849_v43  ;;  %v6917_v43 = vld [vmem:[%s9566_s4 + $0x320] sm:$0xff] }
 0x124   : > { %v448_v49 = vmul.f32 %v7130_v45, %v447_v47  ;;  %v1062_v47 = vld [vmem:[#allocation1 + $0x9] sm:$0xff] }
 0x125   : > { %2739 = vmatpush.bf16.msra.mxu1 %v6857_v46  ;;  %v6932_v46 = vld [vmem:[%s9566_s4 + $0x398] sm:$0xff] }
 0x126   : > { %v449_v51 = vadd.f32 %v7130_v45, %v448_v49  ;;  %v6903_v49 = vld [vmem:[%s9566_s4 + $0x2b0] sm:$0xff]  ;;  %2688 = vmatmul.bf16.vlgmr.msrb.gmra.mxu1 %v1062_v47  ;;  %2727 = vmatmul.bf16.vlgmr.msra.gmra.mxu0 %v1065_v13  ;;  %v6916_v47 = vld [vmem:[%s9566_s4 + $0x318] sm:$0xff]  ;;  %v6965_v13 = vld [vmem:[%s9566_s4 + $0x4a0] sm:$0xff] }
 0x128   : > { %v453_v53 = vsel %vm452_vm3, %v7130_v45, %v449_v51  ;;  %v6888_v45 = vld [vmem:[%s9566_s4 + $0x238] sm:$0xff] }
 0x129   : > { %v458_v54 = vsel %vm455_vm4, %v457_v52, %v453_v53  ;;  %2771 = vmatpush.bf16.msrb.mxu0 %v6888_v45  ;;  %v6887_v52 = vld [vmem:[%s9566_s4 + $0x230] sm:$0xff]  ;;  %2784 = vmatpush.bf16.msrb.mxu1 %v6896_v48  ;;  %v6925_v45 = vld [vmem:[%s9566_s4 + $0x360] sm:$0xff]  ;;  %v6874_v48 = vld [vmem:[%s9566_s4 + $0x1c8] sm:$0xff] }
 0x12a   : > { %v460_v55 = vmul.f32 %v458_v54, %v7470_v16  ;;  %v6870_v16 = vld [vmem:[%s9566_s4 + $0x1a8] sm:$0xff]  ;;  %v6895_v53 = vld [vmem:[%s9566_s4 + $0x270] sm:$0xff] }
 0x12b   : > { %v6902_v54 = vld [vmem:[%s9566_s4 + $0x2a8] sm:$0xff] }
 0x12c   : > { %5583 = vmatmul.msk.f32.vlgmr.msra.gmra.mxu2 %vm470_vm5, %v460_v55  ;;  %v6886_v55 = vld [vmem:[%s9566_s4 + $0x228] sm:$0xff] }
 0x12d   : > { %2745 = vmatpush.bf16.msra.mxu2 %v6872_v6  ;;  %2772 = vmatpush.bf16.msrb.mxu0 %v6887_v52  ;;  %v1067_v6 = vld [vmem:[#allocation1 + $0x36] sm:$0xff]  ;;  %v6873_v52 = vld [vmem:[%s9566_s4 + $0x1c0] sm:$0xff] }
 0x12e   : > { %2785 = vmatpush.bf16.msrb.mxu1 %v6895_v53  ;;  %1070 = vst [vmem:[#allocation1] ss:$9 sm:$0xff] %v379_v19  ;;  %v6912_v53 = vld [vmem:[%s9566_s4 + $0x2f8] sm:$0xff]  ;;  %v6906_v19 = vld [vmem:[%s9566_s4 + $0x2c8] sm:$0xff] }
 0x131   : > { %2746 = vmatpush.bf16.msra.mxu2 %v6871_v12  ;;  %2773 = vmatpush.bf16.msrb.mxu0 %v6886_v55  ;;  %v6930_v55 = vld [vmem:[%s9566_s4 + $0x388] sm:$0xff] }
 0x132   : > { %2786 = vmatpush.bf16.msrb.mxu1 %v6894_v56  ;;  %v6914_v56 = vld [vmem:[%s9566_s4 + $0x308] sm:$0xff] }
 0x134   : > { %2701 = vmatmul.bf16.vlgmr.msrb.gmra.mxu2 %v1063_v41  ;;  %v6926_v41 = vld [vmem:[%s9566_s4 + $0x368] sm:$0xff] }
 0x135   : > { %2747 = vmatpush.bf16.msra.mxu2 %v6870_v16  ;;  %2774 = vmatpush.bf16.msrb.mxu0 %v6885_v59  ;;  %v1071_v37 = vld [vmem:[#allocation1] sm:$0xff] }
 0x136   : > { %2787 = vmatpush.bf16.msrb.mxu1 %v6893_v61  ;;  %v6929_v59 = vld [vmem:[%s9566_s4 + $0x380] sm:$0xff] }
 0x137   : > { %2740 = vmatmul.bf16.vlgmr.msra.gmra.mxu1 %v1066_v17  ;;  %v6913_v61 = vld [vmem:[%s9566_s4 + $0x300] sm:$0xff]  ;;  %v6964_v17 = vld [vmem:[%s9566_s4 + $0x498] sm:$0xff] }
 0x139   : > { %2748 = vmatpush.bf16.msra.mxu2 %v6869_v20  ;;  %2775 = vmatpush.bf16.msrb.mxu0 %v6884_v1  ;;  %v6879_v20 = vld [vmem:[%s9566_s4 + $0x1f0] sm:$0xff]  ;;  %v6921_v1 = vld [vmem:[%s9566_s4 + $0x340] sm:$0xff] }
 0x13a   : > { %2788 = vmatpush.bf16.msrb.mxu1 %v6892_v4  ;;  %v6967_v4 = vld [vmem:[%s9566_s4 + $0x4b0] sm:$0xff] }
 0x13d   : > { %2749 = vmatpush.bf16.msra.mxu2 %v6868_v24  ;;  %2776 = vmatpush.bf16.msrb.mxu0 %v6883_v9  ;;  %v6936_v24 = vld [vmem:[%s9566_s4 + $0x3b8] sm:$0xff]  ;;  %v6966_v9 = vld [vmem:[%s9566_s4 + $0x4a8] sm:$0xff] }
 0x13e   : > { %2789 = vmatpush.bf16.msrb.mxu1 %v6891_v14  ;;  %v6949_v14 = vld [vmem:[%s9566_s4 + $0x420] sm:$0xff] }
 0x141   : > { %2750 = vmatpush.bf16.msra.mxu2 %v6867_v29  ;;  %2777 = vmatpush.bf16.msrb.mxu0 %v6882_v18  ;;  %v6889_v29 = vld [vmem:[%s9566_s4 + $0x240] sm:$0xff]  ;;  %v6948_v18 = vld [vmem:[%s9566_s4 + $0x418] sm:$0xff] }
 0x142   : > { %2790 = vmatpush.bf16.msrb.mxu1 %v6890_v22  ;;  %v380_v22 = vld [vmem:[%s7441_s24 + $0x10] sm:$0xff] }
 0x145   : > { %2751 = vmatpush.bf16.msra.mxu2 %v6866_v36  ;;  %2778 = vmatpush.bf16.msrb.mxu0 %v6881_v25  ;;  %v6934_v36 = vld [vmem:[%s9566_s4 + $0x3a8] sm:$0xff]  ;;  %v6944_v25 = vld [vmem:[%s9566_s4 + $0x3f8] sm:$0xff] }
 0x146   : > { %2791 = vmatpush.bf16.msrb.mxu1 %v6889_v29  ;;  %v6962_v29 = vld [vmem:[%s9566_s4 + $0x488] sm:$0xff] }
 0x148   : > { %2779 = vmatmul.bf16.vlgmr.msrb.gmra.mxu0 %v1071_v37  ;;  %v6942_v37 = vld [vmem:[%s9566_s4 + $0x3e8] sm:$0xff] }
 0x149   : > { %2752 = vmatpush.bf16.msra.mxu2 %v6865_v40  ;;  %v1072_v40 = vld [vmem:[#allocation1 + $0x9] sm:$0xff] }
 0x14a   : > { %2792 = vmatmul.bf16.vlgmr.msrb.gmra.mxu1 %v1072_v40 }
 0x14c   : > { %2753 = vmatmul.bf16.vlgmr.msra.gmra.mxu2 %v1067_v6  ;;  %v6951_v6 = vld [vmem:[%s9566_s4 + $0x430] sm:$0xff] }
 0x14d   : > { %2797 = vmatpush.bf16.msrb.mxu2 %v6904_v42  ;;  %v6933_v42 = vld [vmem:[%s9566_s4 + $0x3a0] sm:$0xff] }
 0x151   : > { %2798 = vmatpush.bf16.msrb.mxu2 %v6903_v49  ;;  %v6924_v49 = vld [vmem:[%s9566_s4 + $0x358] sm:$0xff] }
 0x155   : > { %2799 = vmatpush.bf16.msrb.mxu2 %v6902_v54  ;;  %v6923_v54 = vld [vmem:[%s9566_s4 + $0x350] sm:$0xff] }
 0x159   : > { %2800 = vmatpush.bf16.msrb.mxu2 %v6901_v57  ;;  %v6911_v57 = vld [vmem:[%s9566_s4 + $0x2f0] sm:$0xff] }
 0x15d   : > { %2801 = vmatpush.bf16.msrb.mxu2 %v6900_v63  ;;  %v6910_v63 = vld [vmem:[%s9566_s4 + $0x2e8] sm:$0xff] }
 0x161   : > { %2802 = vmatpush.bf16.msrb.mxu2 %v6899_v5  ;;  %v1076_v5 = vld [vmem:[#allocation1 + $0x2d] sm:$0xff] }
 0x165   : > { %2803 = vmatpush.bf16.msrb.mxu2 %v6898_v15  ;;  %v6907_v15 = vld [vmem:[%s9566_s4 + $0x2d0] sm:$0xff] }
 0x169   : > { %2804 = vmatpush.bf16.msrb.mxu2 %v6897_v23  ;;  %v6947_v23 = vld [vmem:[%s9566_s4 + $0x410] sm:$0xff] }
 0x16d   : > { %2849 = vmatpush.bf16.msra.mxu2 %v6936_v24  ;;  %v6905_v24 = vld [vmem:[%s9566_s4 + $0x2c0] sm:$0xff] }
 0x171   : > { %2850 = vmatpush.bf16.msra.mxu2 %v6935_v31  ;;  %v6943_v31 = vld [vmem:[%s9566_s4 + $0x3f0] sm:$0xff] }
 0x175   : > { %2851 = vmatpush.bf16.msra.mxu2 %v6934_v36  ;;  %v6984_v36 = vld [vmem:[%s9566_s4 + $0x538] sm:$0xff] }
 0x179   : > { %2852 = vmatpush.bf16.msra.mxu2 %v6933_v42  ;;  %v6999_v42 = vld [vmem:[%s9566_s4 + $0x5b0] sm:$0xff] }
 0x17d   : > { %2853 = vmatpush.bf16.msra.mxu2 %v6932_v46  ;;  %v6991_v46 = vld [vmem:[%s9566_s4 + $0x570] sm:$0xff] }
 0x1af   : > { %v491_v30 = vpop.f32.mrf.mxu2 }
 0x1b0   : > { %v7666_v33 = vadd.f32 %v491_v30, %v469_v27  ;;  %v6920_v27 = vld [vmem:[%s9566_s4 + $0x338] sm:$0xff] }
 0x1b1   : > { %v6928_v30 = vld [vmem:[%s9566_s4 + $0x378] sm:$0xff]  ;;  %2823 = vmatpush.bf16.msra.mxu0 %v6920_v27  ;;  %v6955_v27 = vld [vmem:[%s9566_s4 + $0x450] sm:$0xff] }
 0x1b2   : > { %v494_v34 = vsub.f32 0.0, %v7666_v33  ;;  %2836 = vmatpush.bf16.msra.mxu1 %v6928_v30  ;;  %v6946_v30 = vld [vmem:[%s9566_s4 + $0x408] sm:$0xff] }
 0x1b4   : > { %v495_v38 = vmul.f32 1.442695, %v494_v34  ;;  %v1073_v34 = vld [vmem:[#allocation1 + $0x12] sm:$0xff] }
 0x1b5   : > { %2824 = vmatpush.bf16.msra.mxu0 %v6919_v32  ;;  %2805 = vmatmul.bf16.vlgmr.msrb.gmra.mxu2 %v1073_v34  ;;  %v6954_v32 = vld [vmem:[%s9566_s4 + $0x448] sm:$0xff]  ;;  %v6945_v34 = vld [vmem:[%s9566_s4 + $0x400] sm:$0xff] }
 0x1b6   : > { %7131 = vpow2.f32 %v495_v38  ;;  %v6918_v38 = vld [vmem:[%s9566_s4 + $0x328] sm:$0xff]  ;;  %2837 = vmatpush.bf16.msra.mxu1 %v6927_v35  ;;  %v7000_v35 = vld [vmem:[%s9566_s4 + $0x5b8] sm:$0xff] }
 0x1b9   : > { %2825 = vmatpush.bf16.msra.mxu0 %v6918_v38 }
 0x1ba   : > { %2838 = vmatpush.bf16.msra.mxu1 %v6926_v41  ;;  %v6992_v41 = vld [vmem:[%s9566_s4 + $0x578] sm:$0xff] }
 0x1bc   : > { %v7132_v50 = vpop.eup %7131 }
 0x1bd   : > { %v497_v51 = vadd.f32 1.0, %v7132_v50  ;;  %2826 = vmatpush.bf16.msra.mxu0 %v6917_v43  ;;  %v6931_v50 = vld [vmem:[%s9566_s4 + $0x390] sm:$0xff] }
 0x1be   : > { %2839 = vmatpush.bf16.msra.mxu1 %v6925_v45  ;;  %2854 = vmatpush.bf16.msra.mxu2 %v6931_v50  ;;  %v6983_v43 = vld [vmem:[%s9566_s4 + $0x530] sm:$0xff]  ;;  %v6990_v50 = vld [vmem:[%s9566_s4 + $0x568] sm:$0xff] }
 0x1bf   : > { %7133 = vrcp.f32 %v497_v51  ;;  %v509_v0 = vand.u32 2147483648, %v497_v51  ;;  %v507_v3 = vand.u32 2147483647, %v497_v51  ;;  %vm503_vm7 = vweird.f32 %v497_v51 }
 0x1c1   : > { %v510_v8 = vor.u32 1.1754944e-38, %v509_v0  ;;  %vm508_vm9 = vcmp.eq.f32.partialorder %v507_v3, 8.507059e+37  ;;  %2827 = vmatpush.bf16.msra.mxu0 %v6916_v47  ;;  %v1077_v0 = vld [vmem:[#allocation1 + $0x36] sm:$0xff]  ;;  %v6998_v47 = vld [vmem:[%s9566_s4 + $0x5a8] sm:$0xff] }
 0x1c2   : > { %2840 = vmatpush.bf16.msra.mxu1 %v6924_v49  ;;  %2855 = vmatpush.bf16.msra.mxu2 %v6930_v55  ;;  %v6960_v3 = vld [vmem:[%s9566_s4 + $0x478] sm:$0xff] }
 0x1c3   : > { %v6940_v49 = vld [vmem:[%s9566_s4 + $0x3d8] sm:$0xff] }
 0x1c4   : > { %v6996_v55 = vld [vmem:[%s9566_s4 + $0x598] sm:$0xff] }
 0x1c5   : > { %v7134_v58 = vpop.eup %7133 }
 0x1c6   : > { %v499_v60 = vmul.f32 %v7134_v58, %v497_v51  ;;  %vm504_vm6 = vweird.f32 %v7134_v58  ;;  %v6915_v51 = vld [vmem:[%s9566_s4 + $0x310] sm:$0xff]  ;;  %2841 = vmatpush.bf16.msra.mxu1 %v6923_v54  ;;  %2856 = vmatpush.bf16.msra.mxu2 %v6929_v59  ;;  %v6989_v54 = vld [vmem:[%s9566_s4 + $0x560] sm:$0xff] }
 0x1c7   : > { %vm505_vm8 = vmor %vm503_vm7, %vm504_vm6  ;;  %2828 = vmatpush.bf16.msra.mxu0 %v6915_v51  ;;  %v6997_v51 = vld [vmem:[%s9566_s4 + $0x5a0] sm:$0xff]  ;;  %v6995_v59 = vld [vmem:[%s9566_s4 + $0x590] sm:$0xff] }
 0x1c8   : > { %v500_v62 = vsub.f32 1.0, %v499_v60  ;;  %v6968_v60 = vld [vmem:[%s9566_s4 + $0x4b8] sm:$0xff] }
 0x1c9   : > { %2857 = vmatmul.bf16.vlgmr.msra.gmra.mxu2 %v1077_v0  ;;  %v6994_v0 = vld [vmem:[%s9566_s4 + $0x588] sm:$0xff] }
 0x1ca   : > { %v501_v2 = vmul.f32 %v7134_v58, %v500_v62  ;;  %v6952_v62 = vld [vmem:[%s9566_s4 + $0x438] sm:$0xff]  ;;  %2901 = vmatpush.bf16.msrb.mxu2 %v6968_v60  ;;  %v6979_v60 = vld [vmem:[%s9566_s4 + $0x510] sm:$0xff] }
 0x1cb   : > { %2829 = vmatpush.bf16.msra.mxu0 %v6914_v56  ;;  %v6980_v56 = vld [vmem:[%s9566_s4 + $0x518] sm:$0xff] }
 0x1cc   : > { %v502_v7 = vadd.f32 %v7134_v58, %v501_v2  ;;  %v1075_v2 = vld [vmem:[#allocation1 + $0x24] sm:$0xff] }
 0x1ce   : > { %v506_v10 = vsel %vm505_vm8, %v7134_v58, %v502_v7  ;;  %v6922_v58 = vld [vmem:[%s9566_s4 + $0x348] sm:$0xff]  ;;  %v6909_v7 = vld [vmem:[%s9566_s4 + $0x2e0] sm:$0xff]  ;;  %2902 = vmatpush.bf16.msrb.mxu2 %v6967_v4 }
 0x1cf   : > { %v511_v12 = vsel %vm508_vm9, %v510_v8, %v506_v10  ;;  %2842 = vmatpush.bf16.msra.mxu1 %v6922_v58  ;;  %2830 = vmatpush.bf16.msra.mxu0 %v6913_v61  ;;  %v6959_v8 = vld [vmem:[%s9566_s4 + $0x470] sm:$0xff]  ;;  %v6950_v10 = vld [vmem:[%s9566_s4 + $0x428] sm:$0xff]  ;;  %v6988_v58 = vld [vmem:[%s9566_s4 + $0x558] sm:$0xff] }
 0x1d0   : > { %v513_v16 = vmul.f32 %v511_v12, %v7666_v33  ;;  %v6877_v33 = vld [vmem:[%s9566_s4 + $0x1e0] sm:$0xff]  ;;  %v6958_v12 = vld [vmem:[%s9566_s4 + $0x468] sm:$0xff] }
 0x1d1   : > { %v6937_v61 = vld [vmem:[%s9566_s4 + $0x3c0] sm:$0xff] }
 0x1d2   : > { %5584 = vmatmul.msk.f32.vlgmr.msra.gmra.mxu3 %vm470_vm5, %v513_v16  ;;  %2831 = vmatmul.bf16.vlgmr.msra.gmra.mxu0 %v1075_v2  ;;  %v6957_v16 = vld [vmem:[%s9566_s4 + $0x460] sm:$0xff]  ;;  %v6975_v2 = vld [vmem:[%s9566_s4 + $0x4f0] sm:$0xff] }
 0x1d3   : > { %2758 = vmatpush.bf16.msra.mxu3 %v6880_v11  ;;  %2875 = vmatpush.bf16.msrb.mxu0 %v6952_v62  ;;  %v6908_v11 = vld [vmem:[%s9566_s4 + $0x2d8] sm:$0xff]  ;;  %v6993_v4 = vld [vmem:[%s9566_s4 + $0x580] sm:$0xff] }
 0x1d4   : > { %2843 = vmatpush.bf16.msra.mxu1 %v6921_v1  ;;  %2903 = vmatpush.bf16.msrb.mxu2 %v6966_v9  ;;  %v6976_v62 = vld [vmem:[%s9566_s4 + $0x4f8] sm:$0xff]  ;;  %v6978_v1 = vld [vmem:[%s9566_s4 + $0x508] sm:$0xff] }
 0x1d7   : > { %2759 = vmatpush.bf16.msra.mxu3 %v6879_v20  ;;  %2844 = vmatmul.bf16.vlgmr.msra.gmra.mxu1 %v1076_v5  ;;  %v6956_v20 = vld [vmem:[%s9566_s4 + $0x458] sm:$0xff] }
 0x1d8   : > { %2888 = vmatpush.bf16.msrb.mxu1 %v6960_v3  ;;  %2876 = vmatpush.bf16.msrb.mxu0 %v6951_v6  ;;  %v6986_v3 = vld [vmem:[%s9566_s4 + $0x548] sm:$0xff]  ;;  %v7032_v5 = vld [vmem:[%s9566_s4 + $0x6b8] sm:$0xff]  ;;  %v6977_v6 = vld [vmem:[%s9566_s4 + $0x500] sm:$0xff] }
 0x1d9   : > { %2904 = vmatpush.bf16.msrb.mxu2 %v6965_v13  ;;  %v7031_v13 = vld [vmem:[%s9566_s4 + $0x6b0] sm:$0xff] }
 0x1da   : > { %2714 = vmatmul.bf16.vlgmr.msrb.gmra.mxu3 %v1064_v21  ;;  %v6963_v21 = vld [vmem:[%s9566_s4 + $0x490] sm:$0xff] }
 0x1db   : > { %2760 = vmatpush.bf16.msra.mxu3 %v6878_v28  ;;  %v7946_v28 = vld [vmem:[#allocation1 + $0x3f] sm:$0xff] }
 0x1dc   : > { %2889 = vmatpush.bf16.msrb.mxu1 %v6959_v8  ;;  %2877 = vmatpush.bf16.msrb.mxu0 %v6950_v10  ;;  %v6974_v8 = vld [vmem:[%s9566_s4 + $0x4e8] sm:$0xff]  ;;  %v6985_v10 = vld [vmem:[%s9566_s4 + $0x540] sm:$0xff] }
 0x1dd   : > { %2905 = vmatpush.bf16.msrb.mxu2 %v6964_v17 }
 0x1df   : > { %2761 = vmatpush.bf16.msra.mxu3 %v6877_v33  ;;  %v6961_v33 = vld [vmem:[%s9566_s4 + $0x480] sm:$0xff] }
 0x1e0   : > { %2890 = vmatpush.bf16.msrb.mxu1 %v6958_v12  ;;  %2878 = vmatpush.bf16.msrb.mxu0 %v6949_v14  ;;  %v7024_v12 = vld [vmem:[%s9566_s4 + $0x678] sm:$0xff]  ;;  %v7015_v14 = vld [vmem:[%s9566_s4 + $0x630] sm:$0xff] }
 0x1e1   : > { %2906 = vmatpush.bf16.msrb.mxu2 %v6963_v21  ;;  %v6972_v21 = vld [vmem:[%s9566_s4 + $0x4d8] sm:$0xff] }
 0x1e3   : > { %2762 = vmatpush.bf16.msra.mxu3 %v6876_v39  ;;  %v6953_v39 = vld [vmem:[%s9566_s4 + $0x440] sm:$0xff] }
 0x1e4   : > { %2891 = vmatpush.bf16.msrb.mxu1 %v6957_v16  ;;  %2879 = vmatpush.bf16.msrb.mxu0 %v6948_v18  ;;  %v8087_v16 = vpop.f32.mrf.mxu0  ;;  %v7023_v18 = vld [vmem:[%s9566_s4 + $0x670] sm:$0xff] }
 0x1e5   : > { %2907 = vmatpush.bf16.msrb.mxu2 %v6962_v29  ;;  %v8121_v29 = vpop.f32.mrf.mxu1 }
 0x1e7   : > { %2763 = vmatpush.bf16.msra.mxu3 %v6875_v44  ;;  %v6941_v44 = vld [vmem:[%s9566_s4 + $0x3e0] sm:$0xff] }
 0x1e8   : > { %2892 = vmatpush.bf16.msrb.mxu1 %v6956_v20  ;;  %2880 = vmatpush.bf16.msrb.mxu0 %v6947_v23  ;;  %v7014_v20 = vld [vmem:[%s9566_s4 + $0x628] sm:$0xff]  ;;  %v7029_v23 = vld [vmem:[%s9566_s4 + $0x6a0] sm:$0xff] }
 0x1e9   : > { %2908 = vmatpush.bf16.msrb.mxu2 %v6961_v33  ;;  %v7020_v33 = vld [vmem:[%s9566_s4 + $0x658] sm:$0xff] }
 0x1eb   : > { %2764 = vmatpush.bf16.msra.mxu3 %v6874_v48  ;;  %v6982_v48 = vld [vmem:[%s9566_s4 + $0x528] sm:$0xff] }
 0x1ec   : > { %2893 = vmatpush.bf16.msrb.mxu1 %v6955_v27  ;;  %2881 = vmatpush.bf16.msrb.mxu0 %v6946_v30  ;;  %v7021_v27 = vld [vmem:[%s9566_s4 + $0x660] sm:$0xff]  ;;  %v7012_v30 = vld [vmem:[%s9566_s4 + $0x618] sm:$0xff] }
 0x1ed   : > { %2953 = vmatpush.bf16.msra.mxu2 %v7000_v35  ;;  %v381_v35 = vld [vmem:[%s7441_s24 + $0x18] sm:$0xff]  ;;  %s5578_s24 = sshll.u32 %s7423_s25, 2  ;;  %s7316_s25 = smov 112  }
 0x1ee   : > { %s363_s22 = scalar_lea.vmem %s9562_s0, %s5578_s24  ;;  %s367_s29 = scalar_lea.vmem %s9563_s1, %s5578_s24 }
 0x1ef   : > { %2765 = vmatpush.bf16.msra.mxu3 %v6873_v52  ;;  %v6981_v52 = vld [vmem:[%s9566_s4 + $0x520] sm:$0xff] }
 0x1f0   : > { %2894 = vmatpush.bf16.msrb.mxu1 %v6954_v32  ;;  %2882 = vmatpush.bf16.msrb.mxu0 %v6945_v34  ;;  %v8129_v32 = vpop.f32.mrf.mxu2  ;;  %v7027_v34 = vld [vmem:[%s9566_s4 + $0x690] sm:$0xff] }
 0x1f1   : > { %2954 = vmatpush.bf16.msra.mxu2 %v6999_v42  ;;  %v7019_v42 = vld [vmem:[%s9566_s4 + $0x650] sm:$0xff] }
 0x1f2   : > { %2766 = vmatmul.bf16.vlgmr.msra.gmra.mxu3 %v7771_v26  ;;  %v1074_v26 = vld [vmem:[#allocation1 + $0x1b] sm:$0xff] }
 0x1f3   : > { %2810 = vmatpush.bf16.msrb.mxu3 %v6912_v53  ;;  %1080 = vst [vmem:[#allocation1] ss:$9 sm:$0xff] %v380_v22  ;;  %v6939_v53 = vld [vmem:[%s9566_s4 + $0x3d0] sm:$0xff]  ;;  %v7022_v22 = vld [vmem:[%s9566_s4 + $0x668] sm:$0xff] }
 0x1f4   : > { %2927 = vmatpush.bf16.msra.mxu0 %v6984_v36  ;;  %2895 = vmatpush.bf16.msrb.mxu1 %v6953_v39  ;;  %v7011_v36 = vld [vmem:[%s9566_s4 + $0x610] sm:$0xff] }
 0x1f5   : > { %2955 = vmatpush.bf16.msra.mxu2 %v6998_v47 }
 0x1f7   : > { %2811 = vmatpush.bf16.msrb.mxu3 %v6911_v57  ;;  %v6938_v57 = vld [vmem:[%s9566_s4 + $0x3c8] sm:$0xff] }
 0x1f8   : > { %2940 = vmatpush.bf16.msra.mxu1 %v6992_v41  ;;  %2928 = vmatpush.bf16.msra.mxu0 %v6983_v43  ;;  %v7026_v43 = vld [vmem:[%s9566_s4 + $0x688] sm:$0xff]  ;;  %v2704_v47 = vpop.f32.mrf.mxu2 }
 0x1f9   : > { %2956 = vmatpush.bf16.msra.mxu2 %v6997_v51  ;;  %v7009_v51 = vld [vmem:[%s9566_s4 + $0x600] sm:$0xff] }
 0x1fa   : > { %v1083_v38 = vld [vmem:[#allocation1 + $0x12] sm:$0xff]  ;;  %v1081_v40 = vld [vmem:[#allocation1] sm:$0xff]  ;;  %v1082_v45 = vld [vmem:[#allocation1 + $0x9] sm:$0xff] }
 0x1fb   : > { %2812 = vmatpush.bf16.msrb.mxu3 %v6910_v63  ;;  %2909 = vmatmul.bf16.vlgmr.msrb.gmra.mxu2 %v1083_v38  ;;  %v6987_v63 = vld [vmem:[%s9566_s4 + $0x550] sm:$0xff]  ;;  %v7008_v38 = vld [vmem:[%s9566_s4 + $0x5f8] sm:$0xff]  ;;  %v7041_v47 = vld [vmem:[%s9566_s4 + $0x700] sm:$0xff] }
 0x1fc   : > { %2883 = vmatmul.bf16.vlgmr.msrb.gmra.mxu0 %v1081_v40  ;;  %2896 = vmatmul.bf16.vlgmr.msrb.gmra.mxu1 %v1082_v45  ;;  %v1087_v9 = vld [vmem:[#allocation1 + $0x36] sm:$0xff]  ;;  %v1086_v17 = vld [vmem:[#allocation1 + $0x2d] sm:$0xff]  ;;  %v8147_v41 = vld [vmem:[#allocation1 + $0x3f] sm:$0xff] }
 0x1fd   : > { %2941 = vmatpush.bf16.msra.mxu1 %v6991_v46  ;;  %2929 = vmatpush.bf16.msra.mxu0 %v6982_v48  ;;  %v1084_v39 = vld [vmem:[#allocation1 + $0x1b] sm:$0xff]  ;;  %v7010_v45 = vld [vmem:[%s9566_s4 + $0x608] sm:$0xff]  ;;  %v7007_v46 = vld [vmem:[%s9566_s4 + $0x5f0] sm:$0xff] }
 0x1fe   : > { %2957 = vmatpush.bf16.msra.mxu2 %v6996_v55  ;;  %v7018_v48 = vld [vmem:[%s9566_s4 + $0x648] sm:$0xff]  ;;  %v7017_v55 = vld [vmem:[%s9566_s4 + $0x640] sm:$0xff] }
 0x1ff   : > { %2813 = vmatpush.bf16.msrb.mxu3 %v6909_v7  ;;  %v7016_v7 = vld [vmem:[%s9566_s4 + $0x638] sm:$0xff] }
 0x201   : > { %2942 = vmatpush.bf16.msra.mxu1 %v6990_v50  ;;  %2930 = vmatpush.bf16.msra.mxu0 %v6981_v52  ;;  %v7064_v50 = vld [vmem:[%s9566_s4 + $0x7b8] sm:$0xff] }
 0x202   : > { %2958 = vmatpush.bf16.msra.mxu2 %v6995_v59  ;;  %v7048_v52 = vld [vmem:[%s9566_s4 + $0x738] sm:$0xff]  ;;  %v7063_v59 = vld [vmem:[%s9566_s4 + $0x7b0] sm:$0xff] }
 0x203   : > { %2814 = vmatpush.bf16.msrb.mxu3 %v6908_v11  ;;  %v1085_v11 = vld [vmem:[#allocation1 + $0x24] sm:$0xff] }
 0x204   : > { %1090 = vst [vmem:[#allocation1] ss:$9 sm:$0xff] %v381_v35  ;;  %v7001_v35 = vld [vmem:[%s9566_s4 + $0x5c0] sm:$0xff] }
 0x205   : > { %2943 = vmatpush.bf16.msra.mxu1 %v6989_v54  ;;  %2931 = vmatpush.bf16.msra.mxu0 %v6980_v56 }
 0x206   : > { %2959 = vmatpush.bf16.msra.mxu2 %v6994_v0  ;;  %v8198_v0 = vpop.f32.mrf.mxu2 }
 0x207   : > { %2815 = vmatpush.bf16.msrb.mxu3 %v6907_v15  ;;  %v6973_v15 = vld [vmem:[%s9566_s4 + $0x4e0] sm:$0xff] }
 0x209   : > { %2944 = vmatpush.bf16.msra.mxu1 %v6988_v58  ;;  %2932 = vmatpush.bf16.msra.mxu0 %v6979_v60  ;;  %v7056_v58 = vld [vmem:[%s9566_s4 + $0x778] sm:$0xff] }
 0x20a   : > { %2960 = vmatpush.bf16.msra.mxu2 %v6993_v4  ;;  %v522_v4 = vld [vmem:[%s9567_s5 + $0xd8] sm:$0x1] }
 0x20b   : > { %2816 = vmatpush.bf16.msrb.mxu3 %v6906_v19  ;;  %v7030_v19 = vld [vmem:[%s9566_s4 + $0x6a8] sm:$0xff]  ;;  %v1093_v54 = vld [vmem:[#allocation1 + $0x12] sm:$0xff] }
 0x20d   : > { %2945 = vmatpush.bf16.msra.mxu1 %v6987_v63  ;;  %2933 = vmatpush.bf16.msra.mxu0 %v6978_v1  ;;  %v1092_v63 = vld [vmem:[#allocation1 + $0x9] sm:$0xff] }
 0x20e   : > { %3005 = vmatpush.bf16.msrb.mxu2 %v7032_v5  ;;  %v7055_v1 = vld [vmem:[%s9566_s4 + $0x770] sm:$0xff]  ;;  %v7004_v5 = vld [vmem:[%s9566_s4 + $0x5d8] sm:$0xff] }
 0x20f   : > { %2817 = vmatpush.bf16.msrb.mxu3 %v6905_v24  ;;  %2961 = vmatmul.bf16.vlgmr.msra.gmra.mxu2 %v1087_v9  ;;  %v7013_v24 = vld [vmem:[%s9566_s4 + $0x620] sm:$0xff] }
 0x210   : > { %v7061_v9 = vld [vmem:[%s9566_s4 + $0x7a0] sm:$0xff] }
 0x211   : > { %2946 = vmatpush.bf16.msra.mxu1 %v6986_v3  ;;  %2934 = vmatpush.bf16.msra.mxu0 %v6977_v6  ;;  %v7046_v3 = vld [vmem:[%s9566_s4 + $0x728] sm:$0xff] }
 0x212   : > { %2818 = vmatmul.bf16.vlgmr.msrb.gmra.mxu3 %v1074_v26  ;;  %3006 = vmatpush.bf16.msrb.mxu2 %v7031_v13  ;;  %v8113_v26 = vpop.f32.mrf.mxu0  ;;  %v7003_v13 = vld [vmem:[%s9566_s4 + $0x5d0] sm:$0xff] }
 0x213   : > { %2862 = vmatpush.bf16.msra.mxu3 %v6944_v25  ;;  %v6971_v25 = vld [vmem:[%s9566_s4 + $0x4d0] sm:$0xff] }
 0x214   : > { %2935 = vmatmul.bf16.vlgmr.msra.gmra.mxu0 %v1085_v11 }
 0x215   : > { %2979 = vmatpush.bf16.msrb.mxu0 %v7016_v7  ;;  %2947 = vmatpush.bf16.msra.mxu1 %v6985_v10 }
 0x216   : > { %3007 = vmatpush.bf16.msrb.mxu2 %v7030_v19  ;;  %v7060_v19 = vld [vmem:[%s9566_s4 + $0x798] sm:$0xff] }
 0x217   : > { %2863 = vmatpush.bf16.msra.mxu3 %v6943_v31  ;;  %v6970_v31 = vld [vmem:[%s9566_s4 + $0x4c8] sm:$0xff] }
 0x218   : > { %2948 = vmatmul.bf16.vlgmr.msra.gmra.mxu1 %v1086_v17  ;;  %v2756_v17 = vpop.f32.mrf.mxu2 }
 0x219   : > { %2992 = vmatpush.bf16.msrb.mxu1 %v7024_v12  ;;  %2980 = vmatpush.bf16.msrb.mxu0 %v7015_v14  ;;  %v7045_v12 = vld [vmem:[%s9566_s4 + $0x720] sm:$0xff]  ;;  %v7066_v17 = vld [vmem:[%s9566_s4 + $0x7c8] sm:$0xff] }
 0x21a   : > { %3008 = vmatpush.bf16.msrb.mxu2 %v7029_v23  ;;  %v2678_v40 = vpop.f32.mrf.mxu0  ;;  %v375_v14 = vld [vmem:[%s363_s22] sm:$0xf]  ;;  %v7002_v23 = vld [vmem:[%s9566_s4 + $0x5c8] sm:$0xff] }
 0x21b   : > { %2864 = vmatpush.bf16.msra.mxu3 %v6942_v37  ;;  %v6969_v37 = vld [vmem:[%s9566_s4 + $0x4c0] sm:$0xff]  ;;  %v7042_v40 = vld [vmem:[%s9566_s4 + $0x708] sm:$0xff] }
 0x21d   : > { %2993 = vmatpush.bf16.msrb.mxu1 %v7023_v18  ;;  %2981 = vmatpush.bf16.msrb.mxu0 %v7014_v20  ;;  %v7053_v18 = vld [vmem:[%s9566_s4 + $0x760] sm:$0xff] }
 0x21f   : > { %2865 = vmatpush.bf16.msra.mxu3 %v6941_v44  ;;  %v2691_v44 = vpop.f32.mrf.mxu1 }
 0x220   : > { %v7050_v44 = vld [vmem:[%s9566_s4 + $0x748] sm:$0xff] }
 0x221   : > { %2994 = vmatpush.bf16.msrb.mxu1 %v7022_v22  ;;  %2982 = vmatpush.bf16.msrb.mxu0 %v7013_v24 }
 0x222   : > { %v8182_v56 = vpop.f32.mrf.mxu0 }
 0x223   : > { %2866 = vmatpush.bf16.msra.mxu3 %v6940_v49  ;;  %v7025_v49 = vld [vmem:[%s9566_s4 + $0x680] sm:$0xff] }
 0x225   : > { %2995 = vmatpush.bf16.msrb.mxu1 %v7021_v27  ;;  %2983 = vmatpush.bf16.msrb.mxu0 %v7012_v30  ;;  %v7052_v30 = vld [vmem:[%s9566_s4 + $0x758] sm:$0xff] }
 0x227   : > { %2867 = vmatpush.bf16.msra.mxu3 %v6939_v53  ;;  %v7006_v53 = vld [vmem:[%s9566_s4 + $0x5e8] sm:$0xff]  ;;  %v8190_v60 = vpop.f32.mrf.mxu1 }
 0x229   : > { %2996 = vmatpush.bf16.msrb.mxu1 %v7020_v33  ;;  %2984 = vmatpush.bf16.msrb.mxu0 %v7011_v36  ;;  %v7040_v36 = vld [vmem:[%s9566_s4 + $0x6f8] sm:$0xff] }
 0x22a   : > { %v2730_v7 = vpop.f32.mrf.mxu0 }
 0x22b   : > { %2868 = vmatpush.bf16.msra.mxu3 %v6938_v57  ;;  %v1091_v57 = vld [vmem:[#allocation1] sm:$0xff]  ;;  %v7071_v7 = vld [vmem:[%s9566_s4 + $0x7f0] sm:$0xff] }
 0x22d   : > { %2997 = vmatpush.bf16.msrb.mxu1 %v7019_v42  ;;  %2985 = vmatpush.bf16.msrb.mxu0 %v7010_v45  ;;  %v7039_v42 = vld [vmem:[%s9566_s4 + $0x6f0] sm:$0xff]  ;;  %v7057_v45 = vld [vmem:[%s9566_s4 + $0x780] sm:$0xff] }
 0x22f   : > { %2869 = vmatpush.bf16.msra.mxu3 %v6937_v61  ;;  %v7047_v61 = vld [vmem:[%s9566_s4 + $0x730] sm:$0xff]  ;;  %v2743_v11 = vpop.f32.mrf.mxu1 }
 0x230   : > { %v7068_v11 = vld [vmem:[%s9566_s4 + $0x7d8] sm:$0xff] }
 0x231   : > { %2998 = vmatpush.bf16.msrb.mxu1 %v7018_v48  ;;  %2986 = vmatpush.bf16.msrb.mxu0 %v7009_v51  ;;  %v1097_v51 = vld [vmem:[#allocation1 + $0x36] sm:$0xff] }
 0x232   : > { %2870 = vmatmul.bf16.vlgmr.msra.gmra.mxu3 %v7946_v28  ;;  %v7028_v28 = vld [vmem:[%s9566_s4 + $0x698] sm:$0xff] }
 0x233   : > { %2914 = vmatpush.bf16.msrb.mxu3 %v6976_v62  ;;  %3009 = vmatpush.bf16.msrb.mxu2 %v7028_v28  ;;  %v7005_v62 = vld [vmem:[%s9566_s4 + $0x5e0] sm:$0xff]  ;;  %v8255_v28 = vpop.f32.mrf.mxu0 }
 0x234   : > { %2987 = vmatmul.bf16.vlgmr.msrb.gmra.mxu0 %v1091_v57  ;;  %v7035_v57 = vld [vmem:[%s9566_s4 + $0x6d0] sm:$0xff] }
 0x235   : > { %3031 = vmatpush.bf16.msra.mxu0 %v7048_v52  ;;  %2999 = vmatpush.bf16.msrb.mxu1 %v7017_v55  ;;  %v7049_v52 = vld [vmem:[%s9566_s4 + $0x740] sm:$0xff]  ;;  %v7036_v55 = vld [vmem:[%s9566_s4 + $0x6d8] sm:$0xff] }
 0x237   : > { %2915 = vmatpush.bf16.msrb.mxu3 %v6975_v2  ;;  %3010 = vmatpush.bf16.msrb.mxu2 %v7027_v34  ;;  %v7062_v2 = vld [vmem:[%s9566_s4 + $0x7a8] sm:$0xff]  ;;  %v8263_v33 = vpop.f32.mrf.mxu1  ;;  %v7043_v34 = vld [vmem:[%s9566_s4 + $0x710] sm:$0xff] }
 0x238   : > { %3000 = vmatmul.bf16.vlgmr.msrb.gmra.mxu1 %v1092_v63 }
 0x239   : > { %3044 = vmatpush.bf16.msra.mxu1 %v7056_v58  ;;  %3032 = vmatpush.bf16.msra.mxu0 %v7047_v61 }
 0x23b   : > { %2916 = vmatpush.bf16.msrb.mxu3 %v6974_v8  ;;  %3011 = vmatpush.bf16.msrb.mxu2 %v7026_v43  ;;  %v7054_v8 = vld [vmem:[%s9566_s4 + $0x768] sm:$0xff] }
 0x23d   : > { %3045 = vmatpush.bf16.msra.mxu1 %v7055_v1  ;;  %3033 = vmatpush.bf16.msra.mxu0 %v7046_v3  ;;  %v7033_v1 = vld [vmem:[%s9566_s4 + $0x6c0] sm:$0xff] }
 0x23f   : > { %2917 = vmatpush.bf16.msrb.mxu3 %v6973_v15  ;;  %3012 = vmatpush.bf16.msrb.mxu2 %v7025_v49  ;;  %v2795_v48 = vpop.f32.mrf.mxu1  ;;  %v7038_v49 = vld [vmem:[%s9566_s4 + $0x6e8] sm:$0xff] }
 0x241   : > { %3046 = vmatpush.bf16.msra.mxu1 %v7054_v8  ;;  %3034 = vmatpush.bf16.msra.mxu0 %v7045_v12  ;;  %v7067_v12 = vld [vmem:[%s9566_s4 + $0x7d0] sm:$0xff] }
 0x242   : > { %3013 = vmatmul.bf16.vlgmr.msrb.gmra.mxu2 %v1093_v54  ;;  %v1096_v54 = vld [vmem:[#allocation1 + $0x2d] sm:$0xff] }
 0x243   : > { %2918 = vmatpush.bf16.msrb.mxu3 %v6972_v21  ;;  %3057 = vmatpush.bf16.msra.mxu2 %v7064_v50  ;;  %v7044_v21 = vld [vmem:[%s9566_s4 + $0x718] sm:$0xff] }
 0x245   : > { %3047 = vmatpush.bf16.msra.mxu1 %v7053_v18  ;;  %3035 = vmatpush.bf16.msra.mxu0 %v7044_v21 }
 0x247   : > { %2919 = vmatpush.bf16.msrb.mxu3 %v6971_v25  ;;  %3058 = vmatpush.bf16.msra.mxu2 %v7063_v59 }
 0x249   : > { %3048 = vmatpush.bf16.msra.mxu1 %v7052_v30  ;;  %3036 = vmatpush.bf16.msra.mxu0 %v7043_v34  ;;  %v1098_v30 = vld [vmem:[#allocation1 + $0x3f] sm:$0xff] }
 0x24b   : > { %2920 = vmatpush.bf16.msrb.mxu3 %v6970_v31  ;;  %3059 = vmatpush.bf16.msra.mxu2 %v7062_v2  ;;  %v7059_v31 = vld [vmem:[%s9566_s4 + $0x790] sm:$0xff]  ;;  %v7072_v2 = vld [vmem:[%s9566_s4 + $0x7f8] sm:$0xff] }
 0x24d   : > { %3037 = vmatpush.bf16.msra.mxu0 %v7042_v40 }
 0x24f   : > { %2921 = vmatpush.bf16.msrb.mxu3 %v6969_v37  ;;  %3060 = vmatpush.bf16.msra.mxu2 %v7061_v9  ;;  %v8274_v37 = vpop.f32.mrf.mxu2  ;;  %v7070_v9 = vld [vmem:[%s9566_s4 + $0x7e8] sm:$0xff] }
 0x251   : > { %3038 = vmatpush.bf16.msra.mxu0 %v7041_v47 }
 0x252   : > { %2922 = vmatmul.bf16.vlgmr.msrb.gmra.mxu3 %v1084_v39  ;;  %v7058_v39 = vld [vmem:[%s9566_s4 + $0x788] sm:$0xff] }
 0x253   : > { %2966 = vmatpush.bf16.msra.mxu3 %v7008_v38  ;;  %3061 = vmatpush.bf16.msra.mxu2 %v7060_v19  ;;  %v7051_v38 = vld [vmem:[%s9566_s4 + $0x750] sm:$0xff] }
 0x254   : > { %3049 = vmatpush.bf16.msra.mxu1 %v7051_v38  ;;  %v2845_v61 = vpop.f32.mrf.mxu1 }
 0x255   : > { %v543_v6 = vpop.f32.mrf.mxu3 }
 0x256   : > { %v544_v10 = vadd.f32 %v543_v6, %v522_v4  ;;  %v1094_v6 = vld [vmem:[#allocation1 + $0x1b] sm:$0xff] }
 0x257   : > { %2967 = vmatpush.bf16.msra.mxu3 %v7007_v46  ;;  %3062 = vmatpush.bf16.msra.mxu2 %v7059_v31  ;;  %v2782_v46 = vpop.f32.mrf.mxu0  ;;  %v2808_v50 = vpop.f32.mrf.mxu2 }
 0x258   : > { %v3188_v15 = vrot.slane %v544_v10, 4  ;;  %3050 = vmatpush.bf16.msra.mxu1 %v7050_v44  ;;  %v7069_v10 = vld [vmem:[%s9566_s4 + $0x7e0] sm:$0xff] }
 0x25a   : > { %v8240_v20 = vsel %vm3190_vm10, %v375_v14, %v3188_v15  ;;  %v1058_v14 = vld [vmem:[%s9567_s5 + $0xe0] sm:$0x1] }
 0x25b   : > { %2968 = vmatpush.bf16.msra.mxu3 %v7006_v53  ;;  %v3204_v22 = vsel %vm9578_vm11, %v8240_v20, 0.0  ;;  %v3215_v24 = vmul.f32 %v8240_v20, %v8240_v20  ;;  %3063 = vmatpush.bf16.msra.mxu2 %v7058_v39  ;;  %v7037_v53 = vld [vmem:[%s9566_s4 + $0x6e0] sm:$0xff]  ;;  %v2677_v18 = vadd.f32 %v8113_v26, %v1058_v14 }
 0x25c   : > { %3205 = vadd.xlane.f32.xlu0 %v3204_v22  ;;  %3051 = vmatpush.bf16.msra.mxu1 %v7049_v52  ;;  %v7065_v22 = vld [vmem:[%s9566_s4 + $0x7c0] sm:$0xff] }
 0x25d   : > { %v3216_v25 = vsel %vm9578_vm11, %v3215_v24, 0.0  ;;  %v8253_v27 = vpop.f32.mrf.mxu3 }
 0x25e   : > { %3217 = vadd.xlane.f32.xlu1 %v3216_v25 }
 0x25f   : > { %2969 = vmatpush.bf16.msra.mxu3 %v7005_v62  ;;  %3064 = vmatpush.bf16.msra.mxu2 %v7057_v45  ;;  %v2832_v59 = vpop.f32.mrf.mxu0  ;;  %v7034_v62 = vld [vmem:[%s9566_s4 + $0x6c8] sm:$0xff]  ;;  %v2858_v63 = vpop.f32.mrf.mxu2 }
 0x260   : > { %3052 = vmatmul.bf16.vlgmr.msra.gmra.mxu1 %v1096_v54 }
 0x262   : > { %3065 = vmatmul.bf16.vlgmr.msra.gmra.mxu2 %v1097_v51 }
 0x263   : > { %2970 = vmatpush.bf16.msra.mxu3 %v7004_v5  ;;  %v2847_v5 = vpop.f32.mrf.mxu1 }
 0x265   : > { %v2717_v43 = vpop.f32.mrf.mxu3 }
 0x267   : > { %2971 = vmatpush.bf16.msra.mxu3 %v7003_v13  ;;  %v2834_v4 = vpop.f32.mrf.mxu0  ;;  %v2860_v8 = vpop.f32.mrf.mxu2 }
 0x26b   : > { %2972 = vmatpush.bf16.msra.mxu3 %v7002_v23  ;;  %v2690_v23 = vadd.f32 %v8121_v29, %v2677_v18 }
 0x26d   : > { %v2703_v31 = vadd.f32 %v8129_v32, %v2690_v23 }
 0x26f   : > { %2973 = vmatpush.bf16.msra.mxu3 %v7001_v35  ;;  %v2716_v26 = vadd.f32 %v8253_v27, %v2703_v31  ;;  %v3110_v31 = vld [vmem:[%s9567_s5 + $0x120] sm:$0xff] }
 0x270   : > { %3123 = vmatpush.msrb.mxu0 %v3110_v31  ;;  %v3159_v31 = vld [vmem:[%s9567_s5 + $0x150] sm:$0xff] }
 0x272   : > { %2974 = vmatmul.bf16.vlgmr.msra.gmra.mxu3 %v8147_v41  ;;  %v1095_v41 = vld [vmem:[#allocation1 + $0x24] sm:$0xff] }
 0x273   : > { %3018 = vmatpush.bf16.msrb.mxu3 %v7040_v36  ;;  %3039 = vmatmul.bf16.vlgmr.msra.gmra.mxu0 %v1095_v41  ;;  %v2729_v36 = vadd.f32 %v8182_v56, %v2716_v26 }
 0x275   : > { %v2767_v58 = vpop.f32.mrf.mxu3  ;;  %v2742_v38 = vadd.f32 %v8190_v60, %v2729_v36 }
 0x277   : > { %3019 = vmatpush.bf16.msrb.mxu3 %v7039_v42  ;;  %v2755_v39 = vadd.f32 %v8198_v0, %v2742_v38  ;;  %v3108_v38 = vld [vmem:[%s9567_s5 + $0x110] sm:$0xff] }
 0x279   : > { %v2884_v15 = vpop.f32.mrf.mxu0  ;;  %v2897_v19 = vpop.f32.mrf.mxu1  ;;  %v2768_v29 = vadd.f32 %v2767_v58, %v2755_v39 }
 0x27b   : > { %3020 = vmatpush.bf16.msrb.mxu3 %v7038_v49  ;;  %v2781_v45 = vadd.f32 %v8255_v28, %v2768_v29 }
 0x27d   : > { %v2769_v3 = vpop.f32.mrf.mxu3  ;;  %v2794_v47 = vadd.f32 %v8263_v33, %v2781_v45  ;;  %v3105_v45 = vld [vmem:[%s9567_s5 + $0xf8] sm:$0xff] }
 0x27e   : > { %v2910_v21 = vpop.f32.mrf.mxu2 }
 0x27f   : > { %3021 = vmatpush.bf16.msrb.mxu3 %v7037_v53  ;;  %v2807_v27 = vadd.f32 %v8274_v37, %v2794_v47 }
 0x281   : > { %v2886_v25 = vpop.f32.mrf.mxu0  ;;  %v2899_v34 = vpop.f32.mrf.mxu1 }
 0x283   : > { %3022 = vmatpush.bf16.msrb.mxu3 %v7036_v55 }
 0x286   : > { %v2912_v35 = vpop.f32.mrf.mxu2 }
 0x287   : > { %3023 = vmatpush.bf16.msrb.mxu3 %v7035_v57  ;;  %v3109_v35 = vld [vmem:[%s9567_s5 + $0x118] sm:$0xff] }
 0x288   : > { %3124 = vmatpush.msrb.mxu0 %v3109_v35  ;;  %v3157_v35 = vld [vmem:[%s9567_s5 + $0x140] sm:$0xff] }
 0x28a   : > { %3125 = vmatpush.msrb.mxu0 %v3108_v38 }
 0x28b   : > { %3024 = vmatpush.bf16.msrb.mxu3 %v7034_v62 }
 0x28f   : > { %3025 = vmatpush.bf16.msrb.mxu3 %v7033_v1 }
 0x291   : > { %v2936_v42 = vpop.f32.mrf.mxu0 }
 0x292   : > { %3026 = vmatmul.bf16.vlgmr.msrb.gmra.mxu3 %v1094_v6  ;;  %v2962_v44 = vpop.f32.mrf.mxu2 }
 0x293   : > { %3070 = vmatpush.bf16.msra.mxu3 %v7072_v2 }
 0x295   : > { %v2819_v13 = vpop.f32.mrf.mxu3  ;;  %v2949_v43 = vpop.f32.mrf.mxu1 }
 0x296   : > { %v2820_v56 = vadd.f32 %v2819_v13, %v2807_v27  ;;  %v3103_v27 = vld [vmem:[%s9567_s5 + $0xe8] sm:$0xff] }
 0x297   : > { %3071 = vmatpush.bf16.msra.mxu3 %v7071_v7 }
 0x298   : > { %v2833_v50 = vadd.f32 %v2832_v59, %v2820_v56 }
 0x299   : > { %v2938_v32 = vpop.f32.mrf.mxu0 }
 0x29a   : > { %v2964_v49 = vpop.f32.mrf.mxu2  ;;  %v2846_v60 = vadd.f32 %v2845_v61, %v2833_v50  ;;  %v3104_v32 = vld [vmem:[%s9567_s5 + $0xf0] sm:$0xff]  ;;  %v3240_v50 = vld [vmem:[%s9569_s7 + $0x28] sm:$0xff] }
 0x29b   : > { %3072 = vmatpush.bf16.msra.mxu3 %v7070_v9 }
 0x29c   : > { %v2859_v51 = vadd.f32 %v2858_v63, %v2846_v60  ;;  %v3239_v60 = vld [vmem:[%s9569_s7 + $0x20] sm:$0xff] }
 0x29d   : > { %v2821_v24 = vpop.f32.mrf.mxu3  ;;  %v2951_v48 = vpop.f32.mrf.mxu1 }
 0x29f   : > { %3073 = vmatpush.bf16.msra.mxu3 %v7069_v10 }
 0x2a3   : > { %3074 = vmatpush.bf16.msra.mxu3 %v7068_v11 }
 0x2a7   : > { %3075 = vmatpush.bf16.msra.mxu3 %v7067_v12  ;;  %v7315_v12 = vmov 32.0  }
 0x2a8   : > { %7135 = vrcp.f32 %v7315_v12 }
 0x2ab   : > { %3076 = vmatpush.bf16.msra.mxu3 %v7066_v17 }
 0x2ae   : > { %v7136_v13 = vpop.eup %7135 }
 0x2af   : > { %3077 = vmatpush.bf16.msra.mxu3 %v7065_v22  ;;  %v3208_v14 = vmul.f32 32.0, %v7136_v13  ;;  %vm3212_vm12 = vweird.f32 %v7136_v13 }
 0x2b1   : > { %v2988_v52 = vpop.f32.mrf.mxu0  ;;  %v3209_v17 = vsub.f32 1.0, %v3208_v14 }
 0x2b2   : > { %3078 = vmatmul.bf16.vlgmr.msra.gmra.mxu3 %v1098_v30 }
 0x2b3   : > { %v3210_v18 = vmul.f32 %v7136_v13, %v3209_v17  ;;  %v3293_v17 = vld [vmem:[%s9567_s5 + $0x230] sm:$0xff] }
 0x2b5   : > { %v2871_v40 = vpop.f32.mrf.mxu3  ;;  %v3001_v53 = vpop.f32.mrf.mxu1  ;;  %v3211_v22 = vadd.f32 %v7136_v13, %v3210_v18  ;;  %v3292_v18 = vld [vmem:[%s9567_s5 + $0x228] sm:$0xff] }
 0x2b6   : > { %v2872_v41 = vadd.f32 %v2871_v40, %v2859_v51 }
 0x2b7   : > { %v8356_v24 = vsel %vm3212_vm12, %v7136_v13, %v3211_v22  ;;  %v7117_v13 = vld [vmem:[%s9569_s7] ss:$0 sm:$0xff]  ;;  %v3289_v22 = vld [vmem:[%s9567_s5 + $0x210] sm:$0xff] }
 0x2b8   : > { %v2885_v54 = vadd.f32 %v2884_v15, %v2872_v41 }
 0x2b9   : > { %v2990_v28 = vpop.f32.mrf.mxu0 }
 0x2ba   : > { %v2898_v58 = vadd.f32 %v2897_v19, %v2885_v54  ;;  %v3296_v54 = vld [vmem:[%s9567_s5 + $0x248] sm:$0xff] }
 0x2bb   : > { %3308 = vmatpush.msrb.mxu2 %v3296_v54 }
 0x2bc   : > { %v2911_v1 = vadd.f32 %v2910_v21, %v2898_v58 }
 0x2bd   : > { %v2873_v46 = vpop.f32.mrf.mxu3  ;;  %v3003_v62 = vpop.f32.mrf.mxu1 }
 0x2c5   : > { %v3014_v55 = vpop.f32.mrf.mxu2 }
 0x2cd   : > { %v3016_v33 = vpop.f32.mrf.mxu2 }
 0x2cf   : > { %v3206_v25 = vpop.xlane.xlu0 %3205 }
 0x2d0   : > { %v8362_v34 = vmul.f32 %v8356_v24, %v3206_v25  ;;  %v3161_v25 = vld [vmem:[%s9567_s5 + $0x160] sm:$0xff] }
 0x2d1   : > { %v3218_v26 = vpop.xlane.xlu1 %3217 }
 0x2d2   : > { %v3220_v39 = vmul.f32 %v8362_v34, %v8362_v34  ;;  %v3219_v40 = vmul.f32 %v3218_v26, %v8356_v24  ;;  %v3111_v26 = vld [vmem:[%s9567_s5 + $0x128] sm:$0x1] }
 0x2d5   : > { %v2923_v0 = vpop.f32.mrf.mxu3 }
 0x2d6   : > { %v2924_v2 = vadd.f32 %v2923_v0, %v2911_v1  ;;  %v3238_v0 = vld [vmem:[%s9569_s7 + $0x18] sm:$0xff] }
 0x2d8   : > { %v2937_v3 = vadd.f32 %v2936_v42, %v2924_v2  ;;  %v3107_v42 = vld [vmem:[%s9567_s5 + $0x108] sm:$0xff] }
 0x2d9   : > { %3126 = vmatpush.msrb.mxu0 %v3107_v42 }
 0x2da   : > { %v2950_v4 = vadd.f32 %v2949_v43, %v2937_v3  ;;  %v3106_v43 = vld [vmem:[%s9567_s5 + $0x100] sm:$0xff] }
 0x2db   : > { %3127 = vmatpush.msrb.mxu0 %v3106_v43  ;;  %v3266_v43 = vld [vmem:[%s9569_s7 + $0x40] sm:$0xff] }
 0x2dc   : > { %v2963_v37 = vadd.f32 %v2962_v44, %v2950_v4  ;;  %v3221_v44 = vsub.f32 %v3219_v40, %v3220_v39  ;;  %v3155_v40 = vld [vmem:[%s9567_s5 + $0x130] sm:$0xff] }
 0x2dd   : > { %v2925_v57 = vpop.f32.mrf.mxu3  ;;  %v3053_v6 = vpop.f32.mrf.mxu1  ;;  %3128 = vmatpush.msrb.mxu0 %v3105_v45  ;;  %v3265_v45 = vld [vmem:[%s9569_s7 + $0x38] sm:$0xff] }
 0x2de   : > { %v3223_v48 = vadd.f32 1e-05, %v3221_v44 }
 0x2df   : > { %3129 = vmatpush.msrb.mxu0 %v3104_v32 }
 0x2e0   : > { %7137 = vrsqrt.f32 %v3223_v48  ;;  %vm3230_vm3 = vweird.f32 %v3223_v48 }
 0x2e1   : > { %3130 = vmatpush.msrb.mxu0 %v3103_v27 }
 0x2e3   : > { %3256 = vmatpush.msra.mxu0 %v3240_v50 }
 0x2e5   : > { %v3066_v7 = vpop.f32.mrf.mxu2  ;;  %v3055_v10 = vpop.f32.mrf.mxu1  ;;  %3257 = vmatpush.msra.mxu0 %v3239_v60 }
 0x2e7   : > { %3258 = vmatpush.msra.mxu0 %v3238_v0 }
 0x2ed   : > { %v3068_v11 = vpop.f32.mrf.mxu2 }
 0x2ee   : > { %v3222_v11 = vsub.f32 %v8240_v20, %v8362_v34  ;;  %v3158_v34 = vld [vmem:[%s9567_s5 + $0x148] sm:$0xff] }
 0x2f0   : > { %v3040_v61 = vpop.f32.mrf.mxu0 }
 0x2f5   : > { %v2975_v5 = vpop.f32.mrf.mxu3 }
 0x2f6   : > { %v2976_v59 = vadd.f32 %v2975_v5, %v2963_v37 }
 0x2f8   : > { %v2989_v63 = vadd.f32 %v2988_v52, %v2976_v59  ;;  %v3042_v9 = vpop.f32.mrf.mxu0  ;;  %v3237_v52 = vld [vmem:[%s9569_s7 + $0x10] sm:$0xff] }
 0x2f9   : > { %3259 = vmatpush.msra.mxu0 %v3237_v52 }
 0x2fa   : > { %v3002_v21 = vadd.f32 %v3001_v53, %v2989_v63  ;;  %v7138_v53 = vpop.eup %7137 }
 0x2fb   : > { %v3225_v28 = vmul.f32 %v7138_v53, %v3223_v48  ;;  %vm3231_vm15 = vweird.f32 %v7138_v53 }
 0x2fc   : > { %v3015_v23 = vadd.f32 %v3014_v55, %v3002_v21  ;;  %v3295_v55 = vld [vmem:[%s9567_s5 + $0x240] sm:$0xff]  ;;  %vm3232_vm4 = vmor %vm3230_vm3, %vm3231_vm15  ;;  %v3290_v21 = vld [vmem:[%s9567_s5 + $0x218] sm:$0xff]  ;;  %vm3198_vm15 = vcmask 1040384   ;;  %vm3362_vm3 = vcmask 126976  }
 0x2fd   : > { %v2977_v8 = vpop.f32.mrf.mxu3  ;;  %3309 = vmatpush.msrb.mxu2 %v3295_v55  ;;  %v3226_v62 = vmul.f32 %v7138_v53, %v3225_v28  ;;  %v3380_v28 = vld [vmem:[%s9567_s5 + $0x208] sm:$0xff] }
 0x2ff   : > { %v3227_v33 = vmul.f32 0.5, %v3226_v62 }
 0x301   : > { %v3228_v4 = vsub.f32 1.5, %v3227_v33 }
 0x303   : > { %v3229_v63 = vmul.f32 %v7138_v53, %v3228_v4  ;;  %v386_v4 = vld [vmem:[%s9567_s5 + $0x20] sm:$0x1] }
 0x305   : > { %v3233_v10 = vsel %vm3232_vm4, %v7138_v53, %v3229_v63  ;;  %v409_v63 = vadd.f32 %v8087_v16, %v386_v4  ;;  %vm3381_vm4 = vcmask 130048  }
 0x306   : > { %v3234_v12 = vmul.f32 %v3233_v10, %v3222_v11 }
 0x308   : > { %v8412_v14 = vmul.f32 %v7117_v13, %v3234_v12 }
 0x315   : > { %v3027_v15 = vpop.f32.mrf.mxu3 }
 0x316   : > { %v3028_v30 = vadd.f32 %v3027_v15, %v3015_v23  ;;  %v3294_v15 = vld [vmem:[%s9567_s5 + $0x238] sm:$0xff]  ;;  %v3162_v23 = vld [vmem:[%s9567_s5 + $0x168] sm:$0xff] }
 0x317   : > { %3310 = vmatpush.msrb.mxu2 %v3294_v15  ;;  %3175 = vmatpush.msrb.mxu1 %v3162_v23 }
 0x318   : > { %v3041_v36 = vadd.f32 %v3040_v61, %v3028_v30  ;;  %v3160_v30 = vld [vmem:[%s9567_s5 + $0x158] sm:$0xff] }
 0x319   : > { %3311 = vmatpush.msrb.mxu2 %v3293_v17  ;;  %3176 = vmatpush.msrb.mxu1 %v3161_v25 }
 0x31a   : > { %v3054_v29 = vadd.f32 %v3053_v6, %v3041_v36  ;;  %v3156_v36 = vld [vmem:[%s9567_s5 + $0x138] sm:$0xff] }
 0x31b   : > { %3312 = vmatpush.msrb.mxu2 %v3292_v18  ;;  %3177 = vmatpush.msrb.mxu1 %v3160_v30 }
 0x31c   : > { %v3067_v46 = vadd.f32 %v3066_v7, %v3054_v29  ;;  %v3267_v29 = vld [vmem:[%s9569_s7 + $0x48] sm:$0xff] }
 0x31d   : > { %v3029_v19 = vpop.f32.mrf.mxu3  ;;  %3178 = vmatpush.msrb.mxu1 %v3159_v31 }
 0x31e   : > { %v3291_v19 = vld [vmem:[%s9567_s5 + $0x220] sm:$0xff] }
 0x31f   : > { %3313 = vmatpush.msrb.mxu2 %v3291_v19  ;;  %3179 = vmatpush.msrb.mxu1 %v3158_v34 }
 0x321   : > { %3314 = vmatpush.msrb.mxu2 %v3290_v21  ;;  %3180 = vmatpush.msrb.mxu1 %v3157_v35 }
 0x323   : > { %3315 = vmatpush.msrb.mxu2 %v3289_v22  ;;  %3181 = vmatpush.msrb.mxu1 %v3156_v36 }
 0x325   : > { %3182 = vmatpush.msrb.mxu1 %v3155_v40  ;;  %v3441_v40 = vld [vmem:[%s9567_s5 + $0x1c0] sm:$0xf] }
 0x327   : > { %3280 = vmatpush.msra.mxu1 %v3267_v29  ;;  %v3437_v29 = vld [vmem:[%s9569_s7 + $0xc8] sm:$0xff] }
 0x329   : > { %3281 = vmatpush.msra.mxu1 %v3266_v43  ;;  %v3436_v43 = vld [vmem:[%s9569_s7 + $0xc0] sm:$0xff] }
 0x32b   : > { %3282 = vmatpush.msra.mxu1 %v3265_v45  ;;  %v3434_v45 = vld [vmem:[%s9569_s7 + $0xb0] sm:$0xff] }
 0x335   : > { %v3079_v47 = vpop.f32.mrf.mxu3 }
 0x336   : > { %v3080_v49 = vadd.f32 %v3079_v47, %v3067_v46  ;;  %v3264_v46 = vld [vmem:[%s9569_s7 + $0x30] sm:$0xff] }
 0x337   : > { %3283 = vmatpush.msra.mxu1 %v3264_v46  ;;  %v3433_v46 = vld [vmem:[%s9569_s7 + $0xa8] sm:$0xff] }
 0x338   : > { %v3083_v56 = vsub.f32 0.0, %v3080_v49 }
 0x33a   : > { %v3084_v51 = vmul.f32 1.442695, %v3083_v56 }
 0x33c   : > { %7139 = vpow2.f32 %v3084_v51 }
 0x33d   : > { %v3081_v41 = vpop.f32.mrf.mxu3 }
 0x342   : > { %v7140_v57 = vpop.eup %7139 }
 0x343   : > { %v3086_v58 = vadd.f32 1.0, %v7140_v57  ;;  %v8484_v57 = vld [vmem:[%s9567_s5 + $0x1f8] sm:$0xf] }
 0x344   : > { %6614 = vmatpush.msk.msra.mxu2 %vm3190_vm10, %v8484_v57 }
 0x345   : > { %7141 = vrcp.f32 %v3086_v58  ;;  %v3098_v37 = vand.u32 2147483648, %v3086_v58  ;;  %v3096_v59 = vand.u32 2147483647, %v3086_v58  ;;  %vm3092_vm14 = vweird.f32 %v3086_v58 }
 0x347   : > { %v3099_v6 = vor.u32 1.1754944e-38, %v3098_v37  ;;  %vm3097_vm2 = vcmp.eq.f32.partialorder %v3096_v59, 8.507059e+37 }
 0x34b   : > { %v7142_v1 = vpop.eup %7141 }
 0x34c   : > { %v3088_v2 = vmul.f32 %v7142_v1, %v3086_v58  ;;  %vm3093_vm13 = vweird.f32 %v7142_v1  ;;  %v3379_v58 = vld [vmem:[%s9567_s5 + $0x200] sm:$0xff] }
 0x34d   : > { %vm3094_vm1 = vmor %vm3092_vm14, %vm3093_vm13  ;;  %vm3332_vm14 = vcmask 31744  }
 0x34e   : > { %v3089_v3 = vsub.f32 1.0, %v3088_v2 }
 0x350   : > { %v3090_v5 = vmul.f32 %v7142_v1, %v3089_v3 }
 0x352   : > { %v3091_v61 = vadd.f32 %v7142_v1, %v3090_v5  ;;  %v376_v5 = vld [vmem:[%s367_s29] sm:$0xf]  ;;  %s358_s29 = sand.u32 1, %s7304_s10  }
 0x353   : > { %s359_s21 = scalar_lea.vmem [#allocation2], %s358_s29  ;;  %s5474_s14 = scalar_lea.sflag [#allocation3], %s358_s29 }
 0x354   : > { %v3095_v7 = vsel %vm3094_vm1, %v7142_v1, %v3091_v61  ;;  %v3163_v61 = vld [vmem:[%s9567_s5 + $0x170] sm:$0x1]  ;;  %s5484_s2 = sshll.u32 %s359_s21, 4  ;;  %s5485_s2 = int_to_ptr.vmem [resolvable:$true] %s5484_s2 }
 0x355   : > { %v3100_v8 = vsel %vm3097_vm2, %v3099_v6, %v3095_v7  ;;  %v3193_v6 = vrot.slane %v376_v5, 7  ;;  %vm3200_vm2 = vcmask 1044480  }
 0x356   : > { %v3102_v9 = vmul.f32 %v3100_v8, %v3080_v49 }
 0x357   : > { %v3199_v12 = vsel %vm3198_vm15, %v409_v63, %v3193_v6  ;;  %v3447_v63 = vld [vmem:[%s9567_s5 + $0x1f0] sm:$0xf]  ;;  %v3446_v6 = vld [vmem:[%s9567_s5 + $0x1e8] sm:$0xff]  ;;  %vm3591_vm15 = vcmask 162816  }
 0x358   : > { %6609 = vmatmul.msk.f32.vlgmr.msrb.gmra.mxu0 %vm470_vm5, %v3102_v9 }
 0x359   : > { %3399 = vmatpush.msrb.mxu0 %v3380_v28 }
 0x35b   : > { %3400 = vmatpush.msrb.mxu0 %v3379_v58 }
 0x360   : > { %6611 = vmatmul.msk.f32.vlgmr.msra.gmra.mxu0 %vm387_vm0, %v8412_v14 }
 0x3d5   : > { %v3132_v38 = vpop.f32.mrf.mxu0 }
 0x3d6   : > { %v3133_v39 = vadd.f32 %v3132_v38, %v3111_v26  ;;  %v3439_v38 = vld [vmem:[%s9567_s5 + $0x1b0] sm:$0xff] }
 0x3d8   : > { %v3135_v42 = vsub.f32 0.0, %v3133_v39 }
 0x3da   : > { %v3136_v44 = vmul.f32 1.442695, %v3135_v42 }
 0x3dc   : > { %7143 = vpow2.f32 %v3136_v44  ;;  %v3435_v44 = vld [vmem:[%s9569_s7 + $0xb8] sm:$0xff] }
 0x3dd   : > { %v8473_v32 = vpop.f32.mrf.mxu0 }
 0x3de   : > { %v3288_v47 = vmul.f32 %v8473_v32, %v8473_v32 }
 0x3e0   : > { %6613 = vmatmul.msk.f32.vlgmr.msrb.gmra.mxu2 %vm470_vm5, %v3288_v47 }
 0x3e2   : > { %v7144_v48 = vpop.eup %7143 }
 0x3e3   : > { %v3138_v49 = vadd.f32 1.0, %v7144_v48  ;;  %v3432_v48 = vld [vmem:[%s9569_s7 + $0xa0] sm:$0xff] }
 0x3e5   : > { %7145 = vrcp.f32 %v3138_v49  ;;  %v3150_v60 = vand.u32 2147483648, %v3138_v49  ;;  %v3148_v0 = vand.u32 2147483647, %v3138_v49  ;;  %vm3144_vm7 = vweird.f32 %v3138_v49 }
 0x3e7   : > { %v3151_v41 = vor.u32 1.1754944e-38, %v3150_v60  ;;  %vm3149_vm9 = vcmp.eq.f32.partialorder %v3148_v0, 8.507059e+37  ;;  %v3443_v0 = vld [vmem:[%s9567_s5 + $0x1d0] sm:$0xff] }
 0x3eb   : > { %v7146_v27 = vpop.eup %7145 }
 0x3ec   : > { %v3140_v56 = vmul.f32 %v7146_v27, %v3138_v49  ;;  %vm3145_vm6 = vweird.f32 %v7146_v27 }
 0x3ed   : > { %vm3146_vm8 = vmor %vm3144_vm7, %vm3145_vm6 }
 0x3ee   : > { %v3141_v50 = vsub.f32 1.0, %v3140_v56  ;;  %v3430_v56 = vld [vmem:[%s9569_s7 + $0x90] sm:$0xff] }
 0x3f0   : > { %v3142_v51 = vmul.f32 %v7146_v27, %v3141_v50 }
 0x3f2   : > { %v3143_v52 = vadd.f32 %v7146_v27, %v3142_v51  ;;  %v3444_v51 = vld [vmem:[%s9567_s5 + $0x1d8] sm:$0xf] }
 0x3f4   : > { %v3147_v53 = vsel %vm3146_vm8, %v7146_v27, %v3143_v52  ;;  %v3431_v27 = vld [vmem:[%s9569_s7 + $0x98] sm:$0xff] }
 0x3f5   : > { %v3152_v54 = vsel %vm3149_vm9, %v3151_v41, %v3147_v53  ;;  %vm3450_vm9 = vcmask 39936  }
 0x3f6   : > { %v3154_v55 = vmul.f32 %v3152_v54, %v3133_v39  ;;  %v3440_v39 = vld [vmem:[%s9567_s5 + $0x1b8] sm:$0xff]  ;;  %v3442_v54 = vld [vmem:[%s9567_s5 + $0x1c8] sm:$0xff] }
 0x3f8   : > { %6610 = vmatmul.msk.f32.vlgmr.msrb.gmra.mxu1 %vm470_vm5, %v3154_v55  ;;  %v3449_v55 = vld [vmem:[%s9567_s5 + $0x1a8] sm:$0x1f] }
 0x3f9   : > { %3424 = vmatpush.msrb.mxu1 %v3380_v28 }
 0x3fb   : > { %3425 = vmatpush.msrb.mxu1 %v3379_v58 }
 0x400   : > { %6612 = vmatmul.msk.f32.vlgmr.msra.gmra.mxu1 %vm387_vm0, %v8412_v14 }
 0x463   : > { %v3317_v62 = vpop.f32.mrf.mxu2 }
 0x464   : > { %v3320_v1 = vmax.f32 %v3317_v62, 1e-24 }
 0x466   : > { %7147 = vrsqrt.f32 %v3320_v1  ;;  %vm3327_vm13 = vweird.f32 %v3320_v1 }
 0x46c   : > { %v7148_v33 = vpop.eup %7147 }
 0x46d   : > { %v3322_v2 = vmul.f32 %v7148_v33, %v3320_v1  ;;  %vm3328_vm12 = vweird.f32 %v7148_v33  ;;  %v3448_v1 = vld [vmem:[%s9567_s5 + $0x1a0] sm:$0x1f] }
 0x46e   : > { %vm3329_vm1 = vmor %vm3327_vm13, %vm3328_vm12  ;;  %vm3580_vm12 = vcmask 28672   ;;  %vm3576_vm13 = vcmask 159744  }
 0x46f   : > { %v3323_v3 = vmul.f32 %v7148_v33, %v3322_v2 }
 0x471   : > { %v3324_v37 = vmul.f32 0.5, %v3323_v3 }
 0x473   : > { %v3325_v59 = vsub.f32 1.5, %v3324_v37 }
 0x475   : > { %v3184_v7 = vpop.f32.mrf.mxu1  ;;  %v3326_v8 = vmul.f32 %v7148_v33, %v3325_v59 }
 0x476   : > { %v3185_v9 = vadd.f32 %v3184_v7, %v3163_v61  ;;  %v3438_v7 = vld [vmem:[%s9569_s7 + $0xd0] sm:$0xf] }
 0x477   : > { %v3330_v10 = vsel %vm3329_vm1, %v7148_v33, %v3326_v8  ;;  %vm9572_vm1 = vcmask 1045504  }
 0x478   : > { %v3196_v11 = vrot.slane %v3185_v9, 3  ;;  %6615 = vmatmul.msk.f32.vlgmr.msra.gmra.mxu2 %vm3332_vm14, %v3330_v10  ;;  %v3445_v9 = vld [vmem:[%s9567_s5 + $0x1e0] sm:$0xff]  ;;  %v3809_v10 = vld [vmem:[%s9570_s8 + $0x38] sm:$0xff] }
 0x47a   : > { %v8508_v13 = vsel %vm3200_vm2, %v3199_v12, %v3196_v11  ;;  %v3808_v11 = vld [vmem:[%s9570_s8 + $0x30] sm:$0xff]  ;;  %v3807_v12 = vld [vmem:[%s9570_s8 + $0x28] sm:$0xff] }
 0x47d   : > { %v3285_v14 = vpop.f32.mrf.mxu1 }
 0x47e   : > { %3406 = vrot.lane.b32.xlu2 %v3285_v14, %s7316_s25  ;;  %v3361_v16 = vmul.f32 %v3285_v14, %v3285_v14 }
 0x480   : > { %v3363_v15 = vsel %vm3362_vm3, %v3361_v16, 0.0 }
 0x481   : > { %3364 = vadd.xlane.f32.xlu1 %v3363_v15 }
 0x4d8   : > { %v3407_v17 = vpop.permute.xlu2 %3406 }
 0x4d9   : > { %6617 = vmatmul.msk.f32.vlgmr.msrb.gmra.mxu1 %vm3381_vm4, %v3407_v17 }
 0x4f4   : > { %v3365_v18 = vpop.xlane.xlu1 %3364 }
 0x4f5   : > { %v3366_v19 = vmax.f32 %v3365_v18, 1e-24 }
 0x4f7   : > { %7149 = vrsqrt.f32 %v3366_v19  ;;  %vm3373_vm7 = vweird.f32 %v3366_v19 }
 0x4fb   : > { %v3356_v47 = vpop.f32.mrf.mxu2 }
 0x4fc   : > { %v3359_v49 = vmul.f32 %v3356_v47, %v8473_v32 }
 0x4fd   : > { %v7150_v21 = vpop.eup %7149 }
 0x4fe   : > { %v3368_v22 = vmul.f32 %v7150_v21, %v3366_v19  ;;  %vm3374_vm6 = vweird.f32 %v7150_v21  ;;  %v3360_v50 = vmul.f32 4.0, %v3359_v49 }
 0x4ff   : > { %vm3375_vm8 = vmor %vm3373_vm7, %vm3374_vm6 }
 0x500   : > { %v3369_v23 = vmul.f32 %v7150_v21, %v3368_v22 }
 0x502   : > { %v3370_v25 = vmul.f32 0.5, %v3369_v23 }
 0x504   : > { %v3371_v30 = vsub.f32 1.5, %v3370_v25 }
 0x506   : > { %v3372_v31 = vmul.f32 %v7150_v21, %v3371_v30  ;;  %v3781_v30 = vld [vmem:[%s9570_s8 + $0x18] sm:$0xff] }
 0x508   : > { %v3376_v34 = vsel %vm3375_vm8, %v7150_v21, %v3372_v31  ;;  %v3837_v31 = vld [vmem:[%s9570_s8 + $0x58] sm:$0xff] }
 0x509   : > { %v3377_v35 = vmul.f32 %v3376_v34, %v3285_v14  ;;  %v3806_v14 = vld [vmem:[%s9570_s8 + $0x20] sm:$0xff]  ;;  %v3780_v34 = vld [vmem:[%s9570_s8 + $0x10] sm:$0xff] }
 0x50b   : > { %v3378_v26 = vmul.f32 4.0, %v3377_v35  ;;  %v3836_v35 = vld [vmem:[%s9570_s8 + $0x50] sm:$0xff] }
 0x50d   : > { %6616 = vmatmul.msk.f32.vlgmr.msrb.gmra.mxu0 %vm3381_vm4, %v3378_v26  ;;  %v3779_v26 = vld [vmem:[%s9570_s8 + $0x8] sm:$0xff] }
 0x556   : > { %v3427_v36 = vpop.f32.mrf.mxu1 }
 0x557   : > { %6622 = vmatpush.msk.msrb.mxu3 %vm3200_vm2, %v3427_v36  ;;  %v3835_v36 = vld [vmem:[%s9570_s8 + $0x48] sm:$0xff] }
 0x558   : > { %6623 = vmatmul.msk.f32.vlgmr.msrb.gmra.mxu3 %vm3450_vm9, %v3439_v38 }
 0x559   : > { %6637 = vmatpush.msk.msra.mxu3 %vm3190_vm10, %v8484_v57 }
 0x55b   : > { %3850 = vmatpush.msrb.mxu3 %v3837_v31  ;;  %v3877_v31 = vld [vmem:[%s9567_s5 + $0x260] sm:$0xff] }
 0x55d   : > { %3851 = vmatpush.msrb.mxu3 %v3836_v35 }
 0x55f   : > { %3852 = vmatpush.msrb.mxu3 %v3835_v36 }
 0x560   : > { %6624 = vmatmul.msk.f32.gmra.mxu3 %vm3450_vm9, %v3440_v39 }
 0x568   : > { %6625 = vmatmul.msk.f32.gmra.mxu3 %vm3450_vm9, %v3441_v40 }
 0x58a   : > { %v3402_v42 = vpop.f32.mrf.mxu0 }
 0x58b   : > { %6618 = vmatpush.msk.msra.mxu1 %vm3200_vm2, %v3402_v42  ;;  %7073 = vmatpush.msk.msrb.mxu2 %vm3200_vm2, %v3402_v42  ;;  %v3698_v42 = vld [vmem:[%s9569_s7 + $0x80] sm:$0xff] }
 0x58c   : > { %6619 = vmatmul.msk.f32.vlgmr.msra.gmra.mxu1 %vm3450_vm9, %v3439_v38  ;;  %6621 = vmatmul.msk.f32.vlgmr.msrb.gmra.mxu2 %vm3450_vm9, %v3441_v40  ;;  %v3778_v38 = vld [vmem:[%s9570_s8] sm:$0xff]  ;;  %v3699_v40 = vld [vmem:[%s9569_s7 + $0x88] sm:$0xff] }
 0x58d   : > { %3564 = vmatpush.msrb.mxu1 %v3437_v29  ;;  %v3697_v29 = vld [vmem:[%s9569_s7 + $0x78] sm:$0xff] }
 0x58f   : > { %3565 = vmatpush.msrb.mxu1 %v3436_v43  ;;  %v3696_v43 = vld [vmem:[%s9569_s7 + $0x70] sm:$0xff] }
 0x591   : > { %3566 = vmatpush.msrb.mxu1 %v3435_v44  ;;  %v3695_v44 = vld [vmem:[%s9569_s7 + $0x68] sm:$0xff] }
 0x593   : > { %3567 = vmatpush.msrb.mxu1 %v3434_v45  ;;  %v3694_v45 = vld [vmem:[%s9569_s7 + $0x60] sm:$0xff] }
 0x594   : > { %6620 = vmatmul.msk.f32.gmra.mxu1 %vm3450_vm9, %v3440_v39  ;;  %v3834_v39 = vld [vmem:[%s9570_s8 + $0x40] sm:$0xff] }
 0x595   : > { %3568 = vmatpush.msrb.mxu1 %v3433_v46  ;;  %3853 = vmatpush.msrb.mxu3 %v3834_v39 }
 0x597   : > { %3569 = vmatpush.msrb.mxu1 %v3432_v48 }
 0x599   : > { %3570 = vmatpush.msrb.mxu1 %v3431_v27 }
 0x59b   : > { %3571 = vmatpush.msrb.mxu1 %v3430_v56 }
 0x59c   : > { %6630 = vmatmul.msk.f32.vlgmr.msrb.gmra.mxu1 %vm470_vm5, %v3360_v50 }
 0x59d   : > { %6633 = vmatpush.msk.msra.mxu1 %vm3190_vm10, %v3438_v7  ;;  %v7118_v7 = vld [vmem:[%s9569_s7 + $0x8] ss:$0 sm:$0xff] }
 0x59f   : > { %3797 = vmatpush.msrb.mxu1 %v3781_v30 }
 0x5a1   : > { %3798 = vmatpush.msrb.mxu1 %v3780_v34 }
 0x5a3   : > { %3799 = vmatpush.msrb.mxu1 %v3779_v26 }
 0x5a5   : > { %3800 = vmatpush.msrb.mxu1 %v3778_v38  ;;  %v3878_v38 = vld [vmem:[%s9567_s5 + $0x268] sm:$0xff] }
 0x5db   : > { %v3512_v4 = vpop.f32.mrf.mxu3 }
 0x5dc   : > { %v3521_v8 = vmul.f32 %v3512_v4, %v3442_v54 }
 0x5e3   : > { %v3515_v37 = vpop.f32.mrf.mxu3 }
 0x5e4   : > { %v3522_v59 = vmul.f32 %v3515_v37, %v3443_v0 }
 0x5eb   : > { %v3518_v5 = vpop.f32.mrf.mxu3 }
 0x5ec   : > { %v3523_v61 = vmul.f32 %v3518_v5, %v3444_v51 }
 0x5ee   : > { %6635 = vmatpush.msk.msra.mxu2 %vm3190_vm10, %v3523_v61 }
 0x5f0   : > { %3662 = vmatpush.msra.mxu2 %v3522_v59 }
 0x5f2   : > { %3663 = vmatpush.msra.mxu2 %v3521_v8 }
 0x5f4   : > { %3825 = vmatpush.msrb.mxu2 %v3809_v10 }
 0x5f6   : > { %3826 = vmatpush.msrb.mxu2 %v3808_v11 }
 0x5f8   : > { %3827 = vmatpush.msrb.mxu2 %v3807_v12 }
 0x5fa   : > { %3828 = vmatpush.msrb.mxu2 %v3806_v14 }
 0x609   : > { %v3480_v60 = vpop.f32.mrf.mxu1 }
 0x60a   : > { %v3489_v57 = vmul.f32 %v3480_v60, %v3442_v54  ;;  %v3692_v60 = vld [vmem:[%s9569_s7 + $0x50] sm:$0xff] }
 0x60f   : > { %v3486_v32 = vpop.f32.mrf.mxu2 }
 0x610   : > { %v3491_v52 = vmul.f32 %v3486_v32, %v3444_v51 }
 0x611   : > { %v3483_v41 = vpop.f32.mrf.mxu1 }
 0x612   : > { %v3490_v53 = vmul.f32 %v3483_v41, %v3443_v0  ;;  %6626 = vmatpush.xpose.msk.msra.mxu0 %vm470_vm5, %v3491_v52 }
 0x616   : > { %6627 = vmatpush.xpose.msk.msra.mxu0 %vm470_vm5, %v3490_v53 }
 0x619   : > { %v3573_v28 = vpop.f32.mrf.mxu1 }
 0x61a   : > { %v3574_v58 = vadd.f32 %v3573_v28, %v3449_v55  ;;  %6628 = vmatpush.xpose.msk.msra.mxu0 %vm470_vm5, %v3489_v57 }
 0x61c   : > { %v3581_v62 = vsel %vm3580_vm12, %v3574_v58, -inf }
 0x61d   : > { %3582 = vmax.xlane.f32.xlu1 %v3581_v62  ;;  %6629 = vmatmul.msk.f32.vlgmr.msra.gmra.mxu0 %vm470_vm5, %v3360_v50  ;;  %v3693_v50 = vld [vmem:[%s9569_s7 + $0x58] sm:$0xff] }
 0x61e   : > { %6631 = vmatpush.msk.msrb.mxu0 %vm3190_vm10, %v3447_v63 }
 0x620   : > { %3612 = vmatpush.msrb.mxu0 %v3446_v6 }
 0x622   : > { %3613 = vmatpush.msrb.mxu0 %v3445_v9 }
 0x624   : > { %3711 = vmatpush.msra.mxu0 %v3699_v40 }
 0x626   : > { %3712 = vmatpush.msra.mxu0 %v3698_v42  ;;  %v7119_v42 = vld [vmem:[%s9569_s7 + $0xd8] ss:$0 sm:$0xff] }
 0x628   : > { %3713 = vmatpush.msra.mxu0 %v3697_v29 }
 0x62a   : > { %3714 = vmatpush.msra.mxu0 %v3696_v43 }
 0x62c   : > { %3715 = vmatpush.msra.mxu0 %v3695_v44 }
 0x62e   : > { %3716 = vmatpush.msra.mxu0 %v3694_v45  ;;  %v3879_v45 = vld [vmem:[%s9567_s5 + $0x270] sm:$0xff] }
 0x630   : > { %3717 = vmatpush.msra.mxu0 %v3693_v50  ;;  %v3868_v50 = vld [vmem:[%s9569_s7 + $0x1b8] sm:$0xff] }
 0x632   : > { %3718 = vmatpush.msra.mxu0 %v3692_v60  ;;  %v3867_v60 = vld [vmem:[%s9569_s7 + $0x1b0] sm:$0xff] }
 0x690   : > { %v3583_v16 = vpop.xlane.xlu1 %3582 }
 0x69a   : > { %v3553_v33 = vpop.f32.mrf.mxu0 }
 0x69b   : > { %v3554_v2 = vadd.f32 %v3553_v33, %v3448_v1 }
 0x69d   : > { %v3577_v3 = vsel %vm3576_vm13, %v3554_v2, -inf }
 0x69e   : > { %3578 = vmax.xlane.f32.xlu2 %v3577_v3 }
 0x711   : > { %v3579_v15 = vpop.xlane.xlu2 %3578 }
 0x712   : > { %v3584_v17 = vmax.f32 %v3579_v15, %v3583_v16 }
 0x714   : > { %v3585_v18 = vsub.f32 %v3554_v2, %v3584_v17  ;;  %v3588_v19 = vsub.f32 %v3574_v58, %v3584_v17 }
 0x716   : > { %v3586_v21 = vmul.f32 1.442695, %v3585_v18  ;;  %v3589_v22 = vmul.f32 1.442695, %v3588_v19  ;;  %v3875_v18 = vld [vmem:[%s9567_s5 + $0x250] sm:$0xff] }
 0x718   : > { %7151 = vpow2.f32 %v3586_v21 }
 0x719   : > { %7153 = vpow2.f32 %v3589_v22 }
 0x71e   : > { %v7152_v23 = vpop.eup %7151 }
 0x71f   : > { %v7154_v25 = vpop.eup %7153  ;;  %6632 = vmatmul.msk.f32.vlgmr.msrb.gmra.mxu0 %vm3591_vm15, %v7152_v23  ;;  %6636 = vmatmul.msk.f32.vlgmr.msra.gmra.mxu2 %vm3591_vm15, %v7152_v23 }
 0x720   : > { %6634 = vmatmul.msk.f32.vlgmr.msra.gmra.mxu1 %vm3332_vm14, %v7154_v25 }
 0x727   : > { %6641 = vmatmul.msk.f32.vlgmr.msrb.gmra.mxu2 %vm387_vm0, %v8508_v13 }
 0x79c   : > { %v3615_v46 = vpop.f32.mrf.mxu0 }
 0x79d   : > { %v3616_v47 = vadd.f32 %v7154_v25, %v3615_v46  ;;  %v3642_v51 = vpop.f32.mrf.mxu1  ;;  %v3876_v25 = vld [vmem:[%s9567_s5 + $0x258] sm:$0xff] }
 0x79e   : > { %v3880_v46 = vld [vmem:[%s9567_s5 + $0x278] sm:$0xff] }
 0x79f   : > { %7155 = vrcp.f32 %v3616_v47  ;;  %v3873_v47 = vld [vmem:[%s9569_s7 + $0x1e0] sm:$0xff] }
 0x7a0   : > { %4022 = vmatpush.msrb.mxu0 %v3873_v47 }
 0x7a2   : > { %v3665_v48 = vpop.f32.mrf.mxu2 }
 0x7a3   : > { %v3666_v32 = vadd.f32 %v3665_v48, %v3642_v51  ;;  %v3872_v48 = vld [vmem:[%s9569_s7 + $0x1d8] sm:$0xff]  ;;  %v3866_v51 = vld [vmem:[%s9569_s7 + $0x1a8] sm:$0xff] }
 0x7a4   : > { %4023 = vmatpush.msrb.mxu0 %v3872_v48 }
 0x7a5   : > { %v7156_v49 = vpop.eup %7155 }
 0x7a6   : > { %6638 = vmatmul.msk.f32.vlgmr.msra.gmra.mxu3 %vm3332_vm14, %v7156_v49  ;;  %v3871_v49 = vld [vmem:[%s9569_s7 + $0x1d0] sm:$0xff] }
 0x7a7   : > { %4024 = vmatpush.msrb.mxu0 %v3871_v49 }
 0x7aa   : > { %v3830_v27 = vpop.f32.mrf.mxu2 }
 0x7ab   : > { %v3833_v56 = vmul.f32 0.5, %v3830_v27  ;;  %v3870_v27 = vld [vmem:[%s9569_s7 + $0x1c8] sm:$0xff] }
 0x7ac   : > { %4025 = vmatpush.msrb.mxu0 %v3870_v27 }
 0x7ad   : > { %6643 = vmatpush.msk.msra.mxu1 %vm9572_vm1, %v3833_v56  ;;  %v3869_v56 = vld [vmem:[%s9569_s7 + $0x1c0] sm:$0xff] }
 0x7ae   : > { %6642 = vmatmul.msk.f32.vlgmr.msrb.gmra.mxu3 %vm387_vm0, %v8508_v13  ;;  %4026 = vmatpush.msrb.mxu0 %v3869_v56 }
 0x7b0   : > { %4027 = vmatpush.msrb.mxu0 %v3868_v50 }
 0x7b2   : > { %4028 = vmatpush.msrb.mxu0 %v3867_v60 }
 0x7b4   : > { %4029 = vmatpush.msrb.mxu0 %v3866_v51  ;;  %v3893_v51 = vld [vmem:[%s9568_s6 + $0x30] sm:$0xff] }
 0x829   : > { %v3688_v0 = vpop.f32.mrf.mxu3 }
 0x82a   : > { %v3691_v52 = vmul.f32 %v3688_v0, %v3666_v32  ;;  %v3865_v32 = vld [vmem:[%s9569_s7 + $0x1a0] sm:$0xff]  ;;  %v3864_v0 = vld [vmem:[%s9569_s7 + $0x198] sm:$0xff] }
 0x82b   : > { %4030 = vmatpush.msrb.mxu0 %v3865_v32  ;;  %v4165_v32 = vld [vmem:[%s9569_s7 + $0x160] sm:$0xff] }
 0x82c   : > { %6639 = vmatmul.msk.f32.vlgmr.msra.gmra.mxu0 %vm470_vm5, %v3691_v52  ;;  %v3863_v52 = vld [vmem:[%s9569_s7 + $0x190] sm:$0xff] }
 0x82d   : > { %4031 = vmatpush.msrb.mxu0 %v3864_v0  ;;  %v4164_v0 = vld [vmem:[%s9569_s7 + $0x158] sm:$0xff] }
 0x82f   : > { %4032 = vmatpush.msrb.mxu0 %v3863_v52  ;;  %v4163_v52 = vld [vmem:[%s9569_s7 + $0x150] sm:$0xff] }
 0x831   : > { %v3855_v41 = vpop.f32.mrf.mxu3 }
 0x832   : > { %6650 = vmatpush.msk.msra.mxu2 %vm9572_vm1, %v3855_v41  ;;  %v3862_v41 = vld [vmem:[%s9569_s7 + $0x188] sm:$0xff] }
 0x833   : > { %4033 = vmatpush.msrb.mxu0 %v3862_v41  ;;  %v4162_v41 = vld [vmem:[%s9569_s7 + $0x148] sm:$0xff] }
 0x8a9   : > { %v3720_v53 = vpop.f32.mrf.mxu0 }
 0x8aa   : > { %v3724_v54 = vsel %vm9578_vm11, %v3720_v53, 0.0  ;;  %v3728_v55 = vmul.f32 %v3720_v53, %v3720_v53 }
 0x8ab   : > { %3725 = vadd.xlane.f32.xlu1 %v3724_v54  ;;  %v3860_v54 = vld [vmem:[%s9569_s7 + $0x178] sm:$0xff] }
 0x8ac   : > { %v3729_v57 = vsel %vm9578_vm11, %v3728_v55, 0.0  ;;  %v3859_v55 = vld [vmem:[%s9569_s7 + $0x170] sm:$0xff] }
 0x8b3   : > { %3730 = vadd.xlane.f32.xlu1 %v3729_v57  ;;  %v3858_v57 = vld [vmem:[%s9569_s7 + $0x168] sm:$0xff] }
 0x91e   : > { %v3726_v28 = vpop.xlane.xlu1 %3725 }
 0x91f   : > { %v3727_v58 = vmul.f32 %v3726_v28, %v8356_v24 }
 0x921   : > { %v3733_v1 = vmul.f32 %v3727_v58, %v3727_v58  ;;  %v3735_v6 = vsub.f32 %v3720_v53, %v3727_v58  ;;  %v3861_v53 = vld [vmem:[%s9569_s7 + $0x180] sm:$0xff] }
 0x922   : > { %4034 = vmatpush.msrb.mxu0 %v3861_v53  ;;  %v4161_v53 = vld [vmem:[%s9569_s7 + $0x140] sm:$0xff] }
 0x924   : > { %4035 = vmatpush.msrb.mxu0 %v3860_v54  ;;  %v4160_v54 = vld [vmem:[%s9569_s7 + $0x138] sm:$0xff] }
 0x926   : > { %v3731_v62 = vpop.xlane.xlu1 %3730  ;;  %4036 = vmatpush.msrb.mxu0 %v3859_v55  ;;  %v4159_v55 = vld [vmem:[%s9569_s7 + $0x130] sm:$0xff] }
 0x927   : > { %v3732_v33 = vmul.f32 %v3731_v62, %v8356_v24 }
 0x928   : > { %4037 = vmatpush.msrb.mxu0 %v3858_v57  ;;  %v4158_v57 = vld [vmem:[%s9569_s7 + $0x128] sm:$0xff] }
 0x929   : > { %v3734_v2 = vsub.f32 %v3732_v33, %v3733_v1 }
 0x92b   : > { %v3736_v3 = vadd.f32 1e-05, %v3734_v2 }
 0x92d   : > { %7157 = vrsqrt.f32 %v3736_v3  ;;  %vm3743_vm7 = vweird.f32 %v3736_v3 }
 0x933   : > { %v7158_v4 = vpop.eup %7157 }
 0x934   : > { %v3738_v37 = vmul.f32 %v7158_v4, %v3736_v3  ;;  %vm3744_vm6 = vweird.f32 %v7158_v4 }
 0x935   : > { %vm3745_vm8 = vmor %vm3743_vm7, %vm3744_vm6  ;;  %vm9577_vm6 = vcmask 48128  }
 0x936   : > { %v3739_v5 = vmul.f32 %v7158_v4, %v3738_v37  ;;  %6651 = vmatmul.msk.f32.vlgmr.msra.gmra.mxu2 %vm9577_vm6, %v3875_v18 }
 0x938   : > { %v3740_v59 = vmul.f32 0.5, %v3739_v5 }
 0x93a   : > { %v3741_v61 = vsub.f32 1.5, %v3740_v59  ;;  %v3885_v59 = vld [vmem:[%s9568_s6 + $0x20] sm:$0xff] }
 0x93c   : > { %v3742_v63 = vmul.f32 %v7158_v4, %v3741_v61 }
 0x93e   : > { %v3746_v8 = vsel %vm3745_vm8, %v7158_v4, %v3742_v63  ;;  %6652 = vmatmul.msk.f32.gmra.mxu2 %vm9577_vm6, %v3876_v25  ;;  %v3886_v4 = vld [vmem:[%s9568_s6 + $0x28] sm:$0xff]  ;;  %v3884_v63 = vld [vmem:[%s9568_s6 + $0x18] sm:$0xff] }
 0x93f   : > { %v3747_v9 = vmul.f32 %v3746_v8, %v3735_v6 }
 0x941   : > { %v3749_v10 = vmul.f32 %v7118_v7, %v3747_v9  ;;  %v3883_v7 = vld [vmem:[%s9568_s6 + $0x10] sm:$0xff]  ;;  %v3882_v9 = vld [vmem:[%s9568_s6 + $0x8] sm:$0xff] }
 0x943   : > { %v8675_v11 = vadd.f32 %v3749_v10, %v8240_v20 }
 0x945   : > { %v3752_v12 = vsel %vm9578_vm11, %v8675_v11, 0.0  ;;  %v3756_v14 = vmul.f32 %v8675_v11, %v8675_v11 }
 0x946   : > { %3753 = vadd.xlane.f32.xlu1 %v3752_v12  ;;  %6653 = vmatmul.msk.f32.gmra.mxu2 %vm9577_vm6, %v3877_v31  ;;  %v3881_v12 = vld [vmem:[%s9568_s6] sm:$0xff] }
 0x947   : > { %v3757_v16 = vsel %vm9578_vm11, %v3756_v14, 0.0 }
 0x94e   : > { %3758 = vadd.xlane.f32.xlu1 %v3757_v16  ;;  %6654 = vmatmul.msk.f32.gmra.mxu2 %vm9577_vm6, %v3878_v38 }
 0x956   : > { %6655 = vmatmul.msk.f32.gmra.mxu2 %vm9577_vm6, %v3879_v45 }
 0x95e   : > { %6656 = vmatmul.msk.f32.gmra.mxu2 %vm9577_vm6, %v3880_v46 }
 0x9b9   : > { %v3754_v15 = vpop.xlane.xlu1 %3753 }
 0x9ba   : > { %v3755_v17 = vmul.f32 %v3754_v15, %v8356_v24 }
 0x9bc   : > { %v3761_v19 = vmul.f32 %v3755_v17, %v3755_v17  ;;  %v3763_v40 = vsub.f32 %v8675_v11, %v3755_v17 }
 0x9c1   : > { %v3759_v20 = vpop.xlane.xlu1 %3758 }
 0x9c2   : > { %v3760_v21 = vmul.f32 %v3759_v20, %v8356_v24  ;;  %v3892_v20 = vld [vmem:[%s9567_s5 + $0x2a8] sm:$0xff] }
 0x9c4   : > { %v3762_v22 = vsub.f32 %v3760_v21, %v3761_v19  ;;  %v3978_v19 = vpop.f32.mrf.mxu2 }
 0x9c6   : > { %v3764_v23 = vadd.f32 1e-05, %v3762_v22 }
 0x9c8   : > { %7159 = vrsqrt.f32 %v3764_v23  ;;  %vm3771_vm8 = vweird.f32 %v3764_v23 }
 0x9cc   : > { %v3981_v21 = vpop.f32.mrf.mxu2 }
 0x9ce   : > { %v7160_v30 = vpop.eup %7159 }
 0x9cf   : > { %v3766_v34 = vmul.f32 %v7160_v30, %v3764_v23  ;;  %vm3772_vm7 = vweird.f32 %v7160_v30 }
 0x9d0   : > { %vm3773_vm1 = vmor %vm3771_vm8, %vm3772_vm7  ;;  %vm9573_vm7 = vcmask 389120   ;;  %vm9575_vm8 = vcmask 392192  }
 0x9d1   : > { %v3767_v35 = vmul.f32 %v7160_v30, %v3766_v34  ;;  %v3889_v34 = vld [vmem:[%s9567_s5 + $0x290] sm:$0xff] }
 0x9d3   : > { %v3768_v26 = vmul.f32 0.5, %v3767_v35 }
 0x9d4   : > { %v3984_v22 = vpop.f32.mrf.mxu2 }
 0x9d5   : > { %v3769_v36 = vsub.f32 1.5, %v3768_v26  ;;  %v3888_v26 = vld [vmem:[%s9567_s5 + $0x288] sm:$0xff] }
 0x9d7   : > { %v3770_v39 = vmul.f32 %v7160_v30, %v3769_v36  ;;  %v3887_v36 = vld [vmem:[%s9567_s5 + $0x280] sm:$0xff] }
 0x9d9   : > { %v3774_v29 = vsel %vm3773_vm1, %v7160_v30, %v3770_v39  ;;  %vm9576_vm1 = vcmask 61440   ;;  %v3891_v30 = vld [vmem:[%s9567_s5 + $0x2a0] sm:$0xff] }
 0x9da   : > { %v3775_v43 = vmul.f32 %v3774_v29, %v3763_v40  ;;  %v3998_v29 = vmul.f32 %v3984_v22, %v3883_v7 }
 0x9dc   : > { %v3777_v44 = vmul.f32 %v7119_v42, %v3775_v43  ;;  %v3987_v23 = vpop.f32.mrf.mxu2  ;;  %v3997_v43 = vmul.f32 %v3981_v21, %v3882_v9 }
 0x9dd   : > { %v3999_v42 = vmul.f32 %v3987_v23, %v3884_v63 }
 0x9de   : > { %6640 = vmatmul.msk.f32.vlgmr.msrb.gmra.mxu1 %vm387_vm0, %v3777_v44  ;;  %v3996_v44 = vmul.f32 %v3978_v19, %v3881_v12 }
 0x9df   : > { %4166 = vmatpush.msrb.mxu1 %v4165_v32  ;;  %v7210_v32 = vld [vmem:[%s9567_s5 + $0x240] sm:$0xff] }
 0x9e1   : > { %4167 = vmatpush.msrb.mxu1 %v4164_v0 }
 0x9e3   : > { %4168 = vmatpush.msrb.mxu1 %v4163_v52 }
 0x9e5   : > { %4169 = vmatpush.msrb.mxu1 %v4162_v41  ;;  %v7211_v41 = vld [vmem:[%s9567_s5 + $0x238] sm:$0xff] }
 0x9e6   : > { %6644 = vmatmul.msk.f32.vlgmr.msra.gmra.mxu1 %vm9577_vm6, %v3875_v18 }
 0x9e7   : > { %4170 = vmatpush.msrb.mxu1 %v4161_v53 }
 0x9e9   : > { %4171 = vmatpush.msrb.mxu1 %v4160_v54  ;;  %v7212_v54 = vld [vmem:[%s9567_s5 + $0x230] sm:$0xff] }
 0x9eb   : > { %4172 = vmatpush.msrb.mxu1 %v4159_v55 }
 0x9ed   : > { %4173 = vmatpush.msrb.mxu1 %v4158_v57  ;;  %v7213_v57 = vld [vmem:[%s9567_s5 + $0x228] sm:$0xff] }
 0x9ee   : > { %6645 = vmatmul.msk.f32.gmra.mxu1 %vm9577_vm6, %v3876_v25  ;;  %v3990_v25 = vpop.f32.mrf.mxu2 }
 0x9ef   : > { %v4000_v40 = vmul.f32 %v3990_v25, %v3885_v59 }
 0x9f6   : > { %6646 = vmatmul.msk.f32.gmra.mxu1 %vm9577_vm6, %v3877_v31  ;;  %v3890_v31 = vld [vmem:[%s9567_s5 + $0x298] sm:$0xff]  ;;  %v3993_v35 = vpop.f32.mrf.mxu2 }
 0x9f7   : > { %v4001_v39 = vmul.f32 %v3993_v35, %v3886_v4 }
 0x9fe   : > { %6647 = vmatmul.msk.f32.gmra.mxu1 %vm9577_vm6, %v3878_v38  ;;  %v3874_v38 = vld [vmem:[%s9570_s8 + $0x60] sm:$0xff] }
 0x9ff   : > { %4101 = vmatpush.msra.mxu0 %v3874_v38 }
 0xa06   : > { %6648 = vmatmul.msk.f32.gmra.mxu1 %vm9577_vm6, %v3879_v45 }
 0xa0e   : > { %6649 = vmatmul.msk.f32.gmra.mxu1 %vm9577_vm6, %v3880_v46 }
 0xa5b   : > { %v3802_v28 = vpop.f32.mrf.mxu1 }
 0xa5c   : > { %v3805_v58 = vmul.f32 0.5, %v3802_v28  ;;  %v4157_v28 = vld [vmem:[%s9569_s7 + $0x120] sm:$0xff] }
 0xa5d   : > { %4174 = vmatpush.msrb.mxu1 %v4157_v28  ;;  %v7214_v28 = vld [vmem:[%s9567_s5 + $0x220] sm:$0xff] }
 0xa5e   : > { %4038 = vmatmul.f32.vlgmr.msrb.gmra.mxu0 %v3805_v58 }
 0xa5f   : > { %4144 = vmatpush.msrb.mxu0 %v3893_v51 }
 0xa63   : > { %v3934_v62 = vpop.f32.mrf.mxu1 }
 0xa64   : > { %v3952_v14 = vmul.f32 %v3934_v62, %v3881_v12  ;;  %v4155_v62 = vld [vmem:[%s9569_s7 + $0x110] sm:$0xff] }
 0xa6b   : > { %v3937_v1 = vpop.f32.mrf.mxu1 }
 0xa6c   : > { %v3953_v10 = vmul.f32 %v3937_v1, %v3882_v9  ;;  %v4154_v1 = vld [vmem:[%s9569_s7 + $0x108] sm:$0xff] }
 0xa73   : > { %v3940_v33 = vpop.f32.mrf.mxu1 }
 0xa74   : > { %v3954_v8 = vmul.f32 %v3940_v33, %v3883_v7 }
 0xa7b   : > { %v3943_v2 = vpop.f32.mrf.mxu1 }
 0xa7c   : > { %v3955_v6 = vmul.f32 %v3943_v2, %v3884_v63  ;;  %v4153_v2 = vld [vmem:[%s9569_s7 + $0x100] sm:$0xff] }
 0xa83   : > { %v3946_v3 = vpop.f32.mrf.mxu1 }
 0xa84   : > { %v3956_v61 = vmul.f32 %v3946_v3, %v3885_v59  ;;  %v4150_v59 = vld [vmem:[%s9569_s7 + $0xe8] sm:$0xff] }
 0xa8b   : > { %v3949_v37 = vpop.f32.mrf.mxu1 }
 0xa8c   : > { %v3957_v5 = vmul.f32 %v3949_v37, %v3886_v4  ;;  %v4152_v4 = vld [vmem:[%s9569_s7 + $0xf8] sm:$0xff] }
 0xa8e   : > { %4012 = vmatpush.xpose.msra.mxu3 %v3957_v5  ;;  %v4151_v5 = vld [vmem:[%s9569_s7 + $0xf0] sm:$0xff] }
 0xa92   : > { %4013 = vmatpush.xpose.msra.mxu3 %v3956_v61 }
 0xa96   : > { %4014 = vmatpush.xpose.msra.mxu3 %v3955_v6 }
 0xa9a   : > { %4015 = vmatpush.xpose.msra.mxu3 %v3954_v8 }
 0xa9e   : > { %4016 = vmatpush.xpose.msra.mxu3 %v3953_v10 }
 0xaa2   : > { %4017 = vmatpush.xpose.msra.mxu3 %v3952_v14 }
 0xaa5   : > { %4018 = vmatmul.f32.vlgmr.msra.gmra.mxu3 %v3805_v58  ;;  %v4156_v58 = vld [vmem:[%s9569_s7 + $0x118] sm:$0xff] }
 0xaa6   : > { %4071 = vmatpush.msrb.mxu3 %v3892_v20  ;;  %4175 = vmatpush.msrb.mxu1 %v4156_v58  ;;  %v7215_v58 = vld [vmem:[%s9567_s5 + $0x218] sm:$0xff] }
 0xaa8   : > { %4072 = vmatpush.msrb.mxu3 %v3891_v30  ;;  %4176 = vmatpush.msrb.mxu1 %v4155_v62  ;;  %v7216_v62 = vld [vmem:[%s9567_s5 + $0x210] sm:$0xff] }
 0xaaa   : > { %4073 = vmatpush.msrb.mxu3 %v3890_v31  ;;  %4177 = vmatpush.msrb.mxu1 %v4154_v1 }
 0xaac   : > { %4074 = vmatpush.msrb.mxu3 %v3889_v34  ;;  %4178 = vmatpush.msrb.mxu1 %v4153_v2 }
 0xaae   : > { %4075 = vmatpush.msrb.mxu3 %v3888_v26  ;;  %4179 = vmatpush.msrb.mxu1 %v4152_v4  ;;  %v7120_v26 = vld [vmem:[%s9569_s7 + $0xe0] ss:$0 sm:$0xff] }
 0xab0   : > { %4076 = vmatpush.msrb.mxu3 %v3887_v36  ;;  %4180 = vmatpush.msrb.mxu1 %v4151_v5 }
 0xab2   : > { %4116 = vmatpush.msra.mxu3 %v4001_v39  ;;  %4181 = vmatpush.msrb.mxu1 %v4150_v59  ;;  %v7121_v59 = vld [vmem:[%s9569_s7 + $0x1e8] ss:$0 sm:$0xff] }
 0xab4   : > { %4117 = vmatpush.msra.mxu3 %v4000_v40 }
 0xab6   : > { %4118 = vmatpush.msra.mxu3 %v3999_v42 }
 0xab8   : > { %4119 = vmatpush.msra.mxu3 %v3998_v29 }
 0xaba   : > { %4120 = vmatpush.msra.mxu3 %v3997_v43 }
 0xabc   : > { %4121 = vmatpush.msra.mxu3 %v3996_v44  ;;  %v4244_v44 = vld [vmem:[%s9570_s8 + $0x80] sm:$0xff] }
 0xabd   : > { %4260 = vmatpush.msrb.mxu2 %v4244_v44 }
 0xadb   : > { %v4039_v16 = vpop.f32.mrf.mxu0 }
 0xadc   : > { %v4047_v15 = vsel %vm9576_vm1, %v4039_v16, -inf }
 0xadd   : > { %4048 = vmax.xlane.f32.xlu0 %v4047_v15 }
 0xb28   : > { %v4019_v17 = vpop.f32.mrf.mxu3 }
 0xb29   : > { %v4043_v18 = vsel %vm9573_vm7, %v4019_v17, -inf  ;;  %vm9574_vm7 = vcmask 64512  }
 0xb2a   : > { %4044 = vmax.xlane.f32.xlu2 %v4043_v18 }
 0xb50   : > { %v4049_v45 = vpop.xlane.xlu0 %4048 }
 0xb9d   : > { %v4045_v46 = vpop.xlane.xlu2 %4044 }
 0xb9e   : > { %v4050_v47 = vmax.f32 %v4045_v46, %v4049_v45  ;;  %v4271_v45 = vld [vmem:[%s9570_s8 + $0xa0] sm:$0xff]  ;;  %v4270_v46 = vld [vmem:[%s9570_s8 + $0x98] sm:$0xff] }
 0xba0   : > { %v4051_v48 = vsub.f32 %v4019_v17, %v4050_v47  ;;  %v4054_v49 = vsub.f32 %v4039_v16, %v4050_v47  ;;  %v4242_v47 = vld [vmem:[%s9570_s8 + $0x70] sm:$0xff] }
 0xba2   : > { %v4052_v27 = vmul.f32 1.442695, %v4051_v48  ;;  %v4055_v56 = vmul.f32 1.442695, %v4054_v49  ;;  %v4269_v48 = vld [vmem:[%s9570_s8 + $0x90] sm:$0xff]  ;;  %v4241_v49 = vld [vmem:[%s9570_s8 + $0x68] sm:$0xff] }
 0xba4   : > { %7161 = vpow2.f32 %v4052_v27  ;;  %v4268_v27 = vld [vmem:[%s9570_s8 + $0x88] sm:$0xff] }
 0xba5   : > { %7163 = vpow2.f32 %v4055_v56 }
 0xbaa   : > { %v7162_v50 = vpop.eup %7161 }
 0xbab   : > { %v7164_v60 = vpop.eup %7163  ;;  %6657 = vmatmul.msk.f32.vlgmr.msrb.gmra.mxu3 %vm9575_vm8, %v7162_v50 }
 0xbac   : > { %6658 = vmatmul.msk.f32.vlgmr.msra.gmra.mxu0 %vm9574_vm7, %v7164_v60  ;;  %4284 = vmatpush.msrb.mxu3 %v4271_v45 }
 0xbae   : > { %4285 = vmatpush.msrb.mxu3 %v4270_v46 }
 0xbb0   : > { %4286 = vmatpush.msrb.mxu3 %v4269_v48 }
 0xbb2   : > { %4287 = vmatpush.msrb.mxu3 %v4268_v27 }
 0xbb3   : > { %6659 = vmatmul.msk.f32.vlgmr.msra.gmra.mxu3 %vm9575_vm8, %v7162_v50  ;;  %v7209_v50 = vld [vmem:[%s9567_s5 + $0x248] sm:$0xff] }
 0xbb4   : > { %4440 = vmatpush.msra.mxu3 %v7209_v50 }
 0xbb6   : > { %4441 = vmatpush.msra.mxu3 %v7210_v32  ;;  %v6667_v32 = vld [vmem:[%s9569_s7 + $0x298] sm:$0xff] }
 0xbb7   : > { %4396 = vmatpush.msra.mxu1 %v6667_v32  ;;  %v6680_v32 = vld [vmem:[%s9569_s7 + $0x308] sm:$0xff] }
 0xbb8   : > { %4442 = vmatpush.msra.mxu3 %v7211_v41  ;;  %v6665_v41 = vld [vmem:[%s9569_s7 + $0x288] sm:$0xff] }
 0xbba   : > { %4443 = vmatpush.msra.mxu3 %v7212_v54  ;;  %v6664_v54 = vld [vmem:[%s9569_s7 + $0x280] sm:$0xff] }
 0xbbc   : > { %4444 = vmatpush.msra.mxu3 %v7213_v57 }
 0xbbe   : > { %4445 = vmatpush.msra.mxu3 %v7214_v28  ;;  %v7217_v28 = vld [vmem:[%s9567_s5 + $0x208] sm:$0xff] }
 0xbc0   : > { %4446 = vmatpush.msra.mxu3 %v7215_v58  ;;  %v9020_v58 = vld [vmem:[%s9567_s5 + $0x1f8] sm:$0xf] }
 0xbc2   : > { %4447 = vmatpush.msra.mxu3 %v7216_v62 }
 0xc29   : > { %v4103_v61 = vpop.f32.mrf.mxu0 }
 0xc2e   : > { %v4078_v33 = vpop.f32.mrf.mxu3 }
 0xc2f   : > { %v4079_v3 = vadd.f32 %v7164_v60, %v4078_v33 }
 0xc31   : > { %7165 = vrcp.f32 %v4079_v3 }
 0xc36   : > { %v4123_v63 = vpop.f32.mrf.mxu3 }
 0xc37   : > { %v7166_v37 = vpop.eup %7165  ;;  %v4124_v6 = vadd.f32 %v4123_v63, %v4103_v61 }
 0xc38   : > { %6660 = vmatmul.msk.f32.vlgmr.msrb.gmra.mxu0 %vm9574_vm7, %v7166_v37 }
 0xcb5   : > { %v4146_v7 = vpop.f32.mrf.mxu0 }
 0xcb6   : > { %v4149_v8 = vmul.f32 %v4146_v7, %v4124_v6  ;;  %v4328_v7 = vld [vmem:[%s9569_s7 + $0x268] sm:$0xff] }
 0xcb7   : > { %4329 = vmatpush.msra.mxu0 %v4328_v7 }
 0xcb8   : > { %4182 = vmatmul.f32.vlgmr.msrb.gmra.mxu1 %v4149_v8  ;;  %v4327_v8 = vld [vmem:[%s9569_s7 + $0x260] sm:$0xff] }
 0xcb9   : > { %4330 = vmatpush.msra.mxu0 %v4327_v8 }
 0xd35   : > { %v4183_v9 = vpop.f32.mrf.mxu1 }
 0xd36   : > { %v4187_v10 = vsel %vm9578_vm11, %v4183_v9, 0.0  ;;  %v4191_v12 = vmul.f32 %v4183_v9, %v4183_v9 }
 0xd37   : > { %4188 = vadd.xlane.f32.xlu1 %v4187_v10  ;;  %v4325_v10 = vld [vmem:[%s9569_s7 + $0x250] sm:$0xff] }
 0xd38   : > { %v4192_v14 = vsel %vm9578_vm11, %v4191_v12, 0.0  ;;  %v4324_v12 = vld [vmem:[%s9569_s7 + $0x248] sm:$0xff] }
 0xd39   : > { %4193 = vadd.xlane.f32.xlu2 %v4192_v14  ;;  %v4323_v14 = vld [vmem:[%s9569_s7 + $0x240] sm:$0xff] }
 0xdaa   : > { %v4189_v16 = vpop.xlane.xlu1 %4188 }
 0xdab   : > { %v4190_v15 = vmul.f32 %v4189_v16, %v8356_v24  ;;  %v4322_v16 = vld [vmem:[%s9569_s7 + $0x238] sm:$0xff] }
 0xdac   : > { %v4194_v17 = vpop.xlane.xlu2 %4193 }
 0xdad   : > { %v4196_v18 = vmul.f32 %v4190_v15, %v4190_v15  ;;  %v4195_v20 = vmul.f32 %v4194_v17, %v8356_v24  ;;  %v4198_v35 = vsub.f32 %v4183_v9, %v4190_v15  ;;  %v4326_v9 = vld [vmem:[%s9569_s7 + $0x258] sm:$0xff]  ;;  %v4321_v15 = vld [vmem:[%s9569_s7 + $0x230] sm:$0xff]  ;;  %v4320_v17 = vld [vmem:[%s9569_s7 + $0x228] sm:$0xff] }
 0xdae   : > { %4331 = vmatpush.msra.mxu0 %v4326_v9  ;;  %v7122_v9 = vld [vmem:[%s9569_s7 + $0x270] ss:$0 sm:$0xff] }
 0xdaf   : > { %v4197_v19 = vsub.f32 %v4195_v20, %v4196_v18  ;;  %v4319_v18 = vld [vmem:[%s9569_s7 + $0x220] sm:$0xff]  ;;  %v4318_v20 = vld [vmem:[%s9569_s7 + $0x218] sm:$0xff] }
 0xdb0   : > { %4332 = vmatpush.msra.mxu0 %v4325_v10 }
 0xdb1   : > { %v4199_v21 = vadd.f32 1e-05, %v4197_v19  ;;  %v4317_v19 = vld [vmem:[%s9569_s7 + $0x210] sm:$0xff] }
 0xdb2   : > { %4333 = vmatpush.msra.mxu0 %v4324_v12 }
 0xdb3   : > { %7167 = vrsqrt.f32 %v4199_v21  ;;  %vm4206_vm8 = vweird.f32 %v4199_v21 }
 0xdb4   : > { %4334 = vmatpush.msra.mxu0 %v4323_v14 }
 0xdb6   : > { %4335 = vmatpush.msra.mxu0 %v4322_v16 }
 0xdb8   : > { %4336 = vmatpush.msra.mxu0 %v4321_v15 }
 0xdb9   : > { %v7168_v22 = vpop.eup %7167 }
 0xdba   : > { %v4201_v23 = vmul.f32 %v7168_v22, %v4199_v21  ;;  %vm4207_vm7 = vweird.f32 %v7168_v22  ;;  %4337 = vmatpush.msra.mxu0 %v4320_v17  ;;  %v4316_v21 = vld [vmem:[%s9569_s7 + $0x208] sm:$0xff] }
 0xdbb   : > { %vm4208_vm1 = vmor %vm4206_vm8, %vm4207_vm7 }
 0xdbc   : > { %v4202_v25 = vmul.f32 %v7168_v22, %v4201_v23  ;;  %4338 = vmatpush.msra.mxu0 %v4319_v18 }
 0xdbe   : > { %v4203_v30 = vmul.f32 0.5, %v4202_v25  ;;  %4339 = vmatpush.msra.mxu0 %v4318_v20  ;;  %v4314_v25 = vld [vmem:[%s9569_s7 + $0x1f8] sm:$0xff] }
 0xdc0   : > { %v4204_v31 = vsub.f32 1.5, %v4203_v30  ;;  %4340 = vmatpush.msra.mxu0 %v4317_v19 }
 0xdc2   : > { %v4205_v34 = vmul.f32 %v7168_v22, %v4204_v31  ;;  %4341 = vmatpush.msra.mxu0 %v4316_v21  ;;  %v4313_v31 = vld [vmem:[%s9569_s7 + $0x1f0] sm:$0xff] }
 0xdc4   : > { %v4209_v36 = vsel %vm4208_vm1, %v7168_v22, %v4205_v34  ;;  %v4315_v22 = vld [vmem:[%s9569_s7 + $0x200] sm:$0xff] }
 0xdc5   : > { %v4210_v38 = vmul.f32 %v4209_v36, %v4198_v35  ;;  %4342 = vmatpush.msra.mxu0 %v4315_v22  ;;  %v6686_v22 = vld [vmem:[%s9569_s7 + $0x338] sm:$0xff] }
 0xdc7   : > { %v4212_v39 = vmul.f32 %v7120_v26, %v4210_v38  ;;  %4343 = vmatpush.msra.mxu0 %v4314_v25  ;;  %v6684_v25 = vld [vmem:[%s9569_s7 + $0x328] sm:$0xff] }
 0xdc9   : > { %v8871_v40 = vadd.f32 %v4212_v39, %v8675_v11  ;;  %v4243_v11 = vld [vmem:[%s9570_s8 + $0x78] sm:$0xff]  ;;  %4344 = vmatpush.msra.mxu0 %v4313_v31 }
 0xdca   : > { %4261 = vmatpush.msrb.mxu2 %v4243_v11 }
 0xdcb   : > { %v4215_v42 = vsel %vm9578_vm11, %v8871_v40, 0.0  ;;  %v4219_v29 = vmul.f32 %v8871_v40, %v8871_v40  ;;  %4666 = vmatpush.msrb.mxu0 %v6686_v22 }
 0xdcc   : > { %4216 = vadd.xlane.f32.xlu0 %v4215_v42  ;;  %4262 = vmatpush.msrb.mxu2 %v4242_v47 }
 0xdcd   : > { %v4220_v43 = vsel %vm9578_vm11, %v4219_v29, 0.0 }
 0xdce   : > { %4221 = vadd.xlane.f32.xlu1 %v4220_v43  ;;  %4263 = vmatpush.msrb.mxu2 %v4241_v49 }
 0xe3f   : > { %v4217_v56 = vpop.xlane.xlu0 %4216 }
 0xe40   : > { %v4218_v60 = vmul.f32 %v4217_v56, %v8356_v24 }
 0xe41   : > { %v4222_v51 = vpop.xlane.xlu1 %4221 }
 0xe42   : > { %v4224_v0 = vmul.f32 %v4218_v60, %v4218_v60  ;;  %v4223_v52 = vmul.f32 %v4222_v51, %v8356_v24  ;;  %v4226_v5 = vsub.f32 %v8871_v40, %v4218_v60 }
 0xe44   : > { %v4225_v53 = vsub.f32 %v4223_v52, %v4224_v0  ;;  %v6672_v0 = vld [vmem:[%s9569_s7 + $0x2b8] sm:$0xff]  ;;  %v6671_v52 = vld [vmem:[%s9569_s7 + $0x2b0] sm:$0xff] }
 0xe45   : > { %4420 = vmatpush.msra.mxu2 %v6672_v0  ;;  %v6679_v0 = vld [vmem:[%s9569_s7 + $0x300] sm:$0xff] }
 0xe46   : > { %v4227_v55 = vadd.f32 1e-05, %v4225_v53  ;;  %v6670_v53 = vld [vmem:[%s9569_s7 + $0x2a8] sm:$0xff] }
 0xe47   : > { %4421 = vmatpush.msra.mxu2 %v6671_v52 }
 0xe48   : > { %7169 = vrsqrt.f32 %v4227_v55  ;;  %vm4234_vm7 = vweird.f32 %v4227_v55 }
 0xe49   : > { %4422 = vmatpush.msra.mxu2 %v6670_v53 }
 0xe4e   : > { %v7170_v1 = vpop.eup %7169 }
 0xe4f   : > { %v4229_v33 = vmul.f32 %v7170_v1, %v4227_v55  ;;  %vm4235_vm1 = vweird.f32 %v7170_v1  ;;  %v6669_v55 = vld [vmem:[%s9569_s7 + $0x2a0] sm:$0xff] }
 0xe50   : > { %vm4236_vm8 = vmor %vm4234_vm7, %vm4235_vm1  ;;  %4423 = vmatpush.msra.mxu2 %v6669_v55 }
 0xe51   : > { %v4230_v2 = vmul.f32 %v7170_v1, %v4229_v33  ;;  %v7219_v33 = vld [vmem:[%s9567_s5 + $0x200] sm:$0xff] }
 0xe53   : > { %v4231_v3 = vmul.f32 0.5, %v4230_v2 }
 0xe55   : > { %v4232_v4 = vsub.f32 1.5, %v4231_v3 }
 0xe57   : > { %v4233_v37 = vmul.f32 %v7170_v1, %v4232_v4 }
 0xe59   : > { %v4237_v61 = vsel %vm4236_vm8, %v7170_v1, %v4233_v37 }
 0xe5a   : > { %v4238_v63 = vmul.f32 %v4237_v61, %v4226_v5 }
 0xe5c   : > { %v4240_v6 = vmul.f32 %v7121_v59, %v4238_v63 }
 0xe5e   : > { %6661 = vmatmul.msk.f32.vlgmr.msrb.gmra.mxu2 %vm387_vm0, %v4240_v6  ;;  %6662 = vmatmul.msk.f32.vlgmr.msrb.gmra.mxu3 %vm387_vm0, %v4240_v6 }
 0xe5f   : > { %4522 = vmatpush.msrb.mxu2 %v7217_v28 }
 0xe61   : > { %4523 = vmatpush.msrb.mxu2 %v7219_v33 }
 0xee1   : > { %v4289_v23 = vpop.f32.mrf.mxu3  ;;  %v4265_v48 = vpop.f32.mrf.mxu2 }
 0xee2   : > { %v4292_v30 = vsub.f32 0.0, %v4289_v23 }
 0xee4   : > { %v4293_v34 = vmul.f32 1.442695, %v4292_v30 }
 0xee6   : > { %7171 = vpow2.f32 %v4293_v34 }
 0xeec   : > { %v7172_v35 = vpop.eup %7171 }
 0xeed   : > { %v4295_v26 = vadd.f32 1.0, %v7172_v35 }
 0xeef   : > { %7173 = vrcp.f32 %v4295_v26  ;;  %v4307_v42 = vand.u32 2147483648, %v4295_v26  ;;  %v4305_v43 = vand.u32 2147483647, %v4295_v26  ;;  %vm4301_vm7 = vweird.f32 %v4295_v26 }
 0xef1   : > { %v4308_v45 = vor.u32 1.1754944e-38, %v4307_v42  ;;  %vm4306_vm6 = vcmp.eq.f32.partialorder %v4305_v43, 8.507059e+37 }
 0xef5   : > { %v7174_v36 = vpop.eup %7173 }
 0xef6   : > { %v4297_v38 = vmul.f32 %v7174_v36, %v4295_v26  ;;  %vm4302_vm1 = vweird.f32 %v7174_v36  ;;  %v6683_v26 = vld [vmem:[%s9569_s7 + $0x320] sm:$0xff] }
 0xef7   : > { %vm4303_vm8 = vmor %vm4301_vm7, %vm4302_vm1 }
 0xef8   : > { %v4298_v39 = vsub.f32 1.0, %v4297_v38  ;;  %v6682_v38 = vld [vmem:[%s9569_s7 + $0x318] sm:$0xff] }
 0xefa   : > { %v4299_v29 = vmul.f32 %v7174_v36, %v4298_v39 }
 0xefc   : > { %v4300_v44 = vadd.f32 %v7174_v36, %v4299_v29 }
 0xefe   : > { %v4304_v11 = vsel %vm4303_vm8, %v7174_v36, %v4300_v44 }
 0xeff   : > { %v4309_v46 = vsel %vm4306_vm6, %v4308_v45, %v4304_v11 }
 0xf00   : > { %v4311_v47 = vmul.f32 %v4309_v46, %v4289_v23  ;;  %v6685_v23 = vld [vmem:[%s9569_s7 + $0x330] sm:$0xff] }
 0xf01   : > { %4667 = vmatpush.msrb.mxu0 %v6685_v23  ;;  %v6728_v23 = vld [vmem:[%s9570_s8 + $0xe0] sm:$0xff] }
 0xf02   : > { %v4312_v49 = vmul.f32 %v4311_v47, %v4265_v48 }
 0xf03   : > { %4668 = vmatpush.msrb.mxu0 %v6684_v25  ;;  %v6727_v25 = vld [vmem:[%s9570_s8 + $0xd8] sm:$0xff] }
 0xf04   : > { %4345 = vmatmul.f32.vlgmr.msra.gmra.mxu0 %v4312_v49 }
 0xf05   : > { %4669 = vmatpush.msrb.mxu0 %v6683_v26 }
 0xf07   : > { %4670 = vmatpush.msrb.mxu0 %v6682_v38 }
 0xf81   : > { %v4346_v27 = vpop.f32.mrf.mxu0 }
 0xf82   : > { %v8983_v56 = vadd.f32 %v4346_v27, %v8871_v40  ;;  %v6666_v40 = vld [vmem:[%s9569_s7 + $0x290] sm:$0xff] }
 0xf83   : > { %4397 = vmatpush.msra.mxu1 %v6666_v40 }
 0xf84   : > { %v4351_v50 = vsel %vm9578_vm11, %v8983_v56, 0.0  ;;  %v4355_v60 = vmul.f32 %v8983_v56, %v8983_v56 }
 0xf85   : > { %4352 = vadd.xlane.f32.xlu2 %v4351_v50  ;;  %4398 = vmatpush.msra.mxu1 %v6665_v41 }
 0xf86   : > { %v4356_v51 = vsel %vm9578_vm11, %v4355_v60, 0.0 }
 0xf87   : > { %4357 = vadd.xlane.f32.xlu0 %v4356_v51  ;;  %4399 = vmatpush.msra.mxu1 %v6664_v54  ;;  %v6681_v51 = vld [vmem:[%s9569_s7 + $0x310] sm:$0xff] }
 0xf88   : > { %4671 = vmatpush.msrb.mxu0 %v6681_v51  ;;  %v7220_v54 = vld [vmem:[%s9567_s5 + $0x1b0] sm:$0xff]  ;;  %v6714_v51 = vld [vmem:[%s9569_s7 + $0x2e8] sm:$0xff] }
 0xf89   : > { %6675 = vmatpush.msk.msrb.mxu1 %vm3190_vm10, %v9020_v58 }
 0xf8a   : > { %4672 = vmatpush.msrb.mxu0 %v6680_v32  ;;  %v6713_v32 = vld [vmem:[%s9569_s7 + $0x2e0] sm:$0xff] }
 0xf8c   : > { %4673 = vmatpush.msrb.mxu0 %v6679_v0  ;;  %v6712_v0 = vld [vmem:[%s9569_s7 + $0x2d8] sm:$0xff] }
 0xf8e   : > { %6707 = vmatpush.msk.msra.mxu0 %vm3190_vm10, %v9020_v58 }
 0xff8   : > { %v4353_v57 = vpop.xlane.xlu2 %4352 }
 0xff9   : > { %v4354_v62 = vmul.f32 %v4353_v57, %v8356_v24  ;;  %v7221_v57 = vld [vmem:[%s9567_s5 + $0x1b8] sm:$0xff] }
 0xffa   : > { %v4358_v1 = vpop.xlane.xlu0 %4357 }
 0xffb   : > { %v4360_v2 = vmul.f32 %v4354_v62, %v4354_v62  ;;  %v4359_v3 = vmul.f32 %v4358_v1, %v8356_v24  ;;  %v4362_v8 = vsub.f32 %v8983_v56, %v4354_v62  ;;  %v7223_v62 = vld [vmem:[%s9567_s5 + $0x1a8] sm:$0x1f] }
 0xffd   : > { %v4361_v4 = vsub.f32 %v4359_v3, %v4360_v2 }
 0xfff   : > { %v4363_v37 = vadd.f32 1e-05, %v4361_v4 }
0x1001   : > { %7175 = vrsqrt.f32 %v4363_v37  ;;  %vm4370_vm1 = vweird.f32 %v4363_v37 }
0x1007   : > { %v7176_v5 = vpop.eup %7175 }
0x1008   : > { %v4365_v59 = vmul.f32 %v7176_v5, %v4363_v37  ;;  %vm4371_vm6 = vweird.f32 %v7176_v5  ;;  %v7224_v37 = vld [vmem:[%s9567_s5 + $0x1d8] sm:$0xf] }
0x1009   : > { %vm4372_vm7 = vmor %vm4370_vm1, %vm4371_vm6 }
0x100a   : > { %v4366_v61 = vmul.f32 %v7176_v5, %v4365_v59  ;;  %v7225_v59 = vld [vmem:[%s9567_s5 + $0x1d0] sm:$0xff] }
0x100c   : > { %v4367_v63 = vmul.f32 0.5, %v4366_v61 }
0x100e   : > { %v4368_v6 = vsub.f32 1.5, %v4367_v63  ;;  %v7226_v63 = vld [vmem:[%s9567_s5 + $0x1c8] sm:$0xff] }
0x1010   : > { %v4369_v7 = vmul.f32 %v7176_v5, %v4368_v6 }
0x1012   : > { %v4373_v10 = vsel %vm4372_vm7, %v7176_v5, %v4369_v7  ;;  %v7227_v7 = vld [vmem:[%s9567_s5 + $0x1f0] sm:$0xf] }
0x1013   : > { %v4374_v12 = vmul.f32 %v4373_v10, %v4362_v8  ;;  %v7228_v8 = vld [vmem:[%s9567_s5 + $0x1e8] sm:$0xff] }
0x1015   : > { %v4376_v14 = vmul.f32 %v7122_v9, %v4374_v12  ;;  %v7229_v9 = vld [vmem:[%s9567_s5 + $0x1e0] sm:$0xff] }
0x1016   : > { %v7230_v12 = vld [vmem:[%s9567_s5 + $0x1a0] sm:$0x1f] }
0x1017   : > { %6668 = vmatmul.msk.f32.vlgmr.msra.gmra.mxu1 %vm387_vm0, %v4376_v14  ;;  %6673 = vmatmul.msk.f32.vlgmr.msra.gmra.mxu2 %vm387_vm0, %v4376_v14 }
0x1018   : > { %4547 = vmatpush.msra.mxu1 %v7217_v28  ;;  %v7222_v28 = vld [vmem:[%s9567_s5 + $0x1c0] sm:$0xf] }
0x101a   : > { %4548 = vmatpush.msra.mxu1 %v7219_v33 }
0x1094   : > { %v4401_v16 = vpop.f32.mrf.mxu1 }
0x1095   : > { %v4428_v15 = vmul.f32 %v4401_v16, %v4401_v16 }
0x1097   : > { %6674 = vmatmul.msk.f32.vlgmr.msra.gmra.mxu3 %vm470_vm5, %v4428_v15 }
0x109a   : > { %v4425_v17 = vpop.f32.mrf.mxu2 }
0x109b   : > { %4529 = vrot.lane.b32.xlu2 %v4425_v17, %s7316_s25  ;;  %v4488_v18 = vmul.f32 %v4425_v17, %v4425_v17  ;;  %s5482_s25 = scalar_lea.hbm %s9571_s9, %s7388_s13  ;;  %s7270_s13 = scalar_lea.hbm %s9571_s9, 2 }
0x109c   : > { %s5486_s24 = sshll.u32 %s5482_s25, 4  ;;  %s5487_s24 = int_to_ptr.hbm [resolvable:$true] %s5486_s24 }
0x109d   : > { %v4489_v20 = vsel %vm3362_vm3, %v4488_v18, 0.0  ;;  %s7264_s23 = sshra.s32 %s5487_s24, 4  ;;  %s7265_s23 = int_to_ptr.hbm [resolvable:$true] %s7264_s23 }
0x109e   : > { %4490 = vadd.xlane.f32.xlu1 %v4489_v20  ;;  %s7266_s26 = scalar_lea.hbm %s7265_s23, 1  ;;  %p7271_p0 = scmp.lt.s32.totalorder %s7265_s23, %s9571_s9 }
0x109f   : > { %p7267_p11 = scmp.ne.s32.totalorder %s7265_s23, %s7266_s26  ;;  %p7272_p1 = scmp.lt.s32.totalorder %s7270_s13, %s7266_s26 }
0x10a1   : > { %p7268_p12 = pnand %p7267_p11, %p7405_p5  ;;  %p7273_p2 = por %p7272_p1, %p7271_p0 }
0x10a3   : > { %p7269_p13 = pneg %p7268_p12 }
0x10a5   : > { %p7274_p3 = pnand %p7273_p2, %p7269_p13 }
0x10f5   : > { %v4530_v60 = vpop.permute.xlu2 %4529 }
0x1111   : > { %v4491_v19 = vpop.xlane.xlu1 %4490 }
0x1112   : > { %v4492_v21 = vmax.f32 %v4491_v19, 1e-24 }
0x1114   : > { %7177 = vrsqrt.f32 %v4492_v21  ;;  %vm4499_vm8 = vweird.f32 %v4492_v21 }
0x111a   : > { %v7178_v30 = vpop.eup %7177  ;;  %v4449_v31 = vpop.f32.mrf.mxu3 }
0x111b   : > { %v4494_v34 = vmul.f32 %v7178_v30, %v4492_v21  ;;  %v4452_v35 = vmax.f32 %v4449_v31, 1e-24  ;;  %vm4500_vm3 = vweird.f32 %v7178_v30  ;;  %v6687_v21 = vld [vmem:[%s9569_s7 + $0x340] sm:$0xf]  ;;  %v6725_v31 = vld [vmem:[%s9570_s8 + $0xc8] sm:$0xff] }
0x111c   : > { %vm4501_vm6 = vmor %vm4499_vm8, %vm4500_vm3 }
0x111d   : > { %v4495_v36 = vmul.f32 %v7178_v30, %v4494_v34  ;;  %7179 = vrsqrt.f32 %v4452_v35  ;;  %vm4459_vm7 = vweird.f32 %v4452_v35 }
0x111f   : > { %v4496_v39 = vmul.f32 0.5, %v4495_v36 }
0x1121   : > { %v4497_v42 = vsub.f32 1.5, %v4496_v39 }
0x1123   : > { %v7180_v29 = vpop.eup %7179  ;;  %v4498_v43 = vmul.f32 %v7178_v30, %v4497_v42 }
0x1124   : > { %v4454_v44 = vmul.f32 %v7180_v29, %v4452_v35  ;;  %vm4460_vm1 = vweird.f32 %v7180_v29 }
0x1125   : > { %v4502_v45 = vsel %vm4501_vm6, %v7178_v30, %v4498_v43  ;;  %vm4461_vm11 = vmor %vm4459_vm7, %vm4460_vm1  ;;  %v6726_v30 = vld [vmem:[%s9570_s8 + $0xd0] sm:$0xff] }
0x1126   : > { %v4503_v11 = vmul.f32 %v4502_v45, %v4425_v17  ;;  %v4455_v46 = vmul.f32 %v7180_v29, %v4454_v44  ;;  %v6723_v44 = vld [vmem:[%s9570_s8 + $0xc0] sm:$0xff] }
0x1127   : > { %v6733_v45 = vld [vmem:[%s9570_s8 + $0x100] sm:$0xff] }
0x1128   : > { %v4504_v47 = vmul.f32 4.0, %v4503_v11  ;;  %v4456_v48 = vmul.f32 0.5, %v4455_v46  ;;  %v6722_v11 = vld [vmem:[%s9570_s8 + $0xb8] sm:$0xff] }
0x1129   : > { %v6732_v46 = vld [vmem:[%s9570_s8 + $0xf8] sm:$0xff] }
0x112a   : > { %v4457_v49 = vsub.f32 1.5, %v4456_v48  ;;  %6677 = vmatmul.msk.f32.vlgmr.msrb.gmra.mxu2 %vm3381_vm4, %v4504_v47  ;;  %v6721_v47 = vld [vmem:[%s9570_s8 + $0xb0] sm:$0xff] }
0x112b   : > { %v6731_v48 = vld [vmem:[%s9570_s8 + $0xf0] sm:$0xff] }
0x112c   : > { %v4458_v27 = vmul.f32 %v7180_v29, %v4457_v49  ;;  %v6720_v49 = vld [vmem:[%s9570_s8 + $0xa8] sm:$0xff] }
0x112e   : > { %v4462_v50 = vsel %vm4461_vm11, %v7180_v29, %v4458_v27  ;;  %v6730_v27 = vld [vmem:[%s9570_s8 + $0xe8] sm:$0xff] }
0x112f   : > { %6676 = vmatmul.msk.f32.vlgmr.msrb.gmra.mxu1 %vm3332_vm14, %v4462_v50  ;;  %v6716_v50 = vld [vmem:[%s9569_s7 + $0x2f8] sm:$0xff] }
0x1137   : > { %6678 = vmatmul.msk.f32.vlgmr.msra.gmra.mxu1 %vm3381_vm4, %v4530_v60  ;;  %v6715_v60 = vld [vmem:[%s9569_s7 + $0x2f0] sm:$0xff] }
0x11ac   : > { %v4483_v40 = vpop.f32.mrf.mxu1 }
0x11ad   : > { %v4486_v52 = vmul.f32 %v4483_v40, %v4401_v16  ;;  %v4525_v41 = vpop.f32.mrf.mxu2  ;;  %v6711_v40 = vld [vmem:[%s9569_s7 + $0x2d0] sm:$0xff] }
0x11ae   : > { %6688 = vmatpush.msk.msra.mxu2 %vm3200_vm2, %v4525_v41 }
0x11af   : > { %v4487_v53 = vmul.f32 4.0, %v4486_v52  ;;  %6689 = vmatmul.msk.f32.vlgmr.msra.gmra.mxu2 %vm3450_vm9, %v7220_v54 }
0x11b0   : > { %6703 = vmatpush.msk.msrb.mxu2 %vm3190_vm10, %v6687_v21 }
0x11b1   : > { %6700 = vmatmul.msk.f32.vlgmr.msrb.gmra.mxu0 %vm470_vm5, %v4487_v53 }
0x11b2   : > { %4894 = vmatpush.msra.mxu2 %v6723_v44  ;;  %4944 = vmatpush.msrb.mxu0 %v6733_v45 }
0x11b4   : > { %v4550_v55 = vpop.f32.mrf.mxu1  ;;  %4895 = vmatpush.msra.mxu2 %v6722_v11  ;;  %4945 = vmatpush.msrb.mxu0 %v6732_v46 }
0x11b5   : > { %6692 = vmatpush.msk.msrb.mxu3 %vm3200_vm2, %v4550_v55 }
0x11b6   : > { %6693 = vmatmul.msk.f32.vlgmr.msrb.gmra.mxu3 %vm3450_vm9, %v7220_v54  ;;  %4896 = vmatpush.msra.mxu2 %v6721_v47 }
0x11b7   : > { %6690 = vmatmul.msk.f32.gmra.mxu2 %vm3450_vm9, %v7221_v57  ;;  %4946 = vmatpush.msrb.mxu0 %v6731_v48 }
0x11b8   : > { %4897 = vmatpush.msra.mxu2 %v6720_v49 }
0x11b9   : > { %4947 = vmatpush.msrb.mxu0 %v6730_v27 }
0x11be   : > { %6694 = vmatmul.msk.f32.gmra.mxu3 %vm3450_vm9, %v7221_v57 }
0x11bf   : > { %6691 = vmatmul.msk.f32.gmra.mxu2 %vm3450_vm9, %v7222_v28 }
0x11c6   : > { %6695 = vmatmul.msk.f32.gmra.mxu3 %vm3450_vm9, %v7222_v28  ;;  %v6710_v28 = vld [vmem:[%s9569_s7 + $0x2c8] sm:$0xff] }
0x122e   : > { %v4675_v58 = vpop.f32.mrf.mxu0 }
0x122f   : > { %v4676_v1 = vadd.f32 %v7223_v62, %v4675_v58  ;;  %v6709_v58 = vld [vmem:[%s9569_s7 + $0x2c0] sm:$0xff] }
0x1231   : > { %v4681_v33 = vsel %vm3580_vm12, %v4676_v1, -inf }
0x1232   : > { %v4582_v2 = vpop.f32.mrf.mxu2  ;;  %4682 = vmax.xlane.f32.xlu1 %v4681_v33 }
0x1233   : > { %v4591_v6 = vmul.f32 %v7226_v63, %v4582_v2 }
0x1239   : > { %v4614_v15 = vpop.f32.mrf.mxu3 }
0x123a   : > { %v4585_v3 = vpop.f32.mrf.mxu2  ;;  %v4623_v22 = vmul.f32 %v7226_v63, %v4614_v15 }
0x123b   : > { %v4592_v61 = vmul.f32 %v7225_v59, %v4585_v3 }
0x1241   : > { %v4617_v17 = vpop.f32.mrf.mxu3 }
0x1242   : > { %v4588_v4 = vpop.f32.mrf.mxu2  ;;  %v4624_v20 = vmul.f32 %v7225_v59, %v4617_v17  ;;  %v9223_v59 = vld [vmem:[%s9567_s5 + $0x270] sm:$0xff] }
0x1243   : > { %v4593_v5 = vmul.f32 %v7224_v37, %v4588_v4  ;;  %v9202_v4 = vld [vmem:[%s9567_s5 + $0x258] sm:$0xff] }
0x1245   : > { %6696 = vmatpush.xpose.msk.msrb.mxu1 %vm470_vm5, %v4593_v5  ;;  %v9216_v5 = vld [vmem:[%s9567_s5 + $0x268] sm:$0xff] }
0x1249   : > { %6697 = vmatpush.xpose.msk.msrb.mxu1 %vm470_vm5, %v4592_v61  ;;  %v4620_v18 = vpop.f32.mrf.mxu3  ;;  %v9230_v61 = vld [vmem:[%s9567_s5 + $0x278] sm:$0xff] }
0x124a   : > { %v4625_v19 = vmul.f32 %v7224_v37, %v4620_v18  ;;  %v9209_v37 = vld [vmem:[%s9567_s5 + $0x260] sm:$0xff] }
0x124c   : > { %6705 = vmatpush.msk.msra.mxu3 %vm3190_vm10, %v4625_v19 }
0x124d   : > { %6698 = vmatpush.xpose.msk.msrb.mxu1 %vm470_vm5, %v4591_v6 }
0x124e   : > { %4758 = vmatpush.msra.mxu3 %v4624_v20 }
0x1250   : > { %6699 = vmatmul.msk.f32.vlgmr.msrb.gmra.mxu1 %vm470_vm5, %v4487_v53  ;;  %4759 = vmatpush.msra.mxu3 %v4623_v22 }
0x1251   : > { %6701 = vmatpush.msk.msra.mxu1 %vm3190_vm10, %v7227_v7  ;;  %vm9583_vm10 = vcmask 1045504  }
0x1252   : > { %4919 = vmatpush.msrb.mxu3 %v6728_v23  ;;  %vm9584_vm11 = vmmov %vm9583_vm10 }
0x1253   : > { %4708 = vmatpush.msra.mxu1 %v7228_v8 }
0x1254   : > { %4920 = vmatpush.msrb.mxu3 %v6727_v25 }
0x1255   : > { %4709 = vmatpush.msra.mxu1 %v7229_v9 }
0x1256   : > { %4921 = vmatpush.msrb.mxu3 %v6726_v30  ;;  %v7123_v30 = vld [vmem:[%s9569_s7 + $0x278] ss:$0 sm:$0xff] }
0x1257   : > { %4807 = vmatpush.msrb.mxu1 %v6716_v50 }
0x1258   : > { %4922 = vmatpush.msrb.mxu3 %v6725_v31 }
0x1259   : > { %4808 = vmatpush.msrb.mxu1 %v6715_v60 }
0x125b   : > { %4809 = vmatpush.msrb.mxu1 %v6714_v51  ;;  %v7124_v51 = vld [vmem:[%s9569_s7 + $0x348] ss:$0 sm:$0xff] }
0x125d   : > { %4810 = vmatpush.msrb.mxu1 %v6713_v32 }
0x125f   : > { %4811 = vmatpush.msrb.mxu1 %v6712_v0 }
0x1261   : > { %4812 = vmatpush.msrb.mxu1 %v6711_v40 }
0x1263   : > { %4813 = vmatpush.msrb.mxu1 %v6710_v28  ;;  %v6744_v28 = vld [vmem:[%s9569_s7 + $0x420] sm:$0xff] }
0x1265   : > { %4814 = vmatpush.msrb.mxu1 %v6709_v58  ;;  %v6743_v58 = vld [vmem:[%s9569_s7 + $0x418] sm:$0xff] }
0x12a5   : > { %v4683_v34 = vpop.xlane.xlu1 %4682 }
0x12cd   : > { %v4655_v10 = vpop.f32.mrf.mxu1 }
0x12ce   : > { %v4656_v14 = vadd.f32 %v7230_v12, %v4655_v10 }
0x12d0   : > { %v4678_v16 = vsel %vm3576_vm13, %v4656_v14, -inf  ;;  %vm9591_vm13 = vcmask 258048  }
0x12d1   : > { %4679 = vmax.xlane.f32.xlu0 %v4678_v16  ;;  %vm9593_vm1 = vmmov %vm9591_vm13 }
0x12d2   : > { %vm9594_vm7 = vmmov %vm9593_vm1 }
0x1344   : > { %v4680_v35 = vpop.xlane.xlu0 %4679 }
0x1345   : > { %v4684_v26 = vmax.f32 %v4680_v35, %v4683_v34 }
0x1347   : > { %v4685_v36 = vsub.f32 %v4656_v14, %v4684_v26  ;;  %v4688_v38 = vsub.f32 %v4676_v1, %v4684_v26 }
0x1349   : > { %v4686_v39 = vmul.f32 1.442695, %v4685_v36  ;;  %v4689_v42 = vmul.f32 1.442695, %v4688_v38 }
0x134b   : > { %7181 = vpow2.f32 %v4686_v39 }
0x134c   : > { %7183 = vpow2.f32 %v4689_v42 }
0x1351   : > { %v7182_v29 = vpop.eup %7181 }
0x1352   : > { %v7184_v43 = vpop.eup %7183  ;;  %6702 = vmatmul.msk.f32.vlgmr.msra.gmra.mxu1 %vm3591_vm15, %v7182_v29  ;;  %6706 = vmatmul.msk.f32.vlgmr.msra.gmra.mxu3 %vm3591_vm15, %v7182_v29  ;;  %vm9592_vm15 = vmmov %vm9591_vm13 }
0x1353   : > { %6704 = vmatmul.msk.f32.vlgmr.msrb.gmra.mxu2 %vm3332_vm14, %v7184_v43 }
0x135a   : > { %6729 = vmatmul.msk.f32.vlgmr.msrb.gmra.mxu3 %vm387_vm0, %v8508_v13 }
0x13cf   : > { %v4711_v52 = vpop.f32.mrf.mxu1 }
0x13d0   : > { %v4712_v41 = vadd.f32 %v7184_v43, %v4711_v52  ;;  %v6750_v52 = vld [vmem:[%s9569_s7 + $0x450] sm:$0xff] }
0x13d2   : > { %7185 = vrcp.f32 %v4712_v41  ;;  %v6749_v41 = vld [vmem:[%s9569_s7 + $0x448] sm:$0xff] }
0x13d5   : > { %v4761_v53 = vpop.f32.mrf.mxu3 }
0x13d6   : > { %v4738_v62 = vpop.f32.mrf.mxu2 }
0x13d7   : > { %v4762_v1 = vadd.f32 %v4761_v53, %v4738_v62  ;;  %v6748_v53 = vld [vmem:[%s9569_s7 + $0x440] sm:$0xff]  ;;  %v6742_v62 = vld [vmem:[%s9569_s7 + $0x410] sm:$0xff] }
0x13d8   : > { %v7186_v54 = vpop.eup %7185 }
0x13d9   : > { %6708 = vmatmul.msk.f32.vlgmr.msra.gmra.mxu0 %vm3332_vm14, %v7186_v54  ;;  %vm9585_vm14 = vcmask 48128   ;;  %v6747_v54 = vld [vmem:[%s9569_s7 + $0x438] sm:$0xff] }
0x13da   : > { %vm9586_vm2 = vmmov %vm9585_vm14 }
0x13db   : > { %vm9588_vm4 = vmmov %vm9586_vm2 }
0x13dc   : > { %vm9589_vm9 = vmmov %vm9586_vm2 }
0x13dd   : > { %v4924_v55 = vpop.f32.mrf.mxu3  ;;  %vm9590_vm12 = vmmov %vm9586_vm2 }
0x13de   : > { %v4927_v57 = vmul.f32 0.5, %v4924_v55  ;;  %v6746_v55 = vld [vmem:[%s9569_s7 + $0x430] sm:$0xff] }
0x13e0   : > { %6752 = vmatpush.msk.msrb.mxu2 %vm9583_vm10, %v4927_v57  ;;  %v6745_v57 = vld [vmem:[%s9569_s7 + $0x428] sm:$0xff] }
0x13e1   : > { %6734 = vmatmul.msk.f32.vlgmr.msrb.gmra.mxu0 %vm387_vm0, %v8508_v13  ;;  %v9195_v13 = vld [vmem:[%s9567_s5 + $0x250] sm:$0xff] }
0x1456   : > { %v4784_v33 = vpop.f32.mrf.mxu0 }
0x1457   : > { %v4787_v2 = vmul.f32 %v4784_v33, %v4762_v1  ;;  %v6741_v1 = vld [vmem:[%s9569_s7 + $0x408] sm:$0xff]  ;;  %v6740_v33 = vld [vmem:[%s9569_s7 + $0x400] sm:$0xff] }
0x1459   : > { %6717 = vmatmul.msk.f32.vlgmr.msrb.gmra.mxu1 %vm470_vm5, %v4787_v2  ;;  %vm9587_vm5 = vmmov %vm9586_vm2  ;;  %v6739_v2 = vld [vmem:[%s9569_s7 + $0x3f8] sm:$0xff] }
0x145e   : > { %v4949_v3 = vpop.f32.mrf.mxu0 }
0x145f   : > { %6759 = vmatpush.msk.msra.mxu3 %vm9584_vm11, %v4949_v3  ;;  %v6738_v3 = vld [vmem:[%s9569_s7 + $0x3f0] sm:$0xff] }
0x1460   : > { %6760 = vmatmul.msk.f32.vlgmr.msra.gmra.mxu3 %vm9585_vm14, %v9195_v13 }
0x1461   : > { %5077 = vmatpush.msrb.mxu3 %v6750_v52 }
0x1463   : > { %5078 = vmatpush.msrb.mxu3 %v6749_v41 }
0x1465   : > { %5079 = vmatpush.msrb.mxu3 %v6748_v53 }
0x1467   : > { %5080 = vmatpush.msrb.mxu3 %v6747_v54 }
0x1468   : > { %6761 = vmatmul.msk.f32.gmra.mxu3 %vm9586_vm2, %v9202_v4 }
0x1469   : > { %5081 = vmatpush.msrb.mxu3 %v6746_v55 }
0x146b   : > { %5082 = vmatpush.msrb.mxu3 %v6745_v57 }
0x146d   : > { %5083 = vmatpush.msrb.mxu3 %v6744_v28 }
0x146f   : > { %5084 = vmatpush.msrb.mxu3 %v6743_v58  ;;  %v6785_v58 = vld [vmem:[%s9569_s7 + $0x3d0] sm:$0xff] }
0x1470   : > { %6762 = vmatmul.msk.f32.gmra.mxu3 %vm9587_vm5, %v9209_v37  ;;  %vm9595_vm5 = vmmov %vm9586_vm2 }
0x1471   : > { %5085 = vmatpush.msrb.mxu3 %v6742_v62  ;;  %v6784_v62 = vld [vmem:[%s9569_s7 + $0x3c8] sm:$0xff] }
0x1473   : > { %5086 = vmatpush.msrb.mxu3 %v6741_v1  ;;  %v6783_v1 = vld [vmem:[%s9569_s7 + $0x3c0] sm:$0xff] }
0x1475   : > { %5087 = vmatpush.msrb.mxu3 %v6740_v33  ;;  %v6782_v33 = vld [vmem:[%s9569_s7 + $0x3b8] sm:$0xff] }
0x1477   : > { %5088 = vmatpush.msrb.mxu3 %v6739_v2  ;;  %v6781_v2 = vld [vmem:[%s9569_s7 + $0x3b0] sm:$0xff] }
0x1478   : > { %6763 = vmatmul.msk.f32.gmra.mxu3 %vm9588_vm4, %v9216_v5  ;;  %vm9596_vm4 = vmmov %vm9586_vm2 }
0x1479   : > { %5089 = vmatpush.msrb.mxu3 %v6738_v3  ;;  %v6780_v3 = vld [vmem:[%s9569_s7 + $0x3a8] sm:$0xff] }
0x1480   : > { %6764 = vmatmul.msk.f32.gmra.mxu3 %vm9589_vm9, %v9223_v59  ;;  %vm9597_vm9 = vmmov %vm9586_vm2 }
0x1488   : > { %6765 = vmatmul.msk.f32.gmra.mxu3 %vm9590_vm12, %v9230_v61  ;;  %vm9598_vm12 = vmmov %vm9586_vm2 }
0x14d6   : > { %v4816_v63 = vpop.f32.mrf.mxu1 }
0x14d7   : > { %v4820_v6 = vsel %vm9591_vm13, %v4816_v63, 0.0  ;;  %v4824_v7 = vmul.f32 %v4816_v63, %v4816_v63  ;;  %vm9599_vm13 = vmmov %vm9586_vm2 }
0x14d8   : > { %4821 = vadd.xlane.f32.xlu0 %v4820_v6 }
0x14d9   : > { %v4825_v8 = vsel %vm9592_vm15, %v4824_v7, 0.0  ;;  %vm9600_vm15 = vcmask 61440  }
0x14da   : > { %4826 = vadd.xlane.f32.xlu1 %v4825_v8 }
0x154b   : > { %v4822_v9 = vpop.xlane.xlu0 %4821 }
0x154c   : > { %v4823_v10 = vmul.f32 %v4822_v9, %v8356_v24 }
0x154d   : > { %v4827_v12 = vpop.xlane.xlu1 %4826 }
0x154e   : > { %v4829_v14 = vmul.f32 %v4823_v10, %v4823_v10  ;;  %v4828_v16 = vmul.f32 %v4827_v12, %v8356_v24  ;;  %v4831_v25 = vsub.f32 %v4816_v63, %v4823_v10  ;;  %v5033_v10 = vpop.f32.mrf.mxu3  ;;  %v7237_v12 = vld [vmem:[%s9568_s6 + $0x28] sm:$0xff] }
0x1550   : > { %v4830_v15 = vsub.f32 %v4828_v16, %v4829_v14 }
0x1552   : > { %v4832_v17 = vadd.f32 1e-05, %v4830_v15  ;;  %v7238_v15 = vld [vmem:[%s9568_s6 + $0x20] sm:$0xff] }
0x1554   : > { %7187 = vrsqrt.f32 %v4832_v17  ;;  %vm4839_vm8 = vweird.f32 %v4832_v17 }
0x1556   : > { %v5036_v16 = vpop.f32.mrf.mxu3 }
0x155a   : > { %v7188_v18 = vpop.eup %7187 }
0x155b   : > { %v4834_v20 = vmul.f32 %v7188_v18, %v4832_v17  ;;  %vm4840_vm3 = vweird.f32 %v7188_v18 }
0x155c   : > { %vm4841_vm6 = vmor %vm4839_vm8, %vm4840_vm3  ;;  %vm9601_vm3 = vcmask 389120   ;;  %vm9602_vm8 = vcmask 392192  }
0x155d   : > { %v4835_v19 = vmul.f32 %v7188_v18, %v4834_v20 }
0x155f   : > { %v4836_v21 = vmul.f32 0.5, %v4835_v19  ;;  %v5039_v19 = vpop.f32.mrf.mxu3 }
0x1561   : > { %v4837_v22 = vsub.f32 1.5, %v4836_v21  ;;  %v7240_v21 = vld [vmem:[%s9568_s6 + $0x10] sm:$0xff] }
0x1563   : > { %v4838_v23 = vmul.f32 %v7188_v18, %v4837_v22 }
0x1565   : > { %v4842_v31 = vsel %vm4841_vm6, %v7188_v18, %v4838_v23  ;;  %v7239_v18 = vld [vmem:[%s9568_s6 + $0x18] sm:$0xff]  ;;  %v7241_v23 = vld [vmem:[%s9568_s6 + $0x8] sm:$0xff]  ;;  %vm9603_vm6 = vcmask 64512  }
0x1566   : > { %v4843_v34 = vmul.f32 %v4842_v31, %v4831_v25  ;;  %v7242_v31 = vld [vmem:[%s9568_s6] sm:$0xff] }
0x1568   : > { %v4845_v35 = vmul.f32 %v7123_v30, %v4843_v34  ;;  %v5042_v30 = vpop.f32.mrf.mxu3 }
0x156a   : > { %v9242_v26 = vadd.f32 %v4845_v35, %v8983_v56  ;;  %v7243_v35 = vld [vmem:[%s9567_s5 + $0x2a8] sm:$0xff] }
0x156c   : > { %v4848_v36 = vsel %vm9593_vm1, %v9242_v26, 0.0  ;;  %v4852_v38 = vmul.f32 %v9242_v26, %v9242_v26  ;;  %vm9604_vm1 = vmmov %vm9602_vm8 }
0x156d   : > { %4849 = vadd.xlane.f32.xlu0 %v4848_v36 }
0x156e   : > { %v4853_v39 = vsel %vm9594_vm7, %v4852_v38, 0.0  ;;  %v7244_v38 = vld [vmem:[%s9567_s5 + $0x2a0] sm:$0xff]  ;;  %vm9605_vm7 = vmmov %vm9603_vm6 }
0x156f   : > { %4854 = vadd.xlane.f32.xlu1 %v4853_v39  ;;  %v7245_v39 = vld [vmem:[%s9567_s5 + $0x298] sm:$0xff] }
0x1570   : > { %v5045_v36 = vpop.f32.mrf.mxu3 }
0x15e0   : > { %v4850_v42 = vpop.xlane.xlu0 %4849 }
0x15e1   : > { %v4851_v29 = vmul.f32 %v4850_v42, %v8356_v24  ;;  %v7246_v42 = vld [vmem:[%s9567_s5 + $0x290] sm:$0xff] }
0x15e2   : > { %v4855_v43 = vpop.xlane.xlu1 %4854 }
0x15e3   : > { %v4857_v44 = vmul.f32 %v4851_v29, %v4851_v29  ;;  %v4856_v45 = vmul.f32 %v4855_v43, %v8356_v24  ;;  %v4859_v60 = vsub.f32 %v9242_v26, %v4851_v29  ;;  %v7247_v29 = vld [vmem:[%s9567_s5 + $0x288] sm:$0xff]  ;;  %v5048_v43 = vpop.f32.mrf.mxu3 }
0x15e5   : > { %v4858_v11 = vsub.f32 %v4856_v45, %v4857_v44  ;;  %v5055_v44 = vmul.f32 %v7238_v15, %v5045_v36  ;;  %v5056_v45 = vmul.f32 %v7237_v12, %v5048_v43 }
0x15e7   : > { %v4860_v56 = vadd.f32 1e-05, %v4858_v11  ;;  %v7248_v11 = vld [vmem:[%s9567_s5 + $0x280] sm:$0xff] }
0x15e9   : > { %7189 = vrsqrt.f32 %v4860_v56  ;;  %vm4867_vm11 = vweird.f32 %v4860_v56 }
0x15ef   : > { %v7190_v46 = vpop.eup %7189 }
0x15f0   : > { %v4862_v47 = vmul.f32 %v7190_v46, %v4860_v56  ;;  %vm4868_vm10 = vweird.f32 %v7190_v46  ;;  %v5054_v56 = vmul.f32 %v7239_v18, %v5042_v30 }
0x15f1   : > { %vm4869_vm14 = vmor %vm4867_vm11, %vm4868_vm10  ;;  %vm9606_vm10 = vcmask 258048  }
0x15f2   : > { %v4863_v48 = vmul.f32 %v7190_v46, %v4862_v47  ;;  %v5052_v47 = vmul.f32 %v7241_v23, %v5036_v16  ;;  %vm9607_vm11 = vmmov %vm9606_vm10 }
0x15f4   : > { %v4864_v49 = vmul.f32 0.5, %v4863_v48  ;;  %v5051_v48 = vmul.f32 %v7242_v31, %v5033_v10 }
0x15f6   : > { %v4865_v27 = vsub.f32 1.5, %v4864_v49 }
0x15f8   : > { %v4866_v50 = vmul.f32 %v7190_v46, %v4865_v27 }
0x15fa   : > { %v4870_v32 = vsel %vm4869_vm14, %v7190_v46, %v4866_v50  ;;  %v5053_v46 = vmul.f32 %v7240_v21, %v5039_v19 }
0x15fb   : > { %v4871_v0 = vmul.f32 %v4870_v32, %v4859_v60  ;;  %v7249_v32 = vld [vmem:[%s9568_s6 + $0x30] sm:$0xff] }
0x15fd   : > { %v4873_v40 = vmul.f32 %v7124_v51, %v4871_v0  ;;  %v6751_v51 = vld [vmem:[%s9570_s8 + $0x108] sm:$0xff] }
0x15fe   : > { %5152 = vmatpush.msra.mxu1 %v6751_v51  ;;  %v6796_v51 = vld [vmem:[%s9570_s8 + $0x148] sm:$0xff] }
0x15ff   : > { %6724 = vmatmul.msk.f32.vlgmr.msra.gmra.mxu2 %vm387_vm0, %v4873_v40 }
0x1600   : > { %5195 = vmatpush.msrb.mxu1 %v7249_v32  ;;  %5217 = vmatpush.msra.mxu2 %v6785_v58  ;;  %v6795_v32 = vld [vmem:[%s9570_s8 + $0x140] sm:$0xff] }
0x1602   : > { %5218 = vmatpush.msra.mxu2 %v6784_v62 }
0x1604   : > { %5219 = vmatpush.msra.mxu2 %v6783_v1 }
0x1606   : > { %5220 = vmatpush.msra.mxu2 %v6782_v33 }
0x1607   : > { %6753 = vmatmul.msk.f32.vlgmr.msrb.gmra.mxu2 %vm9586_vm2, %v9195_v13  ;;  %v6737_v13 = vld [vmem:[%s9569_s7 + $0x3e8] sm:$0xff] }
0x1608   : > { %5090 = vmatpush.msrb.mxu3 %v6737_v13  ;;  %5221 = vmatpush.msra.mxu2 %v6781_v2  ;;  %v6779_v13 = vld [vmem:[%s9569_s7 + $0x3a0] sm:$0xff] }
0x160a   : > { %5222 = vmatpush.msra.mxu2 %v6780_v3 }
0x160c   : > { %5223 = vmatpush.msra.mxu2 %v6779_v13 }
0x160f   : > { %6754 = vmatmul.msk.f32.gmra.mxu2 %vm9595_vm5, %v9202_v4  ;;  %v6736_v4 = vld [vmem:[%s9569_s7 + $0x3e0] sm:$0xff] }
0x1610   : > { %5091 = vmatpush.msrb.mxu3 %v6736_v4  ;;  %v6778_v4 = vld [vmem:[%s9569_s7 + $0x398] sm:$0xff] }
0x1611   : > { %5224 = vmatpush.msra.mxu2 %v6778_v4 }
0x1617   : > { %6755 = vmatmul.msk.f32.gmra.mxu2 %vm9596_vm4, %v9209_v37  ;;  %v6735_v37 = vld [vmem:[%s9569_s7 + $0x3d8] sm:$0xff]  ;;  %vm9608_vm4 = vmmov %vm9606_vm10 }
0x1618   : > { %5092 = vmatpush.msrb.mxu3 %v6735_v37  ;;  %v6777_v37 = vld [vmem:[%s9569_s7 + $0x390] sm:$0xff] }
0x1619   : > { %5225 = vmatpush.msra.mxu2 %v6777_v37 }
0x161f   : > { %6756 = vmatmul.msk.f32.gmra.mxu2 %vm9597_vm9, %v9216_v5  ;;  %vm9609_vm9 = vmmov %vm9608_vm4 }
0x1627   : > { %6757 = vmatmul.msk.f32.gmra.mxu2 %vm9598_vm12, %v9223_v59 }
0x162f   : > { %6758 = vmatmul.msk.f32.gmra.mxu2 %vm9599_vm13, %v9230_v61 }
0x1682   : > { %v4899_v5 = vpop.f32.mrf.mxu2 }
0x1683   : > { %v4902_v59 = vmul.f32 0.5, %v4899_v5  ;;  %v6776_v5 = vld [vmem:[%s9569_s7 + $0x388] sm:$0xff] }
0x1684   : > { %5226 = vmatpush.msra.mxu2 %v6776_v5  ;;  %v7126_v5 = vld [vmem:[%s9569_s7 + $0x458] ss:$0 sm:$0xff] }
0x1685   : > { %5093 = vmatmul.f32.vlgmr.msrb.gmra.mxu3 %v4902_v59 }
0x168a   : > { %v4989_v63 = vpop.f32.mrf.mxu2 }
0x168b   : > { %v5007_v34 = vmul.f32 %v7242_v31, %v4989_v63  ;;  %v6774_v63 = vld [vmem:[%s9569_s7 + $0x378] sm:$0xff] }
0x1692   : > { %v4992_v6 = vpop.f32.mrf.mxu2 }
0x1693   : > { %v5008_v25 = vmul.f32 %v7241_v23, %v4992_v6 }
0x169a   : > { %v4995_v7 = vpop.f32.mrf.mxu2 }
0x169b   : > { %v5009_v22 = vmul.f32 %v7240_v21, %v4995_v7  ;;  %v6773_v7 = vld [vmem:[%s9569_s7 + $0x370] sm:$0xff] }
0x16a2   : > { %v4998_v8 = vpop.f32.mrf.mxu2 }
0x16a3   : > { %v5010_v20 = vmul.f32 %v7239_v18, %v4998_v8 }
0x16aa   : > { %v5001_v9 = vpop.f32.mrf.mxu2 }
0x16ab   : > { %v5011_v17 = vmul.f32 %v7238_v15, %v5001_v9  ;;  %v6772_v9 = vld [vmem:[%s9569_s7 + $0x368] sm:$0xff] }
0x16b2   : > { %v5004_v61 = vpop.f32.mrf.mxu2 }
0x16b3   : > { %v5012_v14 = vmul.f32 %v7237_v12, %v5004_v61  ;;  %v6771_v61 = vld [vmem:[%s9569_s7 + $0x360] sm:$0xff]  ;;  %v6770_v12 = vld [vmem:[%s9569_s7 + $0x358] sm:$0xff] }
0x16b5   : > { %5067 = vmatpush.xpose.msra.mxu0 %v5012_v14 }
0x16b9   : > { %5068 = vmatpush.xpose.msra.mxu0 %v5011_v17 }
0x16bd   : > { %5069 = vmatpush.xpose.msra.mxu0 %v5010_v20 }
0x16c1   : > { %5070 = vmatpush.xpose.msra.mxu0 %v5009_v22 }
0x16c5   : > { %5071 = vmatpush.xpose.msra.mxu0 %v5008_v25 }
0x16c9   : > { %5072 = vmatpush.xpose.msra.mxu0 %v5007_v34 }
0x16cc   : > { %5073 = vmatmul.f32.vlgmr.msra.gmra.mxu0 %v4902_v59  ;;  %v6775_v59 = vld [vmem:[%s9569_s7 + $0x380] sm:$0xff] }
0x16cd   : > { %5123 = vmatpush.msrb.mxu0 %v7243_v35  ;;  %5227 = vmatpush.msra.mxu2 %v6775_v59 }
0x16cf   : > { %5124 = vmatpush.msrb.mxu0 %v7244_v38  ;;  %5228 = vmatpush.msra.mxu2 %v6774_v63 }
0x16d1   : > { %5125 = vmatpush.msrb.mxu0 %v7245_v39  ;;  %5229 = vmatpush.msra.mxu2 %v6773_v7  ;;  %v6813_v7 = vld [vmem:[%s9569_s7 + $0x4d8] sm:$0xff] }
0x16d3   : > { %5126 = vmatpush.msrb.mxu0 %v7246_v42  ;;  %5230 = vmatpush.msra.mxu2 %v6772_v9  ;;  %v6811_v9 = vld [vmem:[%s9569_s7 + $0x4c8] sm:$0xff] }
0x16d5   : > { %5127 = vmatpush.msrb.mxu0 %v7247_v29  ;;  %5231 = vmatpush.msra.mxu2 %v6771_v61  ;;  %v6809_v61 = vld [vmem:[%s9569_s7 + $0x4b8] sm:$0xff] }
0x16d7   : > { %5128 = vmatpush.msrb.mxu0 %v7248_v11  ;;  %5232 = vmatpush.msra.mxu2 %v6770_v12  ;;  %v7125_v11 = vld [vmem:[%s9569_s7 + $0x350] ss:$0 sm:$0xff] }
0x16d8   : > { %v6808_v12 = vld [vmem:[%s9569_s7 + $0x4b0] sm:$0xff] }
0x16d9   : > { %5167 = vmatpush.msra.mxu0 %v5056_v45 }
0x16db   : > { %5168 = vmatpush.msra.mxu0 %v5055_v44 }
0x16dd   : > { %5169 = vmatpush.msra.mxu0 %v5054_v56 }
0x16df   : > { %5170 = vmatpush.msra.mxu0 %v5053_v46 }
0x16e1   : > { %5171 = vmatpush.msra.mxu0 %v5052_v47 }
0x16e3   : > { %5172 = vmatpush.msra.mxu0 %v5051_v48 }
0x1708   : > { %v5094_v49 = vpop.f32.mrf.mxu3 }
0x1709   : > { %v5100_v27 = vsel %vm9600_vm15, %v5094_v49, -inf }
0x170a   : > { %5101 = vmax.xlane.f32.xlu0 %v5100_v27 }
0x1749   : > { %v5074_v50 = vpop.f32.mrf.mxu0 }
0x174a   : > { %v5097_v60 = vsel %vm9601_vm3, %v5074_v50, -inf }
0x174b   : > { %5098 = vmax.xlane.f32.xlu2 %v5097_v60  ;;  %v6791_v60 = vld [vmem:[%s9570_s8 + $0x128] sm:$0xff] }
0x174c   : > { %5311 = vmatpush.msra.mxu3 %v6791_v60 }
0x177d   : > { %v5102_v0 = vpop.xlane.xlu0 %5101 }
0x17be   : > { %v5099_v40 = vpop.xlane.xlu2 %5098 }
0x17bf   : > { %v5103_v52 = vmax.f32 %v5099_v40, %v5102_v0  ;;  %v6789_v0 = vld [vmem:[%s9570_s8 + $0x118] sm:$0xff] }
0x17c0   : > { %v6794_v40 = vld [vmem:[%s9570_s8 + $0x138] sm:$0xff] }
0x17c1   : > { %v5104_v41 = vsub.f32 %v5074_v50, %v5103_v52  ;;  %v5107_v53 = vsub.f32 %v5094_v49, %v5103_v52  ;;  %v6788_v52 = vld [vmem:[%s9570_s8 + $0x110] sm:$0xff] }
0x17c3   : > { %v5105_v54 = vmul.f32 1.442695, %v5104_v41  ;;  %v5108_v55 = vmul.f32 1.442695, %v5107_v53  ;;  %v6793_v41 = vld [vmem:[%s9570_s8 + $0x130] sm:$0xff] }
0x17c5   : > { %7191 = vpow2.f32 %v5105_v54 }
0x17c6   : > { %7193 = vpow2.f32 %v5108_v55 }
0x17cb   : > { %v7192_v57 = vpop.eup %7191 }
0x17cc   : > { %v7194_v28 = vpop.eup %7193  ;;  %6766 = vmatmul.msk.f32.vlgmr.msrb.gmra.mxu0 %vm9602_vm8, %v7192_v57 }
0x17cd   : > { %6767 = vmatmul.msk.f32.vlgmr.msra.gmra.mxu1 %vm9603_vm6, %v7194_v28  ;;  %5335 = vmatpush.msrb.mxu0 %v6796_v51 }
0x17ce   : > { %5380 = vmatpush.msra.mxu1 %v6813_v7 }
0x17cf   : > { %5336 = vmatpush.msrb.mxu0 %v6795_v32 }
0x17d1   : > { %5337 = vmatpush.msrb.mxu0 %v6794_v40 }
0x17d3   : > { %5338 = vmatpush.msrb.mxu0 %v6793_v41 }
0x17d4   : > { %6768 = vmatmul.msk.f32.vlgmr.msra.gmra.mxu0 %vm9604_vm1, %v7192_v57 }
0x1849   : > { %v5130_v6 = vpop.f32.mrf.mxu0 }
0x184a   : > { %v5131_v8 = vadd.f32 %v7194_v28, %v5130_v6  ;;  %v5154_v14 = vpop.f32.mrf.mxu1 }
0x184c   : > { %7195 = vrcp.f32 %v5131_v8  ;;  %v6812_v8 = vld [vmem:[%s9569_s7 + $0x4d0] sm:$0xff] }
0x184d   : > { %5381 = vmatpush.msra.mxu1 %v6812_v8 }
0x184f   : > { %5382 = vmatpush.msra.mxu1 %v6811_v9 }
0x1851   : > { %v5174_v16 = vpop.f32.mrf.mxu0 }
0x1852   : > { %v7196_v10 = vpop.eup %7195  ;;  %v5175_v15 = vadd.f32 %v5174_v16, %v5154_v14  ;;  %v6807_v14 = vld [vmem:[%s9569_s7 + $0x4a8] sm:$0xff]  ;;  %v6806_v16 = vld [vmem:[%s9569_s7 + $0x4a0] sm:$0xff] }
0x1853   : > { %6769 = vmatmul.msk.f32.vlgmr.msrb.gmra.mxu1 %vm9605_vm7, %v7196_v10  ;;  %v6810_v10 = vld [vmem:[%s9569_s7 + $0x4c0] sm:$0xff]  ;;  %vm5400_vm7 = vcmask 253952  }
0x1854   : > { %5383 = vmatpush.msra.mxu1 %v6810_v10 }
0x1856   : > { %5384 = vmatpush.msra.mxu1 %v6809_v61 }
0x1858   : > { %5385 = vmatpush.msra.mxu1 %v6808_v12 }
0x185a   : > { %5386 = vmatpush.msra.mxu1 %v6807_v14 }
0x185c   : > { %5387 = vmatpush.msra.mxu1 %v6806_v16  ;;  %v5419_v16 = vld [vmem:[%s9567_s5 + $0x178] sm:$0x1] }
0x18d0   : > { %v5197_v17 = vpop.f32.mrf.mxu1 }
0x18d1   : > { %v5200_v18 = vmul.f32 %v5197_v17, %v5175_v15  ;;  %v6805_v15 = vld [vmem:[%s9569_s7 + $0x498] sm:$0xff]  ;;  %v6804_v17 = vld [vmem:[%s9569_s7 + $0x490] sm:$0xff] }
0x18d2   : > { %5388 = vmatpush.msra.mxu1 %v6805_v15 }
0x18d3   : > { %5233 = vmatmul.f32.vlgmr.msra.gmra.mxu2 %v5200_v18  ;;  %v6803_v18 = vld [vmem:[%s9569_s7 + $0x488] sm:$0xff] }
0x18d4   : > { %5389 = vmatpush.msra.mxu1 %v6804_v17 }
0x18d6   : > { %5390 = vmatpush.msra.mxu1 %v6803_v18 }
0x1956   : > { %v5234_v20 = vpop.f32.mrf.mxu2 }
0x1957   : > { %v5238_v19 = vsel %vm9606_vm10, %v5234_v20, 0.0  ;;  %v5242_v21 = vmul.f32 %v5234_v20, %v5234_v20 }
0x1958   : > { %5239 = vadd.xlane.f32.xlu1 %v5238_v19  ;;  %v6801_v19 = vld [vmem:[%s9569_s7 + $0x478] sm:$0xff] }
0x1959   : > { %v5243_v22 = vsel %vm9607_vm11, %v5242_v21, 0.0  ;;  %v6800_v21 = vld [vmem:[%s9569_s7 + $0x470] sm:$0xff] }
0x195a   : > { %5244 = vadd.xlane.f32.xlu0 %v5243_v22 }
0x19cb   : > { %v5240_v23 = vpop.xlane.xlu1 %5239 }
0x19cc   : > { %v5241_v25 = vmul.f32 %v5240_v23, %v8356_v24  ;;  %v6799_v23 = vld [vmem:[%s9569_s7 + $0x468] sm:$0xff] }
0x19cd   : > { %v5245_v30 = vpop.xlane.xlu0 %5244 }
0x19ce   : > { %v5247_v31 = vmul.f32 %v5241_v25, %v5241_v25  ;;  %v5246_v34 = vmul.f32 %v5245_v30, %v8356_v24  ;;  %v5249_v45 = vsub.f32 %v5234_v20, %v5241_v25  ;;  %v6802_v20 = vld [vmem:[%s9569_s7 + $0x480] sm:$0xff] }
0x19cf   : > { %5391 = vmatpush.msra.mxu1 %v6802_v20  ;;  %v6798_v30 = vld [vmem:[%s9569_s7 + $0x460] sm:$0xff] }
0x19d0   : > { %v5248_v35 = vsub.f32 %v5246_v34, %v5247_v31 }
0x19d1   : > { %5392 = vmatpush.msra.mxu1 %v6801_v19 }
0x19d2   : > { %v5250_v36 = vadd.f32 1e-05, %v5248_v35 }
0x19d3   : > { %5393 = vmatpush.msra.mxu1 %v6800_v21 }
0x19d4   : > { %7197 = vrsqrt.f32 %v5250_v36  ;;  %vm5257_vm2 = vweird.f32 %v5250_v36 }
0x19d5   : > { %5394 = vmatpush.msra.mxu1 %v6799_v23 }
0x19d7   : > { %5395 = vmatpush.msra.mxu1 %v6798_v30 }
0x19da   : > { %v7198_v38 = vpop.eup %7197 }
0x19db   : > { %v5252_v39 = vmul.f32 %v7198_v38, %v5250_v36  ;;  %vm5258_vm14 = vweird.f32 %v7198_v38 }
0x19dc   : > { %vm5259_vm5 = vmor %vm5257_vm2, %vm5258_vm14 }
0x19dd   : > { %v5253_v42 = vmul.f32 %v7198_v38, %v5252_v39 }
0x19df   : > { %v5254_v29 = vmul.f32 0.5, %v5253_v42 }
0x19e1   : > { %v5255_v43 = vsub.f32 1.5, %v5254_v29 }
0x19e3   : > { %v5256_v44 = vmul.f32 %v7198_v38, %v5255_v43 }
0x19e5   : > { %v5260_v56 = vsel %vm5259_vm5, %v7198_v38, %v5256_v44 }
0x19e6   : > { %v5261_v46 = vmul.f32 %v5260_v56, %v5249_v45 }
0x19e8   : > { %v5263_v47 = vmul.f32 %v7125_v11, %v5261_v46 }
0x19ea   : > { %v9420_v48 = vadd.f32 %v5263_v47, %v9242_v26  ;;  %v6790_v26 = vld [vmem:[%s9570_s8 + $0x120] sm:$0xff] }
0x19eb   : > { %5312 = vmatpush.msra.mxu3 %v6790_v26 }
0x19ec   : > { %v5266_v49 = vsel %vm9608_vm4, %v9420_v48, 0.0  ;;  %v5270_v27 = vmul.f32 %v9420_v48, %v9420_v48 }
0x19ed   : > { %5267 = vadd.xlane.f32.xlu1 %v5266_v49  ;;  %5313 = vmatpush.msra.mxu3 %v6789_v0 }
0x19ee   : > { %v5271_v50 = vsel %vm9609_vm9, %v5270_v27, 0.0 }
0x19ef   : > { %5272 = vadd.xlane.f32.xlu0 %v5271_v50  ;;  %5314 = vmatpush.msra.mxu3 %v6788_v52 }
0x1a60   : > { %v5268_v53 = vpop.xlane.xlu1 %5267 }
0x1a61   : > { %v5269_v54 = vmul.f32 %v5268_v53, %v8356_v24 }
0x1a62   : > { %v5273_v55 = vpop.xlane.xlu0 %5272 }
0x1a63   : > { %v5275_v57 = vmul.f32 %v5269_v54, %v5269_v54  ;;  %v5274_v28 = vmul.f32 %v5273_v55, %v8356_v24  ;;  %v5277_v37 = vsub.f32 %v9420_v48, %v5269_v54 }
0x1a65   : > { %v5276_v58 = vsub.f32 %v5274_v28, %v5275_v57 }
0x1a67   : > { %v5278_v62 = vadd.f32 1e-05, %v5276_v58 }
0x1a69   : > { %7199 = vrsqrt.f32 %v5278_v62  ;;  %vm5285_vm13 = vweird.f32 %v5278_v62 }
0x1a6f   : > { %v7200_v1 = vpop.eup %7199 }
0x1a70   : > { %v5280_v33 = vmul.f32 %v7200_v1, %v5278_v62  ;;  %vm5286_vm12 = vweird.f32 %v7200_v1 }
0x1a71   : > { %vm5287_vm15 = vmor %vm5285_vm13, %vm5286_vm12 }
0x1a72   : > { %v5281_v2 = vmul.f32 %v7200_v1, %v5280_v33  ;;  %v5447_v33 = vld [vmem:[%s9567_s5 + $0x190] sm:$0xff] }
0x1a74   : > { %v5282_v3 = vmul.f32 0.5, %v5281_v2  ;;  %v5446_v2 = vld [vmem:[%s9567_s5 + $0x188] sm:$0xff] }
0x1a76   : > { %v5283_v13 = vsub.f32 1.5, %v5282_v3  ;;  %v5445_v3 = vld [vmem:[%s9567_s5 + $0x180] sm:$0xff] }
0x1a78   : > { %v5284_v4 = vmul.f32 %v7200_v1, %v5283_v13 }
0x1a7a   : > { %v5288_v59 = vsel %vm5287_vm15, %v7200_v1, %v5284_v4  ;;  %v5448_v1 = vld [vmem:[%s9567_s5 + $0x198] sm:$0xff] }
0x1a7b   : > { %v5289_v63 = vmul.f32 %v5288_v59, %v5277_v37  ;;  %5464 = vmatpush.msrb.mxu2 %v5448_v1 }
0x1a7d   : > { %v5291_v6 = vmul.f32 %v7126_v5, %v5289_v63  ;;  %5465 = vmatpush.msrb.mxu2 %v5447_v33 }
0x1a7f   : > { %6792 = vmatmul.msk.f32.vlgmr.msra.gmra.mxu3 %vm387_vm0, %v5291_v6  ;;  %6797 = vmatmul.msk.f32.vlgmr.msrb.gmra.mxu0 %vm387_vm0, %v5291_v6 }
0x1a80   : > { %5466 = vmatpush.msrb.mxu2 %v5446_v2 }
0x1a82   : > { %5467 = vmatpush.msrb.mxu2 %v5445_v3 }
0x1afc   : > { %v5340_v22 = vpop.f32.mrf.mxu0 }
0x1afd   : > { %v5343_v25 = vsub.f32 0.0, %v5340_v22 }
0x1aff   : > { %v5344_v31 = vmul.f32 1.442695, %v5343_v25 }
0x1b01   : > { %7201 = vpow2.f32 %v5344_v31 }
0x1b02   : > { %v5316_v47 = vpop.f32.mrf.mxu3 }
0x1b07   : > { %v7202_v34 = vpop.eup %7201 }
0x1b08   : > { %v5346_v35 = vadd.f32 1.0, %v7202_v34 }
0x1b0a   : > { %7203 = vrcp.f32 %v5346_v35  ;;  %v5358_v42 = vand.u32 2147483648, %v5346_v35  ;;  %v5356_v43 = vand.u32 2147483647, %v5346_v35  ;;  %vm5352_vm8 = vweird.f32 %v5346_v35 }
0x1b0c   : > { %v5359_v45 = vor.u32 1.1754944e-38, %v5358_v42  ;;  %vm5357_vm1 = vcmp.eq.f32.partialorder %v5356_v43, 8.507059e+37 }
0x1b10   : > { %v7204_v36 = vpop.eup %7203 }
0x1b11   : > { %v5348_v38 = vmul.f32 %v7204_v36, %v5346_v35  ;;  %vm5353_vm3 = vweird.f32 %v7204_v36 }
0x1b12   : > { %vm5354_vm6 = vmor %vm5352_vm8, %vm5353_vm3 }
0x1b13   : > { %v5349_v39 = vsub.f32 1.0, %v5348_v38 }
0x1b15   : > { %v5350_v29 = vmul.f32 %v7204_v36, %v5349_v39 }
0x1b17   : > { %v5351_v44 = vadd.f32 %v7204_v36, %v5350_v29 }
0x1b19   : > { %v5355_v11 = vsel %vm5354_vm6, %v7204_v36, %v5351_v44 }
0x1b1a   : > { %v5360_v56 = vsel %vm5357_vm1, %v5359_v45, %v5355_v11 }
0x1b1b   : > { %v5362_v46 = vmul.f32 %v5360_v56, %v5340_v22 }
0x1b1d   : > { %v5363_v49 = vmul.f32 %v5362_v46, %v5316_v47 }
0x1b1f   : > { %5396 = vmatmul.f32.vlgmr.msra.gmra.mxu1 %v5363_v49 }
0x1b9c   : > { %v5397_v27 = vpop.f32.mrf.mxu1 }
0x1b9d   : > { %v5398_v50 = vadd.f32 %v5397_v27, %v9420_v48 }
0x1b9f   : > { %v5401_v60 = vsel %vm5400_vm7, %v5398_v50, -inf }
0x1ba0   : > { %5402 = vmax.xlane.f32.xlu1 %v5401_v60 }
0x1c13   : > { %v5403_v51 = vpop.xlane.xlu1 %5402 }
0x1c14   : > { %7205 = vrcp.f32 %v5403_v51  ;;  %v5415_v40 = vand.u32 2147483648, %v5403_v51  ;;  %v5413_v41 = vand.u32 2147483647, %v5403_v51  ;;  %vm5409_vm11 = vweird.f32 %v5403_v51 }
0x1c16   : > { %v5416_v54 = vor.u32 1.1754944e-38, %v5415_v40  ;;  %vm5414_vm2 = vcmp.eq.f32.partialorder %v5413_v41, 8.507059e+37 }
0x1c1a   : > { %v7206_v26 = vpop.eup %7205 }
0x1c1b   : > { %v5405_v32 = vmul.f32 %v7206_v26, %v5403_v51  ;;  %vm5410_vm10 = vweird.f32 %v7206_v26 }
0x1c1c   : > { %vm5411_vm14 = vmor %vm5409_vm11, %vm5410_vm10 }
0x1c1d   : > { %v5406_v0 = vsub.f32 1.0, %v5405_v32 }
0x1c1f   : > { %v5407_v52 = vmul.f32 %v7206_v26, %v5406_v0 }
0x1c21   : > { %v5408_v53 = vadd.f32 %v7206_v26, %v5407_v52 }
0x1c23   : > { %v5412_v55 = vsel %vm5411_vm14, %v7206_v26, %v5408_v53 }
0x1c24   : > { %v5417_v57 = vsel %vm5414_vm2, %v5416_v54, %v5412_v55 }
0x1c25   : > { %v5418_v48 = vmul.f32 %v5417_v57, %v5398_v50 }
0x1c27   : > { %v5420_v28 = vsel %vm5400_vm7, %v5418_v48, 0.0  ;;  %v5424_v58 = vmul.f32 %v5418_v48, %v5418_v48 }
0x1c28   : > { %5421 = vadd.xlane.f32.xlu0 %v5420_v28 }
0x1c29   : > { %v5425_v62 = vsel %vm5400_vm7, %v5424_v58, 0.0 }
0x1c2a   : > { %5426 = vadd.xlane.f32.xlu1 %v5425_v62 }
0x1c9b   : > { %v5422_v13 = vpop.xlane.xlu0 %5421 }
0x1c9c   : > { %v5423_v4 = vmul.f32 %v5422_v13, %v8356_v24 }
0x1c9d   : > { %v5427_v37 = vpop.xlane.xlu1 %5426 }
0x1c9e   : > { %v5429_v5 = vmul.f32 %v5423_v4, %v5423_v4  ;;  %v5428_v59 = vmul.f32 %v5427_v37, %v8356_v24  ;;  %v5431_v14 = vsub.f32 %v5418_v48, %v5423_v4 }
0x1ca0   : > { %v5430_v63 = vsub.f32 %v5428_v59, %v5429_v5 }
0x1ca2   : > { %v5432_v6 = vadd.f32 1e-05, %v5430_v63 }
0x1ca4   : > { %7207 = vrsqrt.f32 %v5432_v6  ;;  %vm5439_vm4 = vweird.f32 %v5432_v6 }
0x1caa   : > { %v7208_v7 = vpop.eup %7207 }
0x1cab   : > { %v5434_v8 = vmul.f32 %v7208_v7, %v5432_v6  ;;  %vm5440_vm5 = vweird.f32 %v7208_v7 }
0x1cac   : > { %vm5441_vm9 = vmor %vm5439_vm4, %vm5440_vm5 }
0x1cad   : > { %v5435_v9 = vmul.f32 %v7208_v7, %v5434_v8 }
0x1caf   : > { %v5436_v10 = vmul.f32 0.5, %v5435_v9 }
0x1cb1   : > { %v5437_v61 = vsub.f32 1.5, %v5436_v10 }
0x1cb3   : > { %v5438_v12 = vmul.f32 %v7208_v7, %v5437_v61 }
0x1cb5   : > { %v5442_v24 = vsel %vm5441_vm9, %v7208_v7, %v5438_v12 }
0x1cb6   : > { %v5443_v15 = vmul.f32 %v5442_v24, %v5431_v14 }
0x1cb8   : > { %v5444_v17 = vmul.f32 %v5443_v15, %v5419_v16 }
0x1cba   : > { %6814 = vmatmul.msk.f32.vlgmr.msrb.gmra.mxu2 %vm387_vm0, %v5444_v17 }
0x1d3d   : > { %v5469_v18 = vpop.f32.mrf.mxu2 }
0x1d3e   : > { %5472 = vst.msk [vmem:[%s359_s21] sm:$0x1] %vm5400_vm7, %v5469_v18 }
0x1d3f   : > { %7277 = shalt.err (!%p7274_p3)
}
0x1d40   : > { %7074 = dma.vmem_to_hbm [thread:$0]  (%p7405_p5), %s5485_s2, 16, %s5487_s24, %s5474_s14  }
0x1d41 PF: > { %p7080_p4 = scmp.ge.s32.totalorder %s7312_s12, 2  ;;  %s5498_s29 = sand.u32 1, %s7300_s30  }
0x1d42   : > { %s5499_s17 = scalar_lea.sflag [#allocation3], %s5498_s29 }
0x1d43   : > { %p7077_p7 = pnand %p7080_p4, %p7409_p6 }
0x1d45   : > { %p7078_p8 = pneg %p7077_p7 }
0x1d47   : > { %7295 = dma.done.wait (%p7078_p8), %s5499_s17, 16  }
0x1d48   : > { %7297 = vsyncadd (%p7078_p8), %s5499_s17, 4294967280  ;;  %p19_p9 = scmp.ge.s32.totalorder %s7392_s15, 4   ;;  %s9610_s30 = smov %s7304_s10 }
0x1d49   : > { %s9611_s10 = smov %s7308_s11  ;;  %s9612_s11 = smov %s7403_s18 }
0x1d4a   : > { %s9613_s12 = smov %s7392_s15  ;;  %21 = sbr.rel (!%p19_p9) target bundleno = 5 (0x5), region = 102 }
0x1d4f   :  { %5504 = vsyncpa [#allocation3], 1 }
0x1d50   :  { %5506 = vsyncpa [#allocation3 + $0x1], 1 }

</bundles_post_ra>
